<compile_context>
chip_gen: v7x
topology: tpu7x:2x2x1
jax: 0.10.0
libtpu: 0.0.40
codegen_flags: <defaults>
</compile_context>

<pallas_src>
import functools
import math

import jax
import jax.numpy as jnp
from jax.experimental import pallas as pl
from jax.experimental.pallas import tpu as pltpu

# Small BERT/Contriever-like config (lane-dense: H and I are multiples of 128).
VOCAB = 100
TYPE_VOCAB = 2
MAX_POS = 64
HIDDEN = 128
NUM_HEADS = 4
HEAD_DIM = HIDDEN // NUM_HEADS
INTERMEDIATE = 512
NUM_LAYERS = 2
LN_EPS = 1e-12
ATTN_SCALE = 1.0 / math.sqrt(HEAD_DIM)


# ---------------- in-kernel helpers ----------------

def _layernorm(x, g, b):
    mu = jnp.mean(x, axis=-1, keepdims=True)
    var = jnp.mean((x - mu) ** 2, axis=-1, keepdims=True)
    return (x - mu) * jax.lax.rsqrt(var + LN_EPS) * g + b


def _gelu(x):
    # TODO(synk): HF Contriever uses exact erf-GELU; tanh approximation used for a portable EUP path.
    return 0.5 * x * (1.0 + jnp.tanh(0.7978845608028654 * (x + 0.044715 * x * x * x)))


# ---------------- the single fused kernel ----------------

def _contriever_kernel(emb_ref, mask_ref,
                       emb_ln_g_ref, emb_ln_b_ref,
                       wqkv_ref, bqkv_ref, wo_ref, bo_ref,
                       ln1_g_ref, ln1_b_ref,
                       w1_ref, b1_ref, w2_ref, b2_ref,
                       ln2_g_ref, ln2_b_ref,
                       out_ref, *, batch, seq):
    f32 = jnp.float32
    bf16 = jnp.bfloat16

    # emb_ref: [B*S, H] f32   mask_ref: [B, S] f32   out_ref: [B, H] f32
    h = _layernorm(emb_ref[...], emb_ln_g_ref[...], emb_ln_b_ref[...])        # [B*S, H] f32
    mask = mask_ref[...]                                                       # [B, S] f32

    # Additive attention-mask bias, fully broadcast ONCE and reused across layers/heads.
    bias = jnp.broadcast_to(((1.0 - mask) * -1e9)[:, None, :],
                            (batch, seq, seq))                                 # [B, S, S] f32

    # TODO(synk): at 12 real layers, replace this unrolled loop with a grid axis that streams
    #             one layer's weights at a time via BlockSpec index_map.
    for l in range(NUM_LAYERS):
        # ---- fused QKV projection: one [B*S, H] x [H, 3H] bf16 matmul, f32 accumulation ----
        h_b = h.astype(bf16)                                                   # cast hoisted
        qkv = jnp.dot(h_b, wqkv_ref[l], preferred_element_type=f32) + bqkv_ref[l]
        qkv_b = qkv.astype(bf16)                                               # single cast, sliced below

        # ---- attention: each head handles ALL batches with one batched einsum pair; the per-head
        #      context is folded into the output projection as a block-row of Wo (f32 accumulate),
        #      so there is no ctx scratch buffer and no narrow scatter stores. ----
        attn_out = jnp.broadcast_to(bo_ref[l], (batch * seq, HIDDEN)).astype(f32)
        for hh in range(NUM_HEADS):
            c0 = hh * HEAD_DIM
            q_h = qkv_b[:, c0:c0 + HEAD_DIM].reshape(batch, seq, HEAD_DIM)
            k_h = qkv_b[:, HIDDEN + c0:HIDDEN + c0 + HEAD_DIM].reshape(batch, seq, HEAD_DIM)
            v_h = qkv_b[:, 2 * HIDDEN + c0:2 * HIDDEN + c0 + HEAD_DIM].reshape(batch, seq, HEAD_DIM)

            s = jnp.einsum('bqd,bkd->bqk', q_h, k_h,
                           preferred_element_type=f32) * ATTN_SCALE + bias     # [B, S, S] f32
            m = jnp.max(s, axis=-1, keepdims=True)
            p = jnp.exp(s - m)
            p = p * pl.reciprocal(jnp.sum(p, axis=-1, keepdims=True), approx=True)

            ctx_h = jnp.einsum('bqk,bkd->bqd', p.astype(bf16), v_h,
                               preferred_element_type=f32)                     # [B, S, hd] f32
            attn_out = attn_out + jnp.dot(
                ctx_h.reshape(batch * seq, HEAD_DIM).astype(bf16),
                wo_ref[l, c0:c0 + HEAD_DIM, :],
                preferred_element_type=f32)                                    # [B*S, H] f32

        # ---- fused residual + LayerNorm ----
        h = _layernorm(h + attn_out, ln1_g_ref[l], ln1_b_ref[l])

        # ---- FFN (GELU fused in the matmul epilogue) + fused residual + LayerNorm ----
        inter = _gelu(jnp.dot(h.astype(bf16), w1_ref[l],
                              preferred_element_type=f32) + b1_ref[l])         # [B*S, I] f32
        ffn_out = jnp.dot(inter.astype(bf16), w2_ref[l],
                          preferred_element_type=f32) + b2_ref[l]              # [B*S, H] f32
        h = _layernorm(h + ffn_out, ln2_g_ref[l], ln2_b_ref[l])

    # ---- masked mean pooling: VPU multiply + XLU sublane reduce, one lane-dense [B, H] store ----
    # Contriever.mean_pooling: masked_fill(~mask, 0).sum(dim=1) / mask.sum(dim=1)
    h3 = h.reshape(batch, seq, HIDDEN)                                         # [B, S, H]
    summed = jnp.sum(h3 * mask[:, :, None], axis=1)                            # [B, H]
    denom = jnp.maximum(jnp.sum(mask, axis=1, keepdims=True), 1e-9)            # [B, 1], nan-safe
    out_ref[...] = summed / denom


# ---------------- parameters & forward (glue in plain JAX) ----------------

def init_params(key):
    std = 0.02
    L = NUM_LAYERS

    def norm(k, shape, dtype=jnp.float32):
        return (std * jax.random.normal(k, shape, jnp.float32)).astype(dtype)

    keys = iter(jax.random.split(key, 8))
    return {
        "word_emb": norm(next(keys), (VOCAB, HIDDEN)),
        "pos_emb": norm(next(keys), (MAX_POS, HIDDEN)),
        "type_emb": norm(next(keys), (TYPE_VOCAB, HIDDEN)),
        "emb_ln_g": jnp.ones((1, HIDDEN), jnp.float32),
        "emb_ln_b": jnp.zeros((1, HIDDEN), jnp.float32),
        # weights stacked over layers; matmul weights in bf16 (MXU operands), biases/LN in f32.
        "wqkv": norm(next(keys), (L, HIDDEN, 3 * HIDDEN), jnp.bfloat16),
        "bqkv": jnp.zeros((L, 1, 3 * HIDDEN), jnp.float32),
        "wo": norm(next(keys), (L, HIDDEN, HIDDEN), jnp.bfloat16),
        "bo": jnp.zeros((L, 1, HIDDEN), jnp.float32),
        "ln1_g": jnp.ones((L, 1, HIDDEN), jnp.float32),
        "ln1_b": jnp.zeros((L, 1, HIDDEN), jnp.float32),
        "w1": norm(next(keys), (L, HIDDEN, INTERMEDIATE), jnp.bfloat16),
        "b1": jnp.zeros((L, 1, INTERMEDIATE), jnp.float32),
        "w2": norm(next(keys), (L, INTERMEDIATE, HIDDEN), jnp.bfloat16),
        "b2": jnp.zeros((L, 1, HIDDEN), jnp.float32),
        "ln2_g": jnp.ones((L, 1, HIDDEN), jnp.float32),
        "ln2_b": jnp.zeros((L, 1, HIDDEN), jnp.float32),
    }


@jax.jit
def contriever_forward(params, input_ids, attention_mask):
    B, S = input_ids.shape
    # embedding lookups (gather) stay in plain JAX glue
    emb = (jnp.take(params["word_emb"], input_ids, axis=0)
           + params["pos_emb"][:S][None, :, :]
           + params["type_emb"][0][None, None, :])          # token_type_ids == 0
    emb = emb.reshape(B * S, HIDDEN)
    mask = attention_mask.astype(jnp.float32)                # [B, S]

    return pl.pallas_call(
        functools.partial(_contriever_kernel, batch=B, seq=S),
        out_shape=jax.ShapeDtypeStruct((B, HIDDEN), jnp.float32),
        compiler_params=pltpu.CompilerParams(vmem_limit_bytes=32 * 1024 * 1024),
    )(emb, mask,
      params["emb_ln_g"], params["emb_ln_b"],
      params["wqkv"], params["bqkv"], params["wo"], params["bo"],
      params["ln1_g"], params["ln1_b"],
      params["w1"], params["b1"], params["w2"], params["b2"],
      params["ln2_g"], params["ln2_b"])


if __name__ == "__main__":
    B, S = 2, 8
    key = jax.random.PRNGKey(0)
    pkey, idkey = jax.random.split(key)
    params = init_params(pkey)

    input_ids = jax.random.randint(idkey, (B, S), 0, VOCAB, dtype=jnp.int32)
    attention_mask = jnp.array([[1, 1, 1, 1, 1, 1, 1, 1],
                                [1, 1, 1, 1, 1, 0, 0, 0]], dtype=jnp.int32)

    out = contriever_forward(params, input_ids, attention_mask)
    out = jax.block_until_ready(out)
    assert out.shape == (B, HIDDEN), out.shape
    assert bool(jnp.all(jnp.isfinite(out)))
    print("KERNEL_OK")
</pallas_src>

<mosaic_0001>
module attributes {stable_mosaic.version = 11 : i64} {
  func.func @_contriever_kernel(%arg0: memref<16x128xf32, #tpu.memory_space<vmem>>, %arg1: memref<2x8xf32, #tpu.memory_space<vmem>>, %arg2: memref<1x128xf32, #tpu.memory_space<vmem>>, %arg3: memref<1x128xf32, #tpu.memory_space<vmem>>, %arg4: memref<2x128x384xbf16, #tpu.memory_space<vmem>>, %arg5: memref<2x1x384xf32, #tpu.memory_space<vmem>>, %arg6: memref<2x128x128xbf16, #tpu.memory_space<vmem>>, %arg7: memref<2x1x128xf32, #tpu.memory_space<vmem>>, %arg8: memref<2x1x128xf32, #tpu.memory_space<vmem>>, %arg9: memref<2x1x128xf32, #tpu.memory_space<vmem>>, %arg10: memref<2x128x512xbf16, #tpu.memory_space<vmem>>, %arg11: memref<2x1x512xf32, #tpu.memory_space<vmem>>, %arg12: memref<2x512x128xbf16, #tpu.memory_space<vmem>>, %arg13: memref<2x1x128xf32, #tpu.memory_space<vmem>>, %arg14: memref<2x1x128xf32, #tpu.memory_space<vmem>>, %arg15: memref<2x1x128xf32, #tpu.memory_space<vmem>>, %arg16: memref<2x128xf32, #tpu.memory_space<vmem>>) attributes {dimension_semantics = [], scalar_prefetch = 0 : i64, scratch_operands = 0 : i64, tpu.core_type = #tpu.core_type<tc>} {
    %c0 = arith.constant 0 : index
    %c0_0 = arith.constant 0 : index
    %0 = vector.load %arg0[%c0, %c0_0] : memref<16x128xf32, #tpu.memory_space<vmem>>, vector<16x128xf32>
    %c0_1 = arith.constant 0 : index
    %c0_2 = arith.constant 0 : index
    %1 = vector.load %arg2[%c0_1, %c0_2] : memref<1x128xf32, #tpu.memory_space<vmem>>, vector<1x128xf32>
    %c0_3 = arith.constant 0 : index
    %c0_4 = arith.constant 0 : index
    %2 = vector.load %arg3[%c0_3, %c0_4] : memref<1x128xf32, #tpu.memory_space<vmem>>, vector<1x128xf32>
    %cst = arith.constant dense<0.000000e+00> : vector<16xf32>
    %3 = vector.multi_reduction <add>, %0, %cst [1] : vector<16x128xf32> to vector<16xf32>
    %4 = vector.shape_cast %3 : vector<16xf32> to vector<16x1xf32>
    %cst_5 = arith.constant 1.280000e+02 : f32
    %5 = vector.broadcast %cst_5 : f32 to vector<16x1xf32>
    %6 = arith.divf %4, %5 : vector<16x1xf32>
    %7 = vector.broadcast %6 : vector<16x1xf32> to vector<16x128xf32>
    %8 = arith.subf %0, %7 : vector<16x128xf32>
    %9 = arith.mulf %8, %8 : vector<16x128xf32>
    %cst_6 = arith.constant dense<0.000000e+00> : vector<16xf32>
    %10 = vector.multi_reduction <add>, %9, %cst_6 [1] : vector<16x128xf32> to vector<16xf32>
    %11 = vector.shape_cast %10 : vector<16xf32> to vector<16x1xf32>
    %cst_7 = arith.constant 1.280000e+02 : f32
    %12 = vector.broadcast %cst_7 : f32 to vector<16x1xf32>
    %13 = arith.divf %11, %12 : vector<16x1xf32>
    %14 = vector.broadcast %6 : vector<16x1xf32> to vector<16x128xf32>
    %15 = arith.subf %0, %14 : vector<16x128xf32>
    %cst_8 = arith.constant 9.99999996E-13 : f32
    %16 = vector.broadcast %cst_8 : f32 to vector<16x1xf32>
    %17 = arith.addf %13, %16 : vector<16x1xf32>
    %18 = math.rsqrt %17 : vector<16x1xf32>
    %19 = vector.broadcast %18 : vector<16x1xf32> to vector<16x128xf32>
    %20 = arith.mulf %15, %19 : vector<16x128xf32>
    %21 = vector.broadcast %1 : vector<1x128xf32> to vector<16x128xf32>
    %22 = arith.mulf %20, %21 : vector<16x128xf32>
    %23 = vector.broadcast %2 : vector<1x128xf32> to vector<16x128xf32>
    %24 = arith.addf %22, %23 : vector<16x128xf32>
    %c0_9 = arith.constant 0 : index
    %c0_10 = arith.constant 0 : index
    %25 = vector.load %arg1[%c0_9, %c0_10] : memref<2x8xf32, #tpu.memory_space<vmem>>, vector<2x8xf32>
    %cst_11 = arith.constant 1.000000e+00 : f32
    %26 = vector.broadcast %cst_11 : f32 to vector<2x8xf32>
    %27 = arith.subf %26, %25 : vector<2x8xf32>
    %cst_12 = arith.constant -1.000000e+09 : f32
    %28 = vector.broadcast %cst_12 : f32 to vector<2x8xf32>
    %29 = arith.mulf %27, %28 : vector<2x8xf32>
    %30 = vector.shape_cast %29 : vector<2x8xf32> to vector<2x1x8xf32>
    %31 = vector.shape_cast %30 : vector<2x1x8xf32> to vector<2x1x8xf32>
    %32 = vector.broadcast %31 : vector<2x1x8xf32> to vector<2x8x8xf32>
    %33 = arith.truncf %24 : vector<16x128xf32> to vector<16x128xbf16>
    %c0_13 = arith.constant 0 : index
    %c0_14 = arith.constant 0 : index
    %c0_15 = arith.constant 0 : index
    %34 = vector.load %arg4[%c0_13, %c0_14, %c0_15] : memref<2x128x384xbf16, #tpu.memory_space<vmem>>, vector<1x128x384xbf16>
    %35 = vector.shape_cast %34 : vector<1x128x384xbf16> to vector<128x384xbf16>
    %cst_16 = arith.constant dense<0.000000e+00> : vector<16x384xf32>
    %36 = tpu.matmul %33, %35, %cst_16 {dimension_numbers = #tpu.dot_dimension_numbers<[1], [0], [0], [1], [0, 0, 1, 1], [], []>} : vector<16x128xbf16>, vector<128x384xbf16>, vector<16x384xf32> -> vector<16x384xf32>
    %c0_17 = arith.constant 0 : index
    %c0_18 = arith.constant 0 : index
    %c0_19 = arith.constant 0 : index
    %37 = vector.load %arg5[%c0_17, %c0_18, %c0_19] : memref<2x1x384xf32, #tpu.memory_space<vmem>>, vector<1x1x384xf32>
    %38 = vector.shape_cast %37 : vector<1x1x384xf32> to vector<1x384xf32>
    %39 = vector.broadcast %38 : vector<1x384xf32> to vector<16x384xf32>
    %40 = arith.addf %36, %39 : vector<16x384xf32>
    %41 = arith.truncf %40 : vector<16x384xf32> to vector<16x384xbf16>
    %c0_20 = arith.constant 0 : index
    %c0_21 = arith.constant 0 : index
    %c0_22 = arith.constant 0 : index
    %42 = vector.load %arg7[%c0_20, %c0_21, %c0_22] : memref<2x1x128xf32, #tpu.memory_space<vmem>>, vector<1x1x128xf32>
    %43 = vector.shape_cast %42 : vector<1x1x128xf32> to vector<1x128xf32>
    %44 = vector.shape_cast %43 : vector<1x128xf32> to vector<1x128xf32>
    %45 = vector.broadcast %44 : vector<1x128xf32> to vector<16x128xf32>
    %46 = vector.extract_strided_slice %41 {offsets = [0, 0], sizes = [16, 32], strides = [1, 1]} : vector<16x384xbf16> to vector<16x32xbf16>
    %47 = vector.shape_cast %46 : vector<16x32xbf16> to vector<2x8x32xbf16>
    %48 = vector.extract_strided_slice %41 {offsets = [0, 128], sizes = [16, 32], strides = [1, 1]} : vector<16x384xbf16> to vector<16x32xbf16>
    %49 = vector.shape_cast %48 : vector<16x32xbf16> to vector<2x8x32xbf16>
    %50 = vector.extract_strided_slice %41 {offsets = [0, 256], sizes = [16, 32], strides = [1, 1]} : vector<16x384xbf16> to vector<16x32xbf16>
    %51 = vector.shape_cast %50 : vector<16x32xbf16> to vector<2x8x32xbf16>
    "tpu.trace_start"() <{level = 10 : i32, message = "bqd,bkd->bqk"}> : () -> ()
    %cst_23 = arith.constant dense<0.000000e+00> : vector<2x8x8xf32>
    %52 = tpu.matmul %47, %49, %cst_23 {dimension_numbers = #tpu.dot_dimension_numbers<[2], [2], [1], [1], [0, 0, 0, 1, 1, 1], [0], [0]>} : vector<2x8x32xbf16>, vector<2x8x32xbf16>, vector<2x8x8xf32> -> vector<2x8x8xf32>
    "tpu.trace_stop"() : () -> ()
    %cst_24 = arith.constant 0.176776692 : f32
    %53 = vector.broadcast %cst_24 : f32 to vector<2x8x8xf32>
    %54 = arith.mulf %52, %53 : vector<2x8x8xf32>
    %55 = arith.addf %54, %32 : vector<2x8x8xf32>
    %cst_25 = arith.constant dense<0xFF800000> : vector<2x8xf32>
    %56 = vector.multi_reduction <maximumf>, %55, %cst_25 [2] : vector<2x8x8xf32> to vector<2x8xf32>
    %57 = vector.shape_cast %56 : vector<2x8xf32> to vector<2x8x1xf32>
    %58 = vector.broadcast %57 : vector<2x8x1xf32> to vector<2x8x8xf32>
    %59 = arith.subf %55, %58 : vector<2x8x8xf32>
    %60 = math.exp %59 : vector<2x8x8xf32>
    %cst_26 = arith.constant dense<0.000000e+00> : vector<2x8xf32>
    %61 = vector.multi_reduction <add>, %60, %cst_26 [2] : vector<2x8x8xf32> to vector<2x8xf32>
    %62 = vector.shape_cast %61 : vector<2x8xf32> to vector<2x8x1xf32>
    %63 = tpu.reciprocal %62 {approx = true} : vector<2x8x1xf32> -> vector<2x8x1xf32>
    %64 = vector.broadcast %63 : vector<2x8x1xf32> to vector<2x8x8xf32>
    %65 = arith.mulf %60, %64 : vector<2x8x8xf32>
    %66 = arith.truncf %65 : vector<2x8x8xf32> to vector<2x8x8xbf16>
    "tpu.trace_start"() <{level = 10 : i32, message = "bqk,bkd->bqd"}> : () -> ()
    %cst_27 = arith.constant dense<0.000000e+00> : vector<2x8x32xf32>
    %67 = tpu.matmul %66, %51, %cst_27 {dimension_numbers = #tpu.dot_dimension_numbers<[2], [1], [1], [2], [0, 0, 0, 1, 1, 2], [0], [0]>} : vector<2x8x8xbf16>, vector<2x8x32xbf16>, vector<2x8x32xf32> -> vector<2x8x32xf32>
    "tpu.trace_stop"() : () -> ()
    %68 = vector.shape_cast %67 : vector<2x8x32xf32> to vector<16x32xf32>
    %69 = arith.truncf %68 : vector<16x32xf32> to vector<16x32xbf16>
    %c0_28 = arith.constant 0 : index
    %c0_29 = arith.constant 0 : index
    %c0_30 = arith.constant 0 : index
    %70 = vector.load %arg6[%c0_28, %c0_29, %c0_30] : memref<2x128x128xbf16, #tpu.memory_space<vmem>>, vector<1x32x128xbf16>
    %71 = vector.shape_cast %70 : vector<1x32x128xbf16> to vector<32x128xbf16>
    %cst_31 = arith.constant dense<0.000000e+00> : vector<16x128xf32>
    %72 = tpu.matmul %69, %71, %cst_31 {dimension_numbers = #tpu.dot_dimension_numbers<[1], [0], [0], [1], [0, 0, 1, 1], [], []>} : vector<16x32xbf16>, vector<32x128xbf16>, vector<16x128xf32> -> vector<16x128xf32>
    %73 = arith.addf %45, %72 : vector<16x128xf32>
    %74 = vector.extract_strided_slice %41 {offsets = [0, 32], sizes = [16, 32], strides = [1, 1]} : vector<16x384xbf16> to vector<16x32xbf16>
    %75 = vector.shape_cast %74 : vector<16x32xbf16> to vector<2x8x32xbf16>
    %76 = vector.extract_strided_slice %41 {offsets = [0, 160], sizes = [16, 32], strides = [1, 1]} : vector<16x384xbf16> to vector<16x32xbf16>
    %77 = vector.shape_cast %76 : vector<16x32xbf16> to vector<2x8x32xbf16>
    %78 = vector.extract_strided_slice %41 {offsets = [0, 288], sizes = [16, 32], strides = [1, 1]} : vector<16x384xbf16> to vector<16x32xbf16>
    %79 = vector.shape_cast %78 : vector<16x32xbf16> to vector<2x8x32xbf16>
    "tpu.trace_start"() <{level = 10 : i32, message = "bqd,bkd->bqk"}> : () -> ()
    %cst_32 = arith.constant dense<0.000000e+00> : vector<2x8x8xf32>
    %80 = tpu.matmul %75, %77, %cst_32 {dimension_numbers = #tpu.dot_dimension_numbers<[2], [2], [1], [1], [0, 0, 0, 1, 1, 1], [0], [0]>} : vector<2x8x32xbf16>, vector<2x8x32xbf16>, vector<2x8x8xf32> -> vector<2x8x8xf32>
    "tpu.trace_stop"() : () -> ()
    %cst_33 = arith.constant 0.176776692 : f32
    %81 = vector.broadcast %cst_33 : f32 to vector<2x8x8xf32>
    %82 = arith.mulf %80, %81 : vector<2x8x8xf32>
    %83 = arith.addf %82, %32 : vector<2x8x8xf32>
    %cst_34 = arith.constant dense<0xFF800000> : vector<2x8xf32>
    %84 = vector.multi_reduction <maximumf>, %83, %cst_34 [2] : vector<2x8x8xf32> to vector<2x8xf32>
    %85 = vector.shape_cast %84 : vector<2x8xf32> to vector<2x8x1xf32>
    %86 = vector.broadcast %85 : vector<2x8x1xf32> to vector<2x8x8xf32>
    %87 = arith.subf %83, %86 : vector<2x8x8xf32>
    %88 = math.exp %87 : vector<2x8x8xf32>
    %cst_35 = arith.constant dense<0.000000e+00> : vector<2x8xf32>
    %89 = vector.multi_reduction <add>, %88, %cst_35 [2] : vector<2x8x8xf32> to vector<2x8xf32>
    %90 = vector.shape_cast %89 : vector<2x8xf32> to vector<2x8x1xf32>
    %91 = tpu.reciprocal %90 {approx = true} : vector<2x8x1xf32> -> vector<2x8x1xf32>
    %92 = vector.broadcast %91 : vector<2x8x1xf32> to vector<2x8x8xf32>
    %93 = arith.mulf %88, %92 : vector<2x8x8xf32>
    %94 = arith.truncf %93 : vector<2x8x8xf32> to vector<2x8x8xbf16>
    "tpu.trace_start"() <{level = 10 : i32, message = "bqk,bkd->bqd"}> : () -> ()
    %cst_36 = arith.constant dense<0.000000e+00> : vector<2x8x32xf32>
    %95 = tpu.matmul %94, %79, %cst_36 {dimension_numbers = #tpu.dot_dimension_numbers<[2], [1], [1], [2], [0, 0, 0, 1, 1, 2], [0], [0]>} : vector<2x8x8xbf16>, vector<2x8x32xbf16>, vector<2x8x32xf32> -> vector<2x8x32xf32>
    "tpu.trace_stop"() : () -> ()
    %96 = vector.shape_cast %95 : vector<2x8x32xf32> to vector<16x32xf32>
    %97 = arith.truncf %96 : vector<16x32xf32> to vector<16x32xbf16>
    %c0_37 = arith.constant 0 : index
    %c32 = arith.constant 32 : index
    %c0_38 = arith.constant 0 : index
    %98 = vector.load %arg6[%c0_37, %c32, %c0_38] : memref<2x128x128xbf16, #tpu.memory_space<vmem>>, vector<1x32x128xbf16>
    %99 = vector.shape_cast %98 : vector<1x32x128xbf16> to vector<32x128xbf16>
    %cst_39 = arith.constant dense<0.000000e+00> : vector<16x128xf32>
    %100 = tpu.matmul %97, %99, %cst_39 {dimension_numbers = #tpu.dot_dimension_numbers<[1], [0], [0], [1], [0, 0, 1, 1], [], []>} : vector<16x32xbf16>, vector<32x128xbf16>, vector<16x128xf32> -> vector<16x128xf32>
    %101 = arith.addf %73, %100 : vector<16x128xf32>
    %102 = vector.extract_strided_slice %41 {offsets = [0, 64], sizes = [16, 32], strides = [1, 1]} : vector<16x384xbf16> to vector<16x32xbf16>
    %103 = vector.shape_cast %102 : vector<16x32xbf16> to vector<2x8x32xbf16>
    %104 = vector.extract_strided_slice %41 {offsets = [0, 192], sizes = [16, 32], strides = [1, 1]} : vector<16x384xbf16> to vector<16x32xbf16>
    %105 = vector.shape_cast %104 : vector<16x32xbf16> to vector<2x8x32xbf16>
    %106 = vector.extract_strided_slice %41 {offsets = [0, 320], sizes = [16, 32], strides = [1, 1]} : vector<16x384xbf16> to vector<16x32xbf16>
    %107 = vector.shape_cast %106 : vector<16x32xbf16> to vector<2x8x32xbf16>
    "tpu.trace_start"() <{level = 10 : i32, message = "bqd,bkd->bqk"}> : () -> ()
    %cst_40 = arith.constant dense<0.000000e+00> : vector<2x8x8xf32>
    %108 = tpu.matmul %103, %105, %cst_40 {dimension_numbers = #tpu.dot_dimension_numbers<[2], [2], [1], [1], [0, 0, 0, 1, 1, 1], [0], [0]>} : vector<2x8x32xbf16>, vector<2x8x32xbf16>, vector<2x8x8xf32> -> vector<2x8x8xf32>
    "tpu.trace_stop"() : () -> ()
    %cst_41 = arith.constant 0.176776692 : f32
    %109 = vector.broadcast %cst_41 : f32 to vector<2x8x8xf32>
    %110 = arith.mulf %108, %109 : vector<2x8x8xf32>
    %111 = arith.addf %110, %32 : vector<2x8x8xf32>
    %cst_42 = arith.constant dense<0xFF800000> : vector<2x8xf32>
    %112 = vector.multi_reduction <maximumf>, %111, %cst_42 [2] : vector<2x8x8xf32> to vector<2x8xf32>
    %113 = vector.shape_cast %112 : vector<2x8xf32> to vector<2x8x1xf32>
    %114 = vector.broadcast %113 : vector<2x8x1xf32> to vector<2x8x8xf32>
    %115 = arith.subf %111, %114 : vector<2x8x8xf32>
    %116 = math.exp %115 : vector<2x8x8xf32>
    %cst_43 = arith.constant dense<0.000000e+00> : vector<2x8xf32>
    %117 = vector.multi_reduction <add>, %116, %cst_43 [2] : vector<2x8x8xf32> to vector<2x8xf32>
    %118 = vector.shape_cast %117 : vector<2x8xf32> to vector<2x8x1xf32>
    %119 = tpu.reciprocal %118 {approx = true} : vector<2x8x1xf32> -> vector<2x8x1xf32>
    %120 = vector.broadcast %119 : vector<2x8x1xf32> to vector<2x8x8xf32>
    %121 = arith.mulf %116, %120 : vector<2x8x8xf32>
    %122 = arith.truncf %121 : vector<2x8x8xf32> to vector<2x8x8xbf16>
    "tpu.trace_start"() <{level = 10 : i32, message = "bqk,bkd->bqd"}> : () -> ()
    %cst_44 = arith.constant dense<0.000000e+00> : vector<2x8x32xf32>
    %123 = tpu.matmul %122, %107, %cst_44 {dimension_numbers = #tpu.dot_dimension_numbers<[2], [1], [1], [2], [0, 0, 0, 1, 1, 2], [0], [0]>} : vector<2x8x8xbf16>, vector<2x8x32xbf16>, vector<2x8x32xf32> -> vector<2x8x32xf32>
    "tpu.trace_stop"() : () -> ()
    %124 = vector.shape_cast %123 : vector<2x8x32xf32> to vector<16x32xf32>
    %125 = arith.truncf %124 : vector<16x32xf32> to vector<16x32xbf16>
    %c0_45 = arith.constant 0 : index
    %c64 = arith.constant 64 : index
    %c0_46 = arith.constant 0 : index
    %126 = vector.load %arg6[%c0_45, %c64, %c0_46] : memref<2x128x128xbf16, #tpu.memory_space<vmem>>, vector<1x32x128xbf16>
    %127 = vector.shape_cast %126 : vector<1x32x128xbf16> to vector<32x128xbf16>
    %cst_47 = arith.constant dense<0.000000e+00> : vector<16x128xf32>
    %128 = tpu.matmul %125, %127, %cst_47 {dimension_numbers = #tpu.dot_dimension_numbers<[1], [0], [0], [1], [0, 0, 1, 1], [], []>} : vector<16x32xbf16>, vector<32x128xbf16>, vector<16x128xf32> -> vector<16x128xf32>
    %129 = arith.addf %101, %128 : vector<16x128xf32>
    %130 = vector.extract_strided_slice %41 {offsets = [0, 96], sizes = [16, 32], strides = [1, 1]} : vector<16x384xbf16> to vector<16x32xbf16>
    %131 = vector.shape_cast %130 : vector<16x32xbf16> to vector<2x8x32xbf16>
    %132 = vector.extract_strided_slice %41 {offsets = [0, 224], sizes = [16, 32], strides = [1, 1]} : vector<16x384xbf16> to vector<16x32xbf16>
    %133 = vector.shape_cast %132 : vector<16x32xbf16> to vector<2x8x32xbf16>
    %134 = vector.extract_strided_slice %41 {offsets = [0, 352], sizes = [16, 32], strides = [1, 1]} : vector<16x384xbf16> to vector<16x32xbf16>
    %135 = vector.shape_cast %134 : vector<16x32xbf16> to vector<2x8x32xbf16>
    "tpu.trace_start"() <{level = 10 : i32, message = "bqd,bkd->bqk"}> : () -> ()
    %cst_48 = arith.constant dense<0.000000e+00> : vector<2x8x8xf32>
    %136 = tpu.matmul %131, %133, %cst_48 {dimension_numbers = #tpu.dot_dimension_numbers<[2], [2], [1], [1], [0, 0, 0, 1, 1, 1], [0], [0]>} : vector<2x8x32xbf16>, vector<2x8x32xbf16>, vector<2x8x8xf32> -> vector<2x8x8xf32>
    "tpu.trace_stop"() : () -> ()
    %cst_49 = arith.constant 0.176776692 : f32
    %137 = vector.broadcast %cst_49 : f32 to vector<2x8x8xf32>
    %138 = arith.mulf %136, %137 : vector<2x8x8xf32>
    %139 = arith.addf %138, %32 : vector<2x8x8xf32>
    %cst_50 = arith.constant dense<0xFF800000> : vector<2x8xf32>
    %140 = vector.multi_reduction <maximumf>, %139, %cst_50 [2] : vector<2x8x8xf32> to vector<2x8xf32>
    %141 = vector.shape_cast %140 : vector<2x8xf32> to vector<2x8x1xf32>
    %142 = vector.broadcast %141 : vector<2x8x1xf32> to vector<2x8x8xf32>
    %143 = arith.subf %139, %142 : vector<2x8x8xf32>
    %144 = math.exp %143 : vector<2x8x8xf32>
    %cst_51 = arith.constant dense<0.000000e+00> : vector<2x8xf32>
    %145 = vector.multi_reduction <add>, %144, %cst_51 [2] : vector<2x8x8xf32> to vector<2x8xf32>
    %146 = vector.shape_cast %145 : vector<2x8xf32> to vector<2x8x1xf32>
    %147 = tpu.reciprocal %146 {approx = true} : vector<2x8x1xf32> -> vector<2x8x1xf32>
    %148 = vector.broadcast %147 : vector<2x8x1xf32> to vector<2x8x8xf32>
    %149 = arith.mulf %144, %148 : vector<2x8x8xf32>
    %150 = arith.truncf %149 : vector<2x8x8xf32> to vector<2x8x8xbf16>
    "tpu.trace_start"() <{level = 10 : i32, message = "bqk,bkd->bqd"}> : () -> ()
    %cst_52 = arith.constant dense<0.000000e+00> : vector<2x8x32xf32>
    %151 = tpu.matmul %150, %135, %cst_52 {dimension_numbers = #tpu.dot_dimension_numbers<[2], [1], [1], [2], [0, 0, 0, 1, 1, 2], [0], [0]>} : vector<2x8x8xbf16>, vector<2x8x32xbf16>, vector<2x8x32xf32> -> vector<2x8x32xf32>
    "tpu.trace_stop"() : () -> ()
    %152 = vector.shape_cast %151 : vector<2x8x32xf32> to vector<16x32xf32>
    %153 = arith.truncf %152 : vector<16x32xf32> to vector<16x32xbf16>
    %c0_53 = arith.constant 0 : index
    %c96 = arith.constant 96 : index
    %c0_54 = arith.constant 0 : index
    %154 = vector.load %arg6[%c0_53, %c96, %c0_54] : memref<2x128x128xbf16, #tpu.memory_space<vmem>>, vector<1x32x128xbf16>
    %155 = vector.shape_cast %154 : vector<1x32x128xbf16> to vector<32x128xbf16>
    %cst_55 = arith.constant dense<0.000000e+00> : vector<16x128xf32>
    %156 = tpu.matmul %153, %155, %cst_55 {dimension_numbers = #tpu.dot_dimension_numbers<[1], [0], [0], [1], [0, 0, 1, 1], [], []>} : vector<16x32xbf16>, vector<32x128xbf16>, vector<16x128xf32> -> vector<16x128xf32>
    %157 = arith.addf %129, %156 : vector<16x128xf32>
    %158 = arith.addf %24, %157 : vector<16x128xf32>
    %c0_56 = arith.constant 0 : index
    %c0_57 = arith.constant 0 : index
    %c0_58 = arith.constant 0 : index
    %159 = vector.load %arg8[%c0_56, %c0_57, %c0_58] : memref<2x1x128xf32, #tpu.memory_space<vmem>>, vector<1x1x128xf32>
    %160 = vector.shape_cast %159 : vector<1x1x128xf32> to vector<1x128xf32>
    %c0_59 = arith.constant 0 : index
    %c0_60 = arith.constant 0 : index
    %c0_61 = arith.constant 0 : index
    %161 = vector.load %arg9[%c0_59, %c0_60, %c0_61] : memref<2x1x128xf32, #tpu.memory_space<vmem>>, vector<1x1x128xf32>
    %162 = vector.shape_cast %161 : vector<1x1x128xf32> to vector<1x128xf32>
    %cst_62 = arith.constant dense<0.000000e+00> : vector<16xf32>
    %163 = vector.multi_reduction <add>, %158, %cst_62 [1] : vector<16x128xf32> to vector<16xf32>
    %164 = vector.shape_cast %163 : vector<16xf32> to vector<16x1xf32>
    %cst_63 = arith.constant 1.280000e+02 : f32
    %165 = vector.broadcast %cst_63 : f32 to vector<16x1xf32>
    %166 = arith.divf %164, %165 : vector<16x1xf32>
    %167 = vector.broadcast %166 : vector<16x1xf32> to vector<16x128xf32>
    %168 = arith.subf %158, %167 : vector<16x128xf32>
    %169 = arith.mulf %168, %168 : vector<16x128xf32>
    %cst_64 = arith.constant dense<0.000000e+00> : vector<16xf32>
    %170 = vector.multi_reduction <add>, %169, %cst_64 [1] : vector<16x128xf32> to vector<16xf32>
    %171 = vector.shape_cast %170 : vector<16xf32> to vector<16x1xf32>
    %cst_65 = arith.constant 1.280000e+02 : f32
    %172 = vector.broadcast %cst_65 : f32 to vector<16x1xf32>
    %173 = arith.divf %171, %172 : vector<16x1xf32>
    %174 = vector.broadcast %166 : vector<16x1xf32> to vector<16x128xf32>
    %175 = arith.subf %158, %174 : vector<16x128xf32>
    %cst_66 = arith.constant 9.99999996E-13 : f32
    %176 = vector.broadcast %cst_66 : f32 to vector<16x1xf32>
    %177 = arith.addf %173, %176 : vector<16x1xf32>
    %178 = math.rsqrt %177 : vector<16x1xf32>
    %179 = vector.broadcast %178 : vector<16x1xf32> to vector<16x128xf32>
    %180 = arith.mulf %175, %179 : vector<16x128xf32>
    %181 = vector.broadcast %160 : vector<1x128xf32> to vector<16x128xf32>
    %182 = arith.mulf %180, %181 : vector<16x128xf32>
    %183 = vector.broadcast %162 : vector<1x128xf32> to vector<16x128xf32>
    %184 = arith.addf %182, %183 : vector<16x128xf32>
    %185 = arith.truncf %184 : vector<16x128xf32> to vector<16x128xbf16>
    %c0_67 = arith.constant 0 : index
    %c0_68 = arith.constant 0 : index
    %c0_69 = arith.constant 0 : index
    %186 = vector.load %arg10[%c0_67, %c0_68, %c0_69] : memref<2x128x512xbf16, #tpu.memory_space<vmem>>, vector<1x128x512xbf16>
    %187 = vector.shape_cast %186 : vector<1x128x512xbf16> to vector<128x512xbf16>
    %cst_70 = arith.constant dense<0.000000e+00> : vector<16x512xf32>
    %188 = tpu.matmul %185, %187, %cst_70 {dimension_numbers = #tpu.dot_dimension_numbers<[1], [0], [0], [1], [0, 0, 1, 1], [], []>} : vector<16x128xbf16>, vector<128x512xbf16>, vector<16x512xf32> -> vector<16x512xf32>
    %c0_71 = arith.constant 0 : index
    %c0_72 = arith.constant 0 : index
    %c0_73 = arith.constant 0 : index
    %189 = vector.load %arg11[%c0_71, %c0_72, %c0_73] : memref<2x1x512xf32, #tpu.memory_space<vmem>>, vector<1x1x512xf32>
    %190 = vector.shape_cast %189 : vector<1x1x512xf32> to vector<1x512xf32>
    %191 = vector.broadcast %190 : vector<1x512xf32> to vector<16x512xf32>
    %192 = arith.addf %188, %191 : vector<16x512xf32>
    %cst_74 = arith.constant 5.000000e-01 : f32
    %193 = vector.broadcast %cst_74 : f32 to vector<16x512xf32>
    %194 = arith.mulf %193, %192 : vector<16x512xf32>
    %cst_75 = arith.constant 4.471500e-02 : f32
    %195 = vector.broadcast %cst_75 : f32 to vector<16x512xf32>
    %196 = arith.mulf %195, %192 : vector<16x512xf32>
    %197 = arith.mulf %196, %192 : vector<16x512xf32>
    %198 = arith.mulf %197, %192 : vector<16x512xf32>
    %199 = arith.addf %192, %198 : vector<16x512xf32>
    %cst_76 = arith.constant 0.797884583 : f32
    %200 = vector.broadcast %cst_76 : f32 to vector<16x512xf32>
    %201 = arith.mulf %200, %199 : vector<16x512xf32>
    %202 = math.tanh %201 : vector<16x512xf32>
    %cst_77 = arith.constant 1.000000e+00 : f32
    %203 = vector.broadcast %cst_77 : f32 to vector<16x512xf32>
    %204 = arith.addf %203, %202 : vector<16x512xf32>
    %205 = arith.mulf %194, %204 : vector<16x512xf32>
    %206 = arith.truncf %205 : vector<16x512xf32> to vector<16x512xbf16>
    %c0_78 = arith.constant 0 : index
    %c0_79 = arith.constant 0 : index
    %c0_80 = arith.constant 0 : index
    %207 = vector.load %arg12[%c0_78, %c0_79, %c0_80] : memref<2x512x128xbf16, #tpu.memory_space<vmem>>, vector<1x512x128xbf16>
    %208 = vector.shape_cast %207 : vector<1x512x128xbf16> to vector<512x128xbf16>
    %cst_81 = arith.constant dense<0.000000e+00> : vector<16x128xf32>
    %209 = tpu.matmul %206, %208, %cst_81 {dimension_numbers = #tpu.dot_dimension_numbers<[1], [0], [0], [1], [0, 0, 1, 1], [], []>} : vector<16x512xbf16>, vector<512x128xbf16>, vector<16x128xf32> -> vector<16x128xf32>
    %c0_82 = arith.constant 0 : index
    %c0_83 = arith.constant 0 : index
    %c0_84 = arith.constant 0 : index
    %210 = vector.load %arg13[%c0_82, %c0_83, %c0_84] : memref<2x1x128xf32, #tpu.memory_space<vmem>>, vector<1x1x128xf32>
    %211 = vector.shape_cast %210 : vector<1x1x128xf32> to vector<1x128xf32>
    %212 = vector.broadcast %211 : vector<1x128xf32> to vector<16x128xf32>
    %213 = arith.addf %209, %212 : vector<16x128xf32>
    %214 = arith.addf %184, %213 : vector<16x128xf32>
    %c0_85 = arith.constant 0 : index
    %c0_86 = arith.constant 0 : index
    %c0_87 = arith.constant 0 : index
    %215 = vector.load %arg14[%c0_85, %c0_86, %c0_87] : memref<2x1x128xf32, #tpu.memory_space<vmem>>, vector<1x1x128xf32>
    %216 = vector.shape_cast %215 : vector<1x1x128xf32> to vector<1x128xf32>
    %c0_88 = arith.constant 0 : index
    %c0_89 = arith.constant 0 : index
    %c0_90 = arith.constant 0 : index
    %217 = vector.load %arg15[%c0_88, %c0_89, %c0_90] : memref<2x1x128xf32, #tpu.memory_space<vmem>>, vector<1x1x128xf32>
    %218 = vector.shape_cast %217 : vector<1x1x128xf32> to vector<1x128xf32>
    %cst_91 = arith.constant dense<0.000000e+00> : vector<16xf32>
    %219 = vector.multi_reduction <add>, %214, %cst_91 [1] : vector<16x128xf32> to vector<16xf32>
    %220 = vector.shape_cast %219 : vector<16xf32> to vector<16x1xf32>
    %cst_92 = arith.constant 1.280000e+02 : f32
    %221 = vector.broadcast %cst_92 : f32 to vector<16x1xf32>
    %222 = arith.divf %220, %221 : vector<16x1xf32>
    %223 = vector.broadcast %222 : vector<16x1xf32> to vector<16x128xf32>
    %224 = arith.subf %214, %223 : vector<16x128xf32>
    %225 = arith.mulf %224, %224 : vector<16x128xf32>
    %cst_93 = arith.constant dense<0.000000e+00> : vector<16xf32>
    %226 = vector.multi_reduction <add>, %225, %cst_93 [1] : vector<16x128xf32> to vector<16xf32>
    %227 = vector.shape_cast %226 : vector<16xf32> to vector<16x1xf32>
    %cst_94 = arith.constant 1.280000e+02 : f32
    %228 = vector.broadcast %cst_94 : f32 to vector<16x1xf32>
    %229 = arith.divf %227, %228 : vector<16x1xf32>
    %230 = vector.broadcast %222 : vector<16x1xf32> to vector<16x128xf32>
    %231 = arith.subf %214, %230 : vector<16x128xf32>
    %cst_95 = arith.constant 9.99999996E-13 : f32
    %232 = vector.broadcast %cst_95 : f32 to vector<16x1xf32>
    %233 = arith.addf %229, %232 : vector<16x1xf32>
    %234 = math.rsqrt %233 : vector<16x1xf32>
    %235 = vector.broadcast %234 : vector<16x1xf32> to vector<16x128xf32>
    %236 = arith.mulf %231, %235 : vector<16x128xf32>
    %237 = vector.broadcast %216 : vector<1x128xf32> to vector<16x128xf32>
    %238 = arith.mulf %236, %237 : vector<16x128xf32>
    %239 = vector.broadcast %218 : vector<1x128xf32> to vector<16x128xf32>
    %240 = arith.addf %238, %239 : vector<16x128xf32>
    %241 = arith.truncf %240 : vector<16x128xf32> to vector<16x128xbf16>
    %c1 = arith.constant 1 : index
    %c0_96 = arith.constant 0 : index
    %c0_97 = arith.constant 0 : index
    %242 = vector.load %arg4[%c1, %c0_96, %c0_97] : memref<2x128x384xbf16, #tpu.memory_space<vmem>>, vector<1x128x384xbf16>
    %243 = vector.shape_cast %242 : vector<1x128x384xbf16> to vector<128x384xbf16>
    %cst_98 = arith.constant dense<0.000000e+00> : vector<16x384xf32>
    %244 = tpu.matmul %241, %243, %cst_98 {dimension_numbers = #tpu.dot_dimension_numbers<[1], [0], [0], [1], [0, 0, 1, 1], [], []>} : vector<16x128xbf16>, vector<128x384xbf16>, vector<16x384xf32> -> vector<16x384xf32>
    %c1_99 = arith.constant 1 : index
    %c0_100 = arith.constant 0 : index
    %c0_101 = arith.constant 0 : index
    %245 = vector.load %arg5[%c1_99, %c0_100, %c0_101] : memref<2x1x384xf32, #tpu.memory_space<vmem>>, vector<1x1x384xf32>
    %246 = vector.shape_cast %245 : vector<1x1x384xf32> to vector<1x384xf32>
    %247 = vector.broadcast %246 : vector<1x384xf32> to vector<16x384xf32>
    %248 = arith.addf %244, %247 : vector<16x384xf32>
    %249 = arith.truncf %248 : vector<16x384xf32> to vector<16x384xbf16>
    %c1_102 = arith.constant 1 : index
    %c0_103 = arith.constant 0 : index
    %c0_104 = arith.constant 0 : index
    %250 = vector.load %arg7[%c1_102, %c0_103, %c0_104] : memref<2x1x128xf32, #tpu.memory_space<vmem>>, vector<1x1x128xf32>
    %251 = vector.shape_cast %250 : vector<1x1x128xf32> to vector<1x128xf32>
    %252 = vector.shape_cast %251 : vector<1x128xf32> to vector<1x128xf32>
    %253 = vector.broadcast %252 : vector<1x128xf32> to vector<16x128xf32>
    %254 = vector.extract_strided_slice %249 {offsets = [0, 0], sizes = [16, 32], strides = [1, 1]} : vector<16x384xbf16> to vector<16x32xbf16>
    %255 = vector.shape_cast %254 : vector<16x32xbf16> to vector<2x8x32xbf16>
    %256 = vector.extract_strided_slice %249 {offsets = [0, 128], sizes = [16, 32], strides = [1, 1]} : vector<16x384xbf16> to vector<16x32xbf16>
    %257 = vector.shape_cast %256 : vector<16x32xbf16> to vector<2x8x32xbf16>
    %258 = vector.extract_strided_slice %249 {offsets = [0, 256], sizes = [16, 32], strides = [1, 1]} : vector<16x384xbf16> to vector<16x32xbf16>
    %259 = vector.shape_cast %258 : vector<16x32xbf16> to vector<2x8x32xbf16>
    "tpu.trace_start"() <{level = 10 : i32, message = "bqd,bkd->bqk"}> : () -> ()
    %cst_105 = arith.constant dense<0.000000e+00> : vector<2x8x8xf32>
    %260 = tpu.matmul %255, %257, %cst_105 {dimension_numbers = #tpu.dot_dimension_numbers<[2], [2], [1], [1], [0, 0, 0, 1, 1, 1], [0], [0]>} : vector<2x8x32xbf16>, vector<2x8x32xbf16>, vector<2x8x8xf32> -> vector<2x8x8xf32>
    "tpu.trace_stop"() : () -> ()
    %cst_106 = arith.constant 0.176776692 : f32
    %261 = vector.broadcast %cst_106 : f32 to vector<2x8x8xf32>
    %262 = arith.mulf %260, %261 : vector<2x8x8xf32>
    %263 = arith.addf %262, %32 : vector<2x8x8xf32>
    %cst_107 = arith.constant dense<0xFF800000> : vector<2x8xf32>
    %264 = vector.multi_reduction <maximumf>, %263, %cst_107 [2] : vector<2x8x8xf32> to vector<2x8xf32>
    %265 = vector.shape_cast %264 : vector<2x8xf32> to vector<2x8x1xf32>
    %266 = vector.broadcast %265 : vector<2x8x1xf32> to vector<2x8x8xf32>
    %267 = arith.subf %263, %266 : vector<2x8x8xf32>
    %268 = math.exp %267 : vector<2x8x8xf32>
    %cst_108 = arith.constant dense<0.000000e+00> : vector<2x8xf32>
    %269 = vector.multi_reduction <add>, %268, %cst_108 [2] : vector<2x8x8xf32> to vector<2x8xf32>
    %270 = vector.shape_cast %269 : vector<2x8xf32> to vector<2x8x1xf32>
    %271 = tpu.reciprocal %270 {approx = true} : vector<2x8x1xf32> -> vector<2x8x1xf32>
    %272 = vector.broadcast %271 : vector<2x8x1xf32> to vector<2x8x8xf32>
    %273 = arith.mulf %268, %272 : vector<2x8x8xf32>
    %274 = arith.truncf %273 : vector<2x8x8xf32> to vector<2x8x8xbf16>
    "tpu.trace_start"() <{level = 10 : i32, message = "bqk,bkd->bqd"}> : () -> ()
    %cst_109 = arith.constant dense<0.000000e+00> : vector<2x8x32xf32>
    %275 = tpu.matmul %274, %259, %cst_109 {dimension_numbers = #tpu.dot_dimension_numbers<[2], [1], [1], [2], [0, 0, 0, 1, 1, 2], [0], [0]>} : vector<2x8x8xbf16>, vector<2x8x32xbf16>, vector<2x8x32xf32> -> vector<2x8x32xf32>
    "tpu.trace_stop"() : () -> ()
    %276 = vector.shape_cast %275 : vector<2x8x32xf32> to vector<16x32xf32>
    %277 = arith.truncf %276 : vector<16x32xf32> to vector<16x32xbf16>
    %c1_110 = arith.constant 1 : index
    %c0_111 = arith.constant 0 : index
    %c0_112 = arith.constant 0 : index
    %278 = vector.load %arg6[%c1_110, %c0_111, %c0_112] : memref<2x128x128xbf16, #tpu.memory_space<vmem>>, vector<1x32x128xbf16>
    %279 = vector.shape_cast %278 : vector<1x32x128xbf16> to vector<32x128xbf16>
    %cst_113 = arith.constant dense<0.000000e+00> : vector<16x128xf32>
    %280 = tpu.matmul %277, %279, %cst_113 {dimension_numbers = #tpu.dot_dimension_numbers<[1], [0], [0], [1], [0, 0, 1, 1], [], []>} : vector<16x32xbf16>, vector<32x128xbf16>, vector<16x128xf32> -> vector<16x128xf32>
    %281 = arith.addf %253, %280 : vector<16x128xf32>
    %282 = vector.extract_strided_slice %249 {offsets = [0, 32], sizes = [16, 32], strides = [1, 1]} : vector<16x384xbf16> to vector<16x32xbf16>
    %283 = vector.shape_cast %282 : vector<16x32xbf16> to vector<2x8x32xbf16>
    %284 = vector.extract_strided_slice %249 {offsets = [0, 160], sizes = [16, 32], strides = [1, 1]} : vector<16x384xbf16> to vector<16x32xbf16>
    %285 = vector.shape_cast %284 : vector<16x32xbf16> to vector<2x8x32xbf16>
    %286 = vector.extract_strided_slice %249 {offsets = [0, 288], sizes = [16, 32], strides = [1, 1]} : vector<16x384xbf16> to vector<16x32xbf16>
    %287 = vector.shape_cast %286 : vector<16x32xbf16> to vector<2x8x32xbf16>
    "tpu.trace_start"() <{level = 10 : i32, message = "bqd,bkd->bqk"}> : () -> ()
    %cst_114 = arith.constant dense<0.000000e+00> : vector<2x8x8xf32>
    %288 = tpu.matmul %283, %285, %cst_114 {dimension_numbers = #tpu.dot_dimension_numbers<[2], [2], [1], [1], [0, 0, 0, 1, 1, 1], [0], [0]>} : vector<2x8x32xbf16>, vector<2x8x32xbf16>, vector<2x8x8xf32> -> vector<2x8x8xf32>
    "tpu.trace_stop"() : () -> ()
    %cst_115 = arith.constant 0.176776692 : f32
    %289 = vector.broadcast %cst_115 : f32 to vector<2x8x8xf32>
    %290 = arith.mulf %288, %289 : vector<2x8x8xf32>
    %291 = arith.addf %290, %32 : vector<2x8x8xf32>
    %cst_116 = arith.constant dense<0xFF800000> : vector<2x8xf32>
    %292 = vector.multi_reduction <maximumf>, %291, %cst_116 [2] : vector<2x8x8xf32> to vector<2x8xf32>
    %293 = vector.shape_cast %292 : vector<2x8xf32> to vector<2x8x1xf32>
    %294 = vector.broadcast %293 : vector<2x8x1xf32> to vector<2x8x8xf32>
    %295 = arith.subf %291, %294 : vector<2x8x8xf32>
    %296 = math.exp %295 : vector<2x8x8xf32>
    %cst_117 = arith.constant dense<0.000000e+00> : vector<2x8xf32>
    %297 = vector.multi_reduction <add>, %296, %cst_117 [2] : vector<2x8x8xf32> to vector<2x8xf32>
    %298 = vector.shape_cast %297 : vector<2x8xf32> to vector<2x8x1xf32>
    %299 = tpu.reciprocal %298 {approx = true} : vector<2x8x1xf32> -> vector<2x8x1xf32>
    %300 = vector.broadcast %299 : vector<2x8x1xf32> to vector<2x8x8xf32>
    %301 = arith.mulf %296, %300 : vector<2x8x8xf32>
    %302 = arith.truncf %301 : vector<2x8x8xf32> to vector<2x8x8xbf16>
    "tpu.trace_start"() <{level = 10 : i32, message = "bqk,bkd->bqd"}> : () -> ()
    %cst_118 = arith.constant dense<0.000000e+00> : vector<2x8x32xf32>
    %303 = tpu.matmul %302, %287, %cst_118 {dimension_numbers = #tpu.dot_dimension_numbers<[2], [1], [1], [2], [0, 0, 0, 1, 1, 2], [0], [0]>} : vector<2x8x8xbf16>, vector<2x8x32xbf16>, vector<2x8x32xf32> -> vector<2x8x32xf32>
    "tpu.trace_stop"() : () -> ()
    %304 = vector.shape_cast %303 : vector<2x8x32xf32> to vector<16x32xf32>
    %305 = arith.truncf %304 : vector<16x32xf32> to vector<16x32xbf16>
    %c1_119 = arith.constant 1 : index
    %c32_120 = arith.constant 32 : index
    %c0_121 = arith.constant 0 : index
    %306 = vector.load %arg6[%c1_119, %c32_120, %c0_121] : memref<2x128x128xbf16, #tpu.memory_space<vmem>>, vector<1x32x128xbf16>
    %307 = vector.shape_cast %306 : vector<1x32x128xbf16> to vector<32x128xbf16>
    %cst_122 = arith.constant dense<0.000000e+00> : vector<16x128xf32>
    %308 = tpu.matmul %305, %307, %cst_122 {dimension_numbers = #tpu.dot_dimension_numbers<[1], [0], [0], [1], [0, 0, 1, 1], [], []>} : vector<16x32xbf16>, vector<32x128xbf16>, vector<16x128xf32> -> vector<16x128xf32>
    %309 = arith.addf %281, %308 : vector<16x128xf32>
    %310 = vector.extract_strided_slice %249 {offsets = [0, 64], sizes = [16, 32], strides = [1, 1]} : vector<16x384xbf16> to vector<16x32xbf16>
    %311 = vector.shape_cast %310 : vector<16x32xbf16> to vector<2x8x32xbf16>
    %312 = vector.extract_strided_slice %249 {offsets = [0, 192], sizes = [16, 32], strides = [1, 1]} : vector<16x384xbf16> to vector<16x32xbf16>
    %313 = vector.shape_cast %312 : vector<16x32xbf16> to vector<2x8x32xbf16>
    %314 = vector.extract_strided_slice %249 {offsets = [0, 320], sizes = [16, 32], strides = [1, 1]} : vector<16x384xbf16> to vector<16x32xbf16>
    %315 = vector.shape_cast %314 : vector<16x32xbf16> to vector<2x8x32xbf16>
    "tpu.trace_start"() <{level = 10 : i32, message = "bqd,bkd->bqk"}> : () -> ()
    %cst_123 = arith.constant dense<0.000000e+00> : vector<2x8x8xf32>
    %316 = tpu.matmul %311, %313, %cst_123 {dimension_numbers = #tpu.dot_dimension_numbers<[2], [2], [1], [1], [0, 0, 0, 1, 1, 1], [0], [0]>} : vector<2x8x32xbf16>, vector<2x8x32xbf16>, vector<2x8x8xf32> -> vector<2x8x8xf32>
    "tpu.trace_stop"() : () -> ()
    %cst_124 = arith.constant 0.176776692 : f32
    %317 = vector.broadcast %cst_124 : f32 to vector<2x8x8xf32>
    %318 = arith.mulf %316, %317 : vector<2x8x8xf32>
    %319 = arith.addf %318, %32 : vector<2x8x8xf32>
    %cst_125 = arith.constant dense<0xFF800000> : vector<2x8xf32>
    %320 = vector.multi_reduction <maximumf>, %319, %cst_125 [2] : vector<2x8x8xf32> to vector<2x8xf32>
    %321 = vector.shape_cast %320 : vector<2x8xf32> to vector<2x8x1xf32>
    %322 = vector.broadcast %321 : vector<2x8x1xf32> to vector<2x8x8xf32>
    %323 = arith.subf %319, %322 : vector<2x8x8xf32>
    %324 = math.exp %323 : vector<2x8x8xf32>
    %cst_126 = arith.constant dense<0.000000e+00> : vector<2x8xf32>
    %325 = vector.multi_reduction <add>, %324, %cst_126 [2] : vector<2x8x8xf32> to vector<2x8xf32>
    %326 = vector.shape_cast %325 : vector<2x8xf32> to vector<2x8x1xf32>
    %327 = tpu.reciprocal %326 {approx = true} : vector<2x8x1xf32> -> vector<2x8x1xf32>
    %328 = vector.broadcast %327 : vector<2x8x1xf32> to vector<2x8x8xf32>
    %329 = arith.mulf %324, %328 : vector<2x8x8xf32>
    %330 = arith.truncf %329 : vector<2x8x8xf32> to vector<2x8x8xbf16>
    "tpu.trace_start"() <{level = 10 : i32, message = "bqk,bkd->bqd"}> : () -> ()
    %cst_127 = arith.constant dense<0.000000e+00> : vector<2x8x32xf32>
    %331 = tpu.matmul %330, %315, %cst_127 {dimension_numbers = #tpu.dot_dimension_numbers<[2], [1], [1], [2], [0, 0, 0, 1, 1, 2], [0], [0]>} : vector<2x8x8xbf16>, vector<2x8x32xbf16>, vector<2x8x32xf32> -> vector<2x8x32xf32>
    "tpu.trace_stop"() : () -> ()
    %332 = vector.shape_cast %331 : vector<2x8x32xf32> to vector<16x32xf32>
    %333 = arith.truncf %332 : vector<16x32xf32> to vector<16x32xbf16>
    %c1_128 = arith.constant 1 : index
    %c64_129 = arith.constant 64 : index
    %c0_130 = arith.constant 0 : index
    %334 = vector.load %arg6[%c1_128, %c64_129, %c0_130] : memref<2x128x128xbf16, #tpu.memory_space<vmem>>, vector<1x32x128xbf16>
    %335 = vector.shape_cast %334 : vector<1x32x128xbf16> to vector<32x128xbf16>
    %cst_131 = arith.constant dense<0.000000e+00> : vector<16x128xf32>
    %336 = tpu.matmul %333, %335, %cst_131 {dimension_numbers = #tpu.dot_dimension_numbers<[1], [0], [0], [1], [0, 0, 1, 1], [], []>} : vector<16x32xbf16>, vector<32x128xbf16>, vector<16x128xf32> -> vector<16x128xf32>
    %337 = arith.addf %309, %336 : vector<16x128xf32>
    %338 = vector.extract_strided_slice %249 {offsets = [0, 96], sizes = [16, 32], strides = [1, 1]} : vector<16x384xbf16> to vector<16x32xbf16>
    %339 = vector.shape_cast %338 : vector<16x32xbf16> to vector<2x8x32xbf16>
    %340 = vector.extract_strided_slice %249 {offsets = [0, 224], sizes = [16, 32], strides = [1, 1]} : vector<16x384xbf16> to vector<16x32xbf16>
    %341 = vector.shape_cast %340 : vector<16x32xbf16> to vector<2x8x32xbf16>
    %342 = vector.extract_strided_slice %249 {offsets = [0, 352], sizes = [16, 32], strides = [1, 1]} : vector<16x384xbf16> to vector<16x32xbf16>
    %343 = vector.shape_cast %342 : vector<16x32xbf16> to vector<2x8x32xbf16>
    "tpu.trace_start"() <{level = 10 : i32, message = "bqd,bkd->bqk"}> : () -> ()
    %cst_132 = arith.constant dense<0.000000e+00> : vector<2x8x8xf32>
    %344 = tpu.matmul %339, %341, %cst_132 {dimension_numbers = #tpu.dot_dimension_numbers<[2], [2], [1], [1], [0, 0, 0, 1, 1, 1], [0], [0]>} : vector<2x8x32xbf16>, vector<2x8x32xbf16>, vector<2x8x8xf32> -> vector<2x8x8xf32>
    "tpu.trace_stop"() : () -> ()
    %cst_133 = arith.constant 0.176776692 : f32
    %345 = vector.broadcast %cst_133 : f32 to vector<2x8x8xf32>
    %346 = arith.mulf %344, %345 : vector<2x8x8xf32>
    %347 = arith.addf %346, %32 : vector<2x8x8xf32>
    %cst_134 = arith.constant dense<0xFF800000> : vector<2x8xf32>
    %348 = vector.multi_reduction <maximumf>, %347, %cst_134 [2] : vector<2x8x8xf32> to vector<2x8xf32>
    %349 = vector.shape_cast %348 : vector<2x8xf32> to vector<2x8x1xf32>
    %350 = vector.broadcast %349 : vector<2x8x1xf32> to vector<2x8x8xf32>
    %351 = arith.subf %347, %350 : vector<2x8x8xf32>
    %352 = math.exp %351 : vector<2x8x8xf32>
    %cst_135 = arith.constant dense<0.000000e+00> : vector<2x8xf32>
    %353 = vector.multi_reduction <add>, %352, %cst_135 [2] : vector<2x8x8xf32> to vector<2x8xf32>
    %354 = vector.shape_cast %353 : vector<2x8xf32> to vector<2x8x1xf32>
    %355 = tpu.reciprocal %354 {approx = true} : vector<2x8x1xf32> -> vector<2x8x1xf32>
    %356 = vector.broadcast %355 : vector<2x8x1xf32> to vector<2x8x8xf32>
    %357 = arith.mulf %352, %356 : vector<2x8x8xf32>
    %358 = arith.truncf %357 : vector<2x8x8xf32> to vector<2x8x8xbf16>
    "tpu.trace_start"() <{level = 10 : i32, message = "bqk,bkd->bqd"}> : () -> ()
    %cst_136 = arith.constant dense<0.000000e+00> : vector<2x8x32xf32>
    %359 = tpu.matmul %358, %343, %cst_136 {dimension_numbers = #tpu.dot_dimension_numbers<[2], [1], [1], [2], [0, 0, 0, 1, 1, 2], [0], [0]>} : vector<2x8x8xbf16>, vector<2x8x32xbf16>, vector<2x8x32xf32> -> vector<2x8x32xf32>
    "tpu.trace_stop"() : () -> ()
    %360 = vector.shape_cast %359 : vector<2x8x32xf32> to vector<16x32xf32>
    %361 = arith.truncf %360 : vector<16x32xf32> to vector<16x32xbf16>
    %c1_137 = arith.constant 1 : index
    %c96_138 = arith.constant 96 : index
    %c0_139 = arith.constant 0 : index
    %362 = vector.load %arg6[%c1_137, %c96_138, %c0_139] : memref<2x128x128xbf16, #tpu.memory_space<vmem>>, vector<1x32x128xbf16>
    %363 = vector.shape_cast %362 : vector<1x32x128xbf16> to vector<32x128xbf16>
    %cst_140 = arith.constant dense<0.000000e+00> : vector<16x128xf32>
    %364 = tpu.matmul %361, %363, %cst_140 {dimension_numbers = #tpu.dot_dimension_numbers<[1], [0], [0], [1], [0, 0, 1, 1], [], []>} : vector<16x32xbf16>, vector<32x128xbf16>, vector<16x128xf32> -> vector<16x128xf32>
    %365 = arith.addf %337, %364 : vector<16x128xf32>
    %366 = arith.addf %240, %365 : vector<16x128xf32>
    %c1_141 = arith.constant 1 : index
    %c0_142 = arith.constant 0 : index
    %c0_143 = arith.constant 0 : index
    %367 = vector.load %arg8[%c1_141, %c0_142, %c0_143] : memref<2x1x128xf32, #tpu.memory_space<vmem>>, vector<1x1x128xf32>
    %368 = vector.shape_cast %367 : vector<1x1x128xf32> to vector<1x128xf32>
    %c1_144 = arith.constant 1 : index
    %c0_145 = arith.constant 0 : index
    %c0_146 = arith.constant 0 : index
    %369 = vector.load %arg9[%c1_144, %c0_145, %c0_146] : memref<2x1x128xf32, #tpu.memory_space<vmem>>, vector<1x1x128xf32>
    %370 = vector.shape_cast %369 : vector<1x1x128xf32> to vector<1x128xf32>
    %cst_147 = arith.constant dense<0.000000e+00> : vector<16xf32>
    %371 = vector.multi_reduction <add>, %366, %cst_147 [1] : vector<16x128xf32> to vector<16xf32>
    %372 = vector.shape_cast %371 : vector<16xf32> to vector<16x1xf32>
    %cst_148 = arith.constant 1.280000e+02 : f32
    %373 = vector.broadcast %cst_148 : f32 to vector<16x1xf32>
    %374 = arith.divf %372, %373 : vector<16x1xf32>
    %375 = vector.broadcast %374 : vector<16x1xf32> to vector<16x128xf32>
    %376 = arith.subf %366, %375 : vector<16x128xf32>
    %377 = arith.mulf %376, %376 : vector<16x128xf32>
    %cst_149 = arith.constant dense<0.000000e+00> : vector<16xf32>
    %378 = vector.multi_reduction <add>, %377, %cst_149 [1] : vector<16x128xf32> to vector<16xf32>
    %379 = vector.shape_cast %378 : vector<16xf32> to vector<16x1xf32>
    %cst_150 = arith.constant 1.280000e+02 : f32
    %380 = vector.broadcast %cst_150 : f32 to vector<16x1xf32>
    %381 = arith.divf %379, %380 : vector<16x1xf32>
    %382 = vector.broadcast %374 : vector<16x1xf32> to vector<16x128xf32>
    %383 = arith.subf %366, %382 : vector<16x128xf32>
    %cst_151 = arith.constant 9.99999996E-13 : f32
    %384 = vector.broadcast %cst_151 : f32 to vector<16x1xf32>
    %385 = arith.addf %381, %384 : vector<16x1xf32>
    %386 = math.rsqrt %385 : vector<16x1xf32>
    %387 = vector.broadcast %386 : vector<16x1xf32> to vector<16x128xf32>
    %388 = arith.mulf %383, %387 : vector<16x128xf32>
    %389 = vector.broadcast %368 : vector<1x128xf32> to vector<16x128xf32>
    %390 = arith.mulf %388, %389 : vector<16x128xf32>
    %391 = vector.broadcast %370 : vector<1x128xf32> to vector<16x128xf32>
    %392 = arith.addf %390, %391 : vector<16x128xf32>
    %393 = arith.truncf %392 : vector<16x128xf32> to vector<16x128xbf16>
    %c1_152 = arith.constant 1 : index
    %c0_153 = arith.constant 0 : index
    %c0_154 = arith.constant 0 : index
    %394 = vector.load %arg10[%c1_152, %c0_153, %c0_154] : memref<2x128x512xbf16, #tpu.memory_space<vmem>>, vector<1x128x512xbf16>
    %395 = vector.shape_cast %394 : vector<1x128x512xbf16> to vector<128x512xbf16>
    %cst_155 = arith.constant dense<0.000000e+00> : vector<16x512xf32>
    %396 = tpu.matmul %393, %395, %cst_155 {dimension_numbers = #tpu.dot_dimension_numbers<[1], [0], [0], [1], [0, 0, 1, 1], [], []>} : vector<16x128xbf16>, vector<128x512xbf16>, vector<16x512xf32> -> vector<16x512xf32>
    %c1_156 = arith.constant 1 : index
    %c0_157 = arith.constant 0 : index
    %c0_158 = arith.constant 0 : index
    %397 = vector.load %arg11[%c1_156, %c0_157, %c0_158] : memref<2x1x512xf32, #tpu.memory_space<vmem>>, vector<1x1x512xf32>
    %398 = vector.shape_cast %397 : vector<1x1x512xf32> to vector<1x512xf32>
    %399 = vector.broadcast %398 : vector<1x512xf32> to vector<16x512xf32>
    %400 = arith.addf %396, %399 : vector<16x512xf32>
    %cst_159 = arith.constant 5.000000e-01 : f32
    %401 = vector.broadcast %cst_159 : f32 to vector<16x512xf32>
    %402 = arith.mulf %401, %400 : vector<16x512xf32>
    %cst_160 = arith.constant 4.471500e-02 : f32
    %403 = vector.broadcast %cst_160 : f32 to vector<16x512xf32>
    %404 = arith.mulf %403, %400 : vector<16x512xf32>
    %405 = arith.mulf %404, %400 : vector<16x512xf32>
    %406 = arith.mulf %405, %400 : vector<16x512xf32>
    %407 = arith.addf %400, %406 : vector<16x512xf32>
    %cst_161 = arith.constant 0.797884583 : f32
    %408 = vector.broadcast %cst_161 : f32 to vector<16x512xf32>
    %409 = arith.mulf %408, %407 : vector<16x512xf32>
    %410 = math.tanh %409 : vector<16x512xf32>
    %cst_162 = arith.constant 1.000000e+00 : f32
    %411 = vector.broadcast %cst_162 : f32 to vector<16x512xf32>
    %412 = arith.addf %411, %410 : vector<16x512xf32>
    %413 = arith.mulf %402, %412 : vector<16x512xf32>
    %414 = arith.truncf %413 : vector<16x512xf32> to vector<16x512xbf16>
    %c1_163 = arith.constant 1 : index
    %c0_164 = arith.constant 0 : index
    %c0_165 = arith.constant 0 : index
    %415 = vector.load %arg12[%c1_163, %c0_164, %c0_165] : memref<2x512x128xbf16, #tpu.memory_space<vmem>>, vector<1x512x128xbf16>
    %416 = vector.shape_cast %415 : vector<1x512x128xbf16> to vector<512x128xbf16>
    %cst_166 = arith.constant dense<0.000000e+00> : vector<16x128xf32>
    %417 = tpu.matmul %414, %416, %cst_166 {dimension_numbers = #tpu.dot_dimension_numbers<[1], [0], [0], [1], [0, 0, 1, 1], [], []>} : vector<16x512xbf16>, vector<512x128xbf16>, vector<16x128xf32> -> vector<16x128xf32>
    %c1_167 = arith.constant 1 : index
    %c0_168 = arith.constant 0 : index
    %c0_169 = arith.constant 0 : index
    %418 = vector.load %arg13[%c1_167, %c0_168, %c0_169] : memref<2x1x128xf32, #tpu.memory_space<vmem>>, vector<1x1x128xf32>
    %419 = vector.shape_cast %418 : vector<1x1x128xf32> to vector<1x128xf32>
    %420 = vector.broadcast %419 : vector<1x128xf32> to vector<16x128xf32>
    %421 = arith.addf %417, %420 : vector<16x128xf32>
    %422 = arith.addf %392, %421 : vector<16x128xf32>
    %c1_170 = arith.constant 1 : index
    %c0_171 = arith.constant 0 : index
    %c0_172 = arith.constant 0 : index
    %423 = vector.load %arg14[%c1_170, %c0_171, %c0_172] : memref<2x1x128xf32, #tpu.memory_space<vmem>>, vector<1x1x128xf32>
    %424 = vector.shape_cast %423 : vector<1x1x128xf32> to vector<1x128xf32>
    %c1_173 = arith.constant 1 : index
    %c0_174 = arith.constant 0 : index
    %c0_175 = arith.constant 0 : index
    %425 = vector.load %arg15[%c1_173, %c0_174, %c0_175] : memref<2x1x128xf32, #tpu.memory_space<vmem>>, vector<1x1x128xf32>
    %426 = vector.shape_cast %425 : vector<1x1x128xf32> to vector<1x128xf32>
    %cst_176 = arith.constant dense<0.000000e+00> : vector<16xf32>
    %427 = vector.multi_reduction <add>, %422, %cst_176 [1] : vector<16x128xf32> to vector<16xf32>
    %428 = vector.shape_cast %427 : vector<16xf32> to vector<16x1xf32>
    %cst_177 = arith.constant 1.280000e+02 : f32
    %429 = vector.broadcast %cst_177 : f32 to vector<16x1xf32>
    %430 = arith.divf %428, %429 : vector<16x1xf32>
    %431 = vector.broadcast %430 : vector<16x1xf32> to vector<16x128xf32>
    %432 = arith.subf %422, %431 : vector<16x128xf32>
    %433 = arith.mulf %432, %432 : vector<16x128xf32>
    %cst_178 = arith.constant dense<0.000000e+00> : vector<16xf32>
    %434 = vector.multi_reduction <add>, %433, %cst_178 [1] : vector<16x128xf32> to vector<16xf32>
    %435 = vector.shape_cast %434 : vector<16xf32> to vector<16x1xf32>
    %cst_179 = arith.constant 1.280000e+02 : f32
    %436 = vector.broadcast %cst_179 : f32 to vector<16x1xf32>
    %437 = arith.divf %435, %436 : vector<16x1xf32>
    %438 = vector.broadcast %430 : vector<16x1xf32> to vector<16x128xf32>
    %439 = arith.subf %422, %438 : vector<16x128xf32>
    %cst_180 = arith.constant 9.99999996E-13 : f32
    %440 = vector.broadcast %cst_180 : f32 to vector<16x1xf32>
    %441 = arith.addf %437, %440 : vector<16x1xf32>
    %442 = math.rsqrt %441 : vector<16x1xf32>
    %443 = vector.broadcast %442 : vector<16x1xf32> to vector<16x128xf32>
    %444 = arith.mulf %439, %443 : vector<16x128xf32>
    %445 = vector.broadcast %424 : vector<1x128xf32> to vector<16x128xf32>
    %446 = arith.mulf %444, %445 : vector<16x128xf32>
    %447 = vector.broadcast %426 : vector<1x128xf32> to vector<16x128xf32>
    %448 = arith.addf %446, %447 : vector<16x128xf32>
    %449 = vector.shape_cast %448 : vector<16x128xf32> to vector<2x8x128xf32>
    %450 = vector.shape_cast %25 : vector<2x8xf32> to vector<2x8x1xf32>
    %451 = vector.broadcast %450 : vector<2x8x1xf32> to vector<2x8x128xf32>
    %452 = arith.mulf %449, %451 : vector<2x8x128xf32>
    %cst_181 = arith.constant dense<0.000000e+00> : vector<2x128xf32>
    %453 = vector.multi_reduction <add>, %452, %cst_181 [1] : vector<2x8x128xf32> to vector<2x128xf32>
    %cst_182 = arith.constant dense<0.000000e+00> : vector<2xf32>
    %454 = vector.multi_reduction <add>, %25, %cst_182 [1] : vector<2x8xf32> to vector<2xf32>
    %455 = vector.shape_cast %454 : vector<2xf32> to vector<2x1xf32>
    %cst_183 = arith.constant 9.99999971E-10 : f32
    %456 = vector.broadcast %cst_183 : f32 to vector<2x1xf32>
    %457 = arith.maximumf %455, %456 : vector<2x1xf32>
    %458 = vector.broadcast %457 : vector<2x1xf32> to vector<2x128xf32>
    %459 = arith.divf %453, %458 : vector<2x128xf32>
    %c0_184 = arith.constant 0 : index
    %c0_185 = arith.constant 0 : index
    %460 = vector.load %arg16[%c0_184, %c0_185] : memref<2x128xf32, #tpu.memory_space<vmem>>, vector<2x128xf32>
    tpu.vector_store %arg16[%c0_184, %c0_185], %459 {strides = array<i32>} : memref<2x128xf32, #tpu.memory_space<vmem>>, vector<2x128xf32>,
    return
  }
}

</mosaic_0001>

<bundles_post_ra>
// kernel: contriever_forward.1
= control target key start
LH: loop header
LB: loop body
LE: loop exit
PB: predicated region body
PF: predicated region fallthrough
CT: control target
= control target key end

     0   :  { %s6821_s0 = inlined_call_operand.vmem [shape: f32[16,128], index: 0, kind: input, shape index: {}]   ;;  %s6822_s1 = inlined_call_operand.vmem [shape: f32[2,8], index: 1, kind: input, shape index: {}]   ;;  %s6823_s2 = inlined_call_operand.vmem [shape: f32[1,128], index: 2, kind: input, shape index: {}]   ;;  %s6824_s3 = inlined_call_operand.vmem [shape: f32[1,128], index: 3, kind: input, shape index: {}]   ;;  %s6825_s4 = inlined_call_operand.hbm [shape: bf16[2,128,384], index: 4, kind: input, shape index: {}]   ;;  %s6826_s5 = inlined_call_operand.vmem [shape: f32[2,1,384], index: 5, kind: input, shape index: {}]   ;;  %s6827_s6 = inlined_call_operand.vmem [shape: bf16[2,128,128], index: 6, kind: input, shape index: {}]   ;;  %s6828_s7 = inlined_call_operand.vmem [shape: f32[2,1,128], index: 7, kind: input, shape index: {}]   ;;  %s6829_s8 = inlined_call_operand.vmem [shape: f32[2,1,128], index: 8, kind: input, shape index: {}]   ;;  %s6830_s9 = inlined_call_operand.vmem [shape: f32[2,1,128], index: 9, kind: input, shape index: {}]   ;;  %s6831_s10 = inlined_call_operand.hbm [shape: bf16[2,128,512], index: 10, kind: input, shape index: {}]   ;;  %s6832_s11 = inlined_call_operand.vmem [shape: f32[2,1,512], index: 11, kind: input, shape index: {}]   ;;  %s6833_s12 = inlined_call_operand.hbm [shape: bf16[2,512,128], index: 12, kind: input, shape index: {}]   ;;  %s6834_s13 = inlined_call_operand.vmem [shape: f32[2,1,128], index: 13, kind: input, shape index: {}]   ;;  %s6835_s14 = inlined_call_operand.vmem [shape: f32[2,1,128], index: 14, kind: input, shape index: {}]   ;;  %s6836_s15 = inlined_call_operand.vmem [shape: f32[2,1,128], index: 15, kind: input, shape index: {}]   ;;  %s6837_s16 = inlined_call_operand.hbm [shape: f32[2,128], index: 16, kind: output, shape index: {}]  }
   0x1   :  { %6839 = sst [smem:[#allocation12_spill]] %s6821_s0 }
   0x2   :  { %21 = vsyncpa [#allocation3], 0 }
   0x3   :  { %22 = vsyncpa [#allocation6], 0 }
   0x4   :  { %23 = vsyncpa [#allocation4], 0  ;;  %s5967_s21 = smov [#allocation5]   ;;  %s5873_s25 = scalar_lea.hbm %s6831_s10, 8192 }
   0x5   :  { %s59_s22 = sshll.u32 %s5967_s21, 4  ;;  %p5874_p0 = scmp.ne.s32.totalorder %s6831_s10, %s5873_s25  ;;  %s60_s22 = int_to_ptr.vmem [resolvable:$true] %s59_s22 }
   0x6   :  { %p5877_p1 = scmp.lt.u32.totalorder %s5873_s25, %s6831_s10 }
   0x8   :  { %p5879_p2 = pnand %p5877_p1, %p5874_p0 }
   0xa   :  { %5882 = shalt.err (!%p5879_p2)
}
   0xb   :  { %s5883_s30 = scalar_lea.vmem %s60_s22, 8192  ;;  %p5888_p4 = scmp.lt.s32.totalorder %s60_s22, %s60_s22 }
   0xc   :  { %p5884_p3 = scmp.ne.s32.totalorder %s60_s22, %s5883_s30  ;;  %p5889_p5 = scmp.lt.s32.totalorder %s5883_s30, %s5883_s30 }
   0xe   :  { %p5890_p6 = por %p5889_p5, %p5888_p4 }
  0x10   :  { %p5891_p7 = pnand %p5890_p6, %p5884_p3 }
  0x12   :  { %5894 = shalt.err (!%p5891_p7)
}
  0x13   :  { %s5968_s0 = smov 256   ;;  %s5969_s17 = smov 16  }
  0x14   :  { %65 = dma.hbm_to_vmem [thread:$0]  %s6831_s10, 8192, %s60_s22, [#allocation6], %s5968_s0, %s5968_s0, %s5969_s17  }
  0x15   :  { %s5970_s20 = smov [#allocation2]   ;;  %s5895_s25 = scalar_lea.hbm %s6825_s4, 6144 }
  0x16   :  { %s37_s21 = sshll.u32 %s5970_s20, 4  ;;  %p5896_p8 = scmp.ne.s32.totalorder %s6825_s4, %s5895_s25  ;;  %s38_s21 = int_to_ptr.vmem [resolvable:$true] %s37_s21 }
  0x17   :  { %p5899_p9 = scmp.lt.u32.totalorder %s5895_s25, %s6825_s4 }
  0x19   :  { %p5901_p10 = pnand %p5899_p9, %p5896_p8 }
  0x1b   :  { %5904 = shalt.err (!%p5901_p10)
}
  0x1c   :  { %s5905_s30 = scalar_lea.vmem %s38_s21, 6144  ;;  %p5910_p12 = scmp.lt.s32.totalorder %s38_s21, %s38_s21 }
  0x1d   :  { %p5906_p11 = scmp.ne.s32.totalorder %s38_s21, %s5905_s30  ;;  %p5911_p13 = scmp.lt.s32.totalorder %s5905_s30, %s5905_s30 }
  0x1f   :  { %p5912_p0 = por %p5911_p13, %p5910_p12 }
  0x21   :  { %p5913_p1 = pnand %p5912_p0, %p5906_p11 }
  0x23   :  { %5916 = shalt.err (!%p5913_p1)
}
  0x24   :  { %s5971_s10 = smov 192   ;;  %s5972_s22 = smov 12  }
  0x25   :  { %43 = dma.hbm_to_vmem [thread:$0]  %s6825_s4, 6144, %s38_s21, [#allocation3], %s5971_s10, %s5971_s10, %s5972_s22  }
  0x26   :  { %s5973_s18 = smov [#allocation7]   ;;  %s5917_s24 = scalar_lea.hbm %s6833_s12, 8192 }
  0x27   :  { %s73_s19 = sshll.u32 %s5973_s18, 4  ;;  %p5918_p2 = scmp.ne.s32.totalorder %s6833_s12, %s5917_s24  ;;  %s74_s19 = int_to_ptr.vmem [resolvable:$true] %s73_s19 }
  0x28   :  { %p5921_p3 = scmp.lt.u32.totalorder %s5917_s24, %s6833_s12 }
  0x2a   :  { %p5923_p4 = pnand %p5921_p3, %p5918_p2 }
  0x2c   :  { %5926 = shalt.err (!%p5923_p4)
}
  0x2d   :  { %s5927_s29 = scalar_lea.vmem %s74_s19, 8192  ;;  %p5932_p6 = scmp.lt.s32.totalorder %s74_s19, %s74_s19 }
  0x2e   :  { %p5928_p5 = scmp.ne.s32.totalorder %s74_s19, %s5927_s29  ;;  %p5933_p7 = scmp.lt.s32.totalorder %s5927_s29, %s5927_s29 }
  0x30   :  { %p5934_p8 = por %p5933_p7, %p5932_p6 }
  0x32   :  { %p5935_p9 = pnand %p5934_p8, %p5928_p5 }
  0x34   :  { %5938 = shalt.err (!%p5935_p9)
}
  0x35   :  { %s5974_s4 = smov 64   ;;  %s5975_s21 = smov 4  }
  0x36   :  { %79 = dma.hbm_to_vmem [thread:$0]  %s6833_s12, 8192, %s74_s19, [#allocation6], %s5974_s4, %s5974_s4, %s5975_s21  }
  0x37   :  { %5961 = dma.done.wait [#allocation3], 6144  }
  0x38   :  { %5962 = vsyncadd [#allocation3], 4294961152 }
  0x39   :  { %5963 = dma.done.wait [#allocation6], 16384  }
  0x3a   :  { %5964 = vsyncadd [#allocation6], 4294950912  ;;  %s6840_s17 = sld [smem:[#allocation12_spill]]  ;;  %v5512_v2 = vld [vmem:[#allocation2 + $0x4] ss:$12 sps:$4 sm:$0xff]   ;;  %v5976_v4 = vmov 0.0   ;;  %v146_v53 = vlaneseq }
  0x3b   :  { %v5514_v3 = vld [vmem:[#allocation2] ss:$12 sps:$4 sm:$0xff]   ;;  %5200 = vmatprep.subr.bf16.mxu1 %v5976_v4  ;;  %v5515_v5 = vld [vmem:[#allocation2 + $0x8] ss:$12 sps:$4 sm:$0xff]   ;;  %353 = vmatprep.subr.bf16.mxu0 %v5512_v2  ;;  %v5518_v15 = vld [vmem:[#allocation2 + $0x18] ss:$12 sps:$4 sm:$0xff]  }
  0x3c   :  { %v5516_v6 = vld [vmem:[#allocation2 + $0x1c] ss:$12 sps:$4 sm:$0xff]   ;;  %354 = vmatpush1.bf16.msra.mxu0 %v5514_v3  ;;  %5201 = vmatpush3.bf16.msra.mxu1 %v5515_v5  ;;  %v5519_v16 = vld [vmem:[#allocation2 + $0x20] ss:$12 sps:$4 sm:$0xff]   ;;  %v5523_v19 = vld [vmem:[#allocation2 + $0x38] ss:$12 sps:$4 sm:$0xff]  }
  0x3d   :  { %355 = vmatprep.subr.bf16.mxu0 %v5516_v6  ;;  %5202 = vmatprep.subr.bf16.mxu1 %v5976_v4  ;;  %v5520_v17 = vld [vmem:[#allocation2 + $0x34] ss:$12 sps:$4 sm:$0xff]   ;;  %v5522_v18 = vld [vmem:[#allocation2 + $0x30] ss:$12 sps:$4 sm:$0xff]   ;;  %v5524_v20 = vld [vmem:[#allocation2 + $0x4c] ss:$12 sps:$4 sm:$0xff]  }
  0x3e   :  { %v5526_v21 = vld [vmem:[#allocation2 + $0x48] ss:$12 sps:$4 sm:$0xff]   ;;  %v5527_v22 = vld [vmem:[#allocation2 + $0x50] ss:$12 sps:$4 sm:$0xff]   ;;  %v5530_v24 = vld [vmem:[#allocation2 + $0x60] ss:$12 sps:$4 sm:$0xff]  }
  0x3f   :  { %v5528_v23 = vld [vmem:[#allocation2 + $0x64] ss:$12 sps:$4 sm:$0xff]   ;;  %v5531_v25 = vld [vmem:[#allocation2 + $0x68] ss:$12 sps:$4 sm:$0xff]   ;;  %v5535_v28 = vld [vmem:[#allocation2 + $0x80] ss:$12 sps:$4 sm:$0xff]  }
  0x40   :  { %v96_v0 = vld [vmem:[%s6840_s17] sm:$0xff]  ;;  %v97_v1 = vld [vmem:[%s6840_s17 + $0x8] sm:$0xff]  ;;  %356 = vmatpush1.bf16.msra.mxu0 %v5518_v15  ;;  %5203 = vmatpush3.bf16.msra.mxu1 %v5519_v16  ;;  %v5977_v30 = vmov 0   ;;  %vm5978_vm0 = vmmov 0   ;;  %v5538_v31 = vld [vmem:[#allocation2 + $0x90] ss:$12 sps:$4 sm:$0xff]  }
  0x41   :  { %100 = vadd.xlane.f32.xlu0 %v96_v0  ;;  %5204 = vmatprep.subr.bf16.mxu1 %v5976_v4  ;;  %v5532_v26 = vld [vmem:[#allocation2 + $0x7c] ss:$12 sps:$4 sm:$0xff]   ;;  %v5534_v27 = vld [vmem:[#allocation2 + $0x78] ss:$12 sps:$4 sm:$0xff]   ;;  %v5536_v29 = vld [vmem:[#allocation2 + $0x94] ss:$12 sps:$4 sm:$0xff]  }
  0x42   :  { %357 = vmatprep.subr.bf16.mxu0 %v5520_v17  ;;  %385 = vmatprep.mubr.bf16.mxu0 %v5977_v30  ;;  %v5539_v32 = vld [vmem:[#allocation2 + $0x98] ss:$12 sps:$4 sm:$0xff]   ;;  %v5542_v34 = vld [vmem:[#allocation2 + $0xa8] ss:$12 sps:$4 sm:$0xff]   ;;  %v5543_v35 = vld [vmem:[#allocation2 + $0xb0] ss:$12 sps:$4 sm:$0xff]  }
  0x43   :  { %5216 = vmatprep.mubr.msk.bf16.mxu1 %vm5978_vm0, %v5976_v4  ;;  %v5540_v33 = vld [vmem:[#allocation2 + $0xac] ss:$12 sps:$4 sm:$0xff]   ;;  %v4712_v44 = vld [vmem:[%s6823_s2] ss:$0 sm:$0xff]  ;;  %v6151_v54 = vshrl.u32 %v146_v53, 7  ;;  %vm462_vm1 = vcmask 261120  }
  0x44   :  { %358 = vmatpush1.bf16.msra.mxu0 %v5522_v18  ;;  %5205 = vmatpush3.bf16.msra.mxu1 %v5523_v19  ;;  %v4713_v48 = vld [vmem:[%s6824_s3] ss:$0 sm:$0xff]  ;;  %vm587_vm2 = vcmask 1043456   ;;  %vm559_vm3 = vcmask 64512   ;;  %s5980_s27 = smov 96   ;;  %s5981_s12 = smov 32  }
  0x45   :  { %102 = vadd.xlane.f32.xlu0 %v97_v1  ;;  %5206 = vmatprep.subr.bf16.mxu1 %v5976_v4  ;;  %v6154_v55 = vsub.s32 1, %v6151_v54  ;;  %v208_v56 = vld [vmem:[%s6826_s5] sm:$0x7]  ;;  %v6160_v57 = vsub.s32 2, %v6151_v54  ;;  %v6164_v59 = vsub.s32 0, %v6151_v54  ;;  %vm4676_vm4 = vcmask 58368  }
  0x46   :  { %359 = vmatprep.subr.bf16.mxu0 %v5524_v20  ;;  %vm4692_vm5 = vcmask 1041409  }
  0x47   :  { %v217_v58 = vrot.slane %v208_v56, %v6154_v55 }
  0x48   :  { %360 = vmatpush1.bf16.msra.mxu0 %v5526_v21  ;;  %5207 = vmatpush3.bf16.msra.mxu1 %v5527_v22 }
  0x49   :  { %5208 = vmatprep.subr.bf16.mxu1 %v5976_v4  ;;  %361 = vmatprep.subr.bf16.mxu0 %v5528_v23  ;;  %v5979_v23 = vmov 1966171168  }
  0x4c   :  { %362 = vmatpush1.bf16.msra.mxu0 %v5530_v24  ;;  %5209 = vmatpush3.bf16.msra.mxu1 %v5531_v25  ;;  %v144_v24 = vunpack.c.l.s4 %v5979_v23  ;;  %v139_v25 = vld [vmem:[%s6822_s1] sm:$0x3] }
  0x4d   :  { %363 = vmatprep.subr.bf16.mxu0 %v5532_v26  ;;  %5210 = vmatprep.subr.bf16.mxu1 %v5976_v4  ;;  %v140_v26 = vsub.f32 1.0, %v139_v25 }
  0x50   :  { %364 = vmatpush1.bf16.msra.mxu0 %v5534_v27  ;;  %5211 = vmatpush3.bf16.msra.mxu1 %v5535_v28  ;;  %v145_v27 = vunpack.c.0.s8 %v144_v24  ;;  %v141_v28 = vmul.f32 -1e+09, %v140_v26 }
  0x51   :  { %365 = vmatprep.subr.bf16.mxu0 %v5536_v29  ;;  %5212 = vmatprep.subr.bf16.mxu1 %v5976_v4 }
  0x52   :  { %v148_v29 = vsub.s32 %v145_v27, %v6151_v54 }
  0x54   :  { %366 = vmatpush1.bf16.msra.mxu0 %v5538_v31  ;;  %5213 = vmatpush3.bf16.msra.mxu1 %v5539_v32  ;;  %v149_v31 = vrot.slane %v141_v28, %v148_v29 }
  0x55   :  { %367 = vmatprep.subr.bf16.mxu0 %v5540_v33  ;;  %5214 = vmatprep.subr.bf16.mxu1 %v5976_v4 }
  0x56   :  { %v150_v32 = vcombine.high %v149_v31, %v149_v31  ;;  %v157_v33 = vrot.slane %v149_v31, %v148_v29 }
  0x58   :  { %368 = vmatpush1.bf16.msra.mxu0 %v5542_v34  ;;  %5215 = vmatpush3.bf16.msra.mxu1 %v5543_v35  ;;  %v164_v34 = vrot.slane %v150_v32, %v148_v29  ;;  %v6205_v35 = vrot.slane %v157_v33, %v6164_v59 }
  0x59   :  { %5220 = vmatprep.subr.bf16.mxu0 %v5976_v4  ;;  %5226 = vmatprep.subr.bf16.mxu1 %v5976_v4 }
  0xce   :  { %v101_v7 = vpop.xlane.xlu0 %100 }
  0xcf   :  { %v105_v8 = vmul.f32 0.0078125, %v101_v7  ;;  %v213_v7 = vrot.slane %v208_v56, %v6164_v59 }
  0xd1   :  { %v6114_v9 = vsub.f32 %v96_v0, %v105_v8  ;;  %v221_v0 = vrot.slane %v208_v56, %v6160_v57 }
  0xd2   :  { %v103_v10 = vpop.xlane.xlu0 %102 }
  0xd3   :  { %v106_v11 = vmul.f32 0.0078125, %v103_v10  ;;  %v109_v12 = vmul.f32 %v6114_v9, %v6114_v9 }
  0xd5   :  { %v6118_v13 = vsub.f32 %v97_v1, %v106_v11  ;;  %111 = vadd.xlane.f32.xlu1 %v109_v12 }
  0xd7   :  { %v110_v14 = vmul.f32 %v6118_v13, %v6118_v13 }
  0xd9   :  { %113 = vadd.xlane.f32.xlu1 %v110_v14 }
 0x162   :  { %v112_v36 = vpop.xlane.xlu1 %111 }
 0x163   :  { %v115_v37 = vmul.f32 0.0078125, %v112_v36 }
 0x165   :  { %v117_v38 = vadd.f32 1e-12, %v115_v37 }
 0x166   :  { %v114_v39 = vpop.xlane.xlu1 %113 }
 0x167   :  { %5752 = vrsqrt.f32 %v117_v38  ;;  %v116_v40 = vmul.f32 0.0078125, %v114_v39  ;;  %v6208_v39 = vrot.slane %v164_v34, %v6164_v59 }
 0x169   :  { %v118_v41 = vadd.f32 1e-12, %v116_v40 }
 0x16b   :  { %5754 = vrsqrt.f32 %v118_v41 }
 0x171   :  { %v5753_v42 = vpop.eup %5752 }
 0x172   :  { %v121_v43 = vmul.f32 %v5753_v42, %v6114_v9 }
 0x174   :  { %v129_v47 = vmul.f32 %v4712_v44, %v121_v43 }
 0x175   :  { %v5755_v45 = vpop.eup %5754 }
 0x176   :  { %v122_v46 = vmul.f32 %v5755_v45, %v6118_v13  ;;  %v6141_v50 = vadd.f32 %v4713_v48, %v129_v47 }
 0x178   :  { %v130_v49 = vmul.f32 %v4712_v44, %v122_v46 }
 0x17a   :  { %v6143_v51 = vadd.f32 %v4713_v48, %v130_v49 }
 0x17c   :  { %v175_v52 = vpack.c.bf16 %v6143_v51, %v6141_v50 }
 0x17e   :  { %386 = vmatmul.mubr.bf16.vlgmr.msra.gmra.mrb[0].mxu0 %v175_v52  ;;  %5217 = vmatmul.mubr.bf16.vlgmr.msra.gmra.mrb[0].mxu1 %v175_v52 }
 0x17f   :  { %5222 = vmatprep.mubr.msk.bf16.mxu0 %vm5978_vm0, %v5976_v4  ;;  %5228 = vmatprep.mubr.msk.bf16.mxu1 %vm5978_vm0, %v5976_v4 }
 0x251   :  { %v387_v60 = vpop.f32.mrb[0].mxu0  ;;  %v430_v61 = vpop.f32.mrb[0].mxu1 }
 0x252   :  { %v389_v62 = vpop.f32.mrb[1].mxu0  ;;  %v5218_v63 = vpop.f32.mrb[1].mxu1  ;;  %v431_v10 = vadd.f32 %v430_v61, %v221_v0  ;;  %v388_v13 = vadd.f32 %v387_v60, %v213_v7 }
 0x253   :  { %v390_v1 = vadd.f32 %v389_v62, %v217_v58  ;;  %v391_v2 = vpop.f32.mrb[2].mxu0  ;;  %v433_v3 = vpop.f32.mrb[2].mxu1 }
 0x254   :  { %v393_v5 = vpop.f32.mrb[3].mxu0  ;;  %v5219_v6 = vpop.f32.mrb[3].mxu1  ;;  %v434_v14 = vadd.f32 %v433_v3, %v221_v0  ;;  %v6177_v16 = vpack.c.bf16 %v431_v10, %v431_v10  ;;  %v392_v17 = vadd.f32 %v391_v2, %v213_v7  ;;  %v6180_v18 = vpack.c.bf16 %v388_v13, %v388_v13  ;;  %v5544_v10 = vld [vmem:[%s6827_s6] sm:$0xff]  }
 0x255   :  { %v6168_v8 = vpack.c.bf16 %v390_v1, %v390_v1  ;;  %v394_v9 = vadd.f32 %v393_v5, %v217_v58 }
 0x256   :  { %v6182_v19 = vpack.c.bf16 %v434_v14, %v434_v14  ;;  %v6184_v20 = vpack.c.bf16 %v392_v17, %v392_v17  ;;  %v589_v21 = vsel %vm587_vm2, %v6177_v16, 0  ;;  %v5545_v17 = vld [vmem:[%s6827_s6 + $0x8] sm:$0xff]  }
 0x257   :  { %v6170_v11 = vpack.c.bf16 %v394_v9, %v394_v9  ;;  %v467_v12 = vsel %vm462_vm1, %v6168_v8, 0 }
 0x258   :  { %5221 = vmatpush3.bf16.xpose.msra.mxu0 %v467_v12  ;;  %v635_v22 = vsel %vm587_vm2, %v6182_v19, 0 }
 0x259   :  { %v513_v15 = vsel %vm462_vm1, %v6170_v11, 0  ;;  %5232 = vmatprep.subr.bf16.mxu0 %v5976_v4 }
 0x25a   :  { %5227 = vmatpush3.bf16.xpose.msra.mxu1 %v513_v15 }
 0x25b   :  { %5238 = vmatprep.subr.bf16.mxu1 %v5976_v4 }
 0x25f   :  { %5223 = vmatmul.mubr.msk.bf16.vlgmr.msra.gmra.mrb[4].mxu0 %vm462_vm1, %v6180_v18 }
 0x260   :  { %5233 = vmatpush3.bf16.msra.mxu0 %v589_v21  ;;  %5234 = vmatprep.mubr.msk.bf16.mxu0 %vm5978_vm0, %v5976_v4 }
 0x261   :  { %5229 = vmatmul.mubr.msk.bf16.vlgmr.msra.gmra.mrb[4].mxu1 %vm462_vm1, %v6184_v20  ;;  %5244 = vmatprep.subr.bf16.mxu0 %v5976_v4 }
 0x262   :  { %5239 = vmatpush3.bf16.msra.mxu1 %v635_v22  ;;  %5240 = vmatprep.mubr.msk.bf16.mxu1 %vm5978_vm0, %v5976_v4 }
 0x263   :  { %5252 = vmatprep.subr.bf16.mxu1 %v5976_v4 }
 0x332   :  { %v503_v36 = vpop.f32.mrb[4].mxu0 }
 0x333   :  { %v555_v37 = vmul.f32 0.17677669, %v503_v36  ;;  %v5224_v38 = vpop.f32.mrb[5].mxu0 }
 0x334   :  { %v506_v40 = vpop.f32.mrb[6].mxu0  ;;  %v549_v41 = vpop.f32.mrb[4].mxu1 }
 0x335   :  { %v556_v42 = vmul.f32 0.17677669, %v549_v41  ;;  %v5225_v43 = vpop.f32.mrb[7].mxu0  ;;  %v5230_v44 = vpop.f32.mrb[5].mxu1  ;;  %v557_v45 = vadd.f32 %v555_v37, %v6205_v35 }
 0x336   :  { %v552_v46 = vpop.f32.mrb[6].mxu1 }
 0x337   :  { %v5231_v47 = vpop.f32.mrb[7].mxu1  ;;  %v560_v48 = vsel %vm559_vm3, %v557_v45, -inf  ;;  %v558_v49 = vadd.f32 %v556_v42, %v6208_v39 }
 0x338   :  { %561 = vmax.xlane.f32.xlu0 %v560_v48 }
 0x339   :  { %v563_v52 = vsel %vm559_vm3, %v558_v49, -inf }
 0x33a   :  { %564 = vmax.xlane.f32.xlu1 %v563_v52 }
 0x3c5   :  { %v562_v53 = vpop.xlane.xlu0 %561 }
 0x3c6   :  { %v566_v56 = vsub.f32 %v557_v45, %v562_v53 }
 0x3c7   :  { %v565_v58 = vpop.xlane.xlu1 %564 }
 0x3c8   :  { %v568_v60 = vmul.f32 1.442695, %v566_v56  ;;  %v567_v61 = vsub.f32 %v558_v49, %v565_v58 }
 0x3ca   :  { %5756 = vpow2.f32 %v568_v60  ;;  %v570_v62 = vmul.f32 1.442695, %v567_v61 }
 0x3cc   :  { %5758 = vpow2.f32 %v570_v62 }
 0x3d4   :  { %v5757_v63 = vpop.eup %5756 }
 0x3d5   :  { %v572_v0 = vsel %vm559_vm3, %v5757_v63, 0.0 }
 0x3d6   :  { %v5759_v1 = vpop.eup %5758  ;;  %573 = vadd.xlane.f32.xlu0 %v572_v0 }
 0x3d7   :  { %v575_v2 = vsel %vm559_vm3, %v5759_v1, 0.0 }
 0x3d8   :  { %576 = vadd.xlane.f32.xlu1 %v575_v2 }
 0x3e9   :  { %792 = vrot.lane.b32.xlu1 %v6170_v11, %s5980_s27 }
 0x3ec   :  { %742 = vrot.lane.b32.xlu0 %v6168_v8, %s5980_s27 }
 0x3ed   :  { %740 = vrot.lane.b32.xlu1 %v6180_v18, %s5980_s27 }
 0x3f1   :  { %790 = vrot.lane.b32.xlu1 %v6184_v20, %s5980_s27 }
 0x463   :  { %v574_v3 = vpop.xlane.xlu0 %573 }
 0x464   :  { %5760 = vrcp.f32 %v574_v3 }
 0x465   :  { %v577_v5 = vpop.xlane.xlu1 %576 }
 0x466   :  { %5762 = vrcp.f32 %v577_v5 }
 0x467   :  { %v743_v14 = vpop.permute.xlu0 %742 }
 0x468   :  { %v748_v21 = vsel %vm462_vm1, %v743_v14, 0 }
 0x469   :  { %v793_v22 = vpop.permute.xlu1 %792 }
 0x46a   :  { %v798_v33 = vsel %vm462_vm1, %v793_v22, 0 }
 0x46d   :  { %v741_v23 = vpop.permute.xlu1 %740 }
 0x46e   :  { %v5761_v6 = vpop.eup %5760 }
 0x46f   :  { %v580_v7 = vmul.f32 %v5761_v6, %v5757_v63 }
 0x470   :  { %v5763_v9 = vpop.eup %5762 }
 0x471   :  { %v581_v12 = vmul.f32 %v5763_v9, %v5759_v1  ;;  %v582_v13 = vpack.c.bf16 %v580_v7, %v580_v7  ;;  %v791_v40 = vpop.permute.xlu1 %790 }
 0x473   :  { %5235 = vmatmul.mubr.msk.bf16.vlgmr.msra.gmra.mrb[8].mxu0 %vm559_vm3, %v582_v13  ;;  %v583_v15 = vpack.c.bf16 %v581_v12, %v581_v12 }
 0x474   :  { %5245 = vmatpush3.bf16.msra.mxu0 %v5544_v10  ;;  %5248 = vmatprep.mubr.msk.bf16.mxu0 %vm5978_vm0, %v5976_v4 }
 0x475   :  { %5241 = vmatmul.mubr.msk.bf16.vlgmr.msra.gmra.mrb[8].mxu1 %vm559_vm3, %v583_v15  ;;  %5246 = vmatprep.subr.bf16.mxu0 %v5976_v4 }
 0x476   :  { %5253 = vmatpush3.bf16.xpose.msra.mxu1 %v748_v21  ;;  %5254 = vmatprep.mubr.msk.bf16.mxu1 %vm5978_vm0, %v5976_v4 }
 0x477   :  { %5264 = vmatprep.subr.bf16.mxu1 %v5976_v4 }
 0x478   :  { %5247 = vmatpush3.bf16.msra.mxu0 %v5545_v17 }
 0x479   :  { %5258 = vmatprep.subr.bf16.mxu0 %v5976_v4 }
 0x47d   :  { %5255 = vmatmul.mubr.msk.bf16.vlgmr.msra.gmra.mrb[12].mxu1 %vm462_vm1, %v741_v23  ;;  %v5546_v23 = vld [vmem:[%s6827_s6 + $0x10] sm:$0xff]  }
 0x47e   :  { %5266 = vmatprep.mubr.msk.bf16.mxu1 %vm5978_vm0, %v5976_v4 }
 0x546   :  { %v625_v24 = vpop.f32.mrb[8].mxu0 }
 0x547   :  { %v5236_v25 = vpop.f32.mrb[9].mxu0 }
 0x548   :  { %v628_v26 = vpop.f32.mrb[10].mxu0  ;;  %v671_v27 = vpop.f32.mrb[8].mxu1 }
 0x549   :  { %v677_v28 = vpack.c.bf16 %v671_v27, %v625_v24  ;;  %v5237_v29 = vpop.f32.mrb[11].mxu0  ;;  %v5242_v31 = vpop.f32.mrb[9].mxu1 }
 0x54a   :  { %v674_v32 = vpop.f32.mrb[10].mxu1 }
 0x54b   :  { %v5243_v34 = vpop.f32.mrb[11].mxu1  ;;  %5249 = vmatmul.mubr.msk.bf16.vlgmr.msra.gmra.mrb[12].mxu0 %vm462_vm1, %v677_v28  ;;  %v5547_v32 = vld [vmem:[%s6827_s6 + $0x18] sm:$0xff]  }
 0x54c   :  { %5259 = vmatpush3.bf16.xpose.msra.mxu0 %v798_v33  ;;  %5260 = vmatprep.mubr.msk.bf16.mxu0 %vm5978_vm0, %v5976_v4 }
 0x54d   :  { %5270 = vmatprep.subr.bf16.mxu0 %v5976_v4 }
 0x550   :  { %v784_v36 = vpop.f32.mrb[12].mxu1 }
 0x551   :  { %v840_v37 = vmul.f32 0.17677669, %v784_v36  ;;  %v5256_v38 = vpop.f32.mrb[13].mxu1 }
 0x552   :  { %v787_v41 = vpop.f32.mrb[14].mxu1 }
 0x553   :  { %v5257_v42 = vpop.f32.mrb[15].mxu1  ;;  %5261 = vmatmul.mubr.msk.bf16.vlgmr.msra.gmra.mrb[16].mxu0 %vm462_vm1, %v791_v40  ;;  %v842_v43 = vadd.f32 %v840_v37, %v6205_v35 }
 0x554   :  { %5272 = vmatprep.mubr.msk.bf16.mxu0 %vm5978_vm0, %v5976_v4 }
 0x555   :  { %v844_v44 = vsel %vm559_vm3, %v842_v43, -inf }
 0x556   :  { %845 = vmax.xlane.f32.xlu0 %v844_v44 }
 0x5e3   :  { %v846_v45 = vpop.xlane.xlu0 %845 }
 0x5e4   :  { %v850_v46 = vsub.f32 %v842_v43, %v846_v45 }
 0x5e6   :  { %v852_v47 = vmul.f32 1.442695, %v850_v46 }
 0x5e8   :  { %5764 = vpow2.f32 %v852_v47 }
 0x5f2   :  { %v5765_v48 = vpop.eup %5764 }
 0x5f3   :  { %v856_v49 = vsel %vm559_vm3, %v5765_v48, 0.0 }
 0x5f4   :  { %857 = vadd.xlane.f32.xlu0 %v856_v49 }
 0x61e   :  { %v6254_v52 = vpop.f32.mrb[12].mxu0 }
 0x61f   :  { %v5250_v53 = vpop.f32.mrb[13].mxu0 }
 0x620   :  { %v6256_v56 = vpop.f32.mrb[14].mxu0 }
 0x621   :  { %v5251_v58 = vpop.f32.mrb[15].mxu0 }
 0x626   :  { %v834_v60 = vpop.f32.mrb[16].mxu0 }
 0x627   :  { %v841_v61 = vmul.f32 0.17677669, %v834_v60  ;;  %v5262_v62 = vpop.f32.mrb[17].mxu0 }
 0x628   :  { %v837_v63 = vpop.f32.mrb[18].mxu0 }
 0x629   :  { %v5263_v0 = vpop.f32.mrb[19].mxu0  ;;  %v843_v1 = vadd.f32 %v841_v61, %v6208_v39 }
 0x62b   :  { %v847_v2 = vsel %vm559_vm3, %v843_v1, -inf }
 0x62c   :  { %848 = vmax.xlane.f32.xlu1 %v847_v2 }
 0x63d   :  { %916 = vrot.lane.b32.xlu1 %v6182_v19, %s5980_s27 }
 0x641   :  { %1029 = vrot.lane.b32.xlu1 %v6168_v8, %s5974_s4 }
 0x645   :  { %1079 = vrot.lane.b32.xlu1 %v6170_v11, %s5974_s4 }
 0x649   :  { %1077 = vrot.lane.b32.xlu1 %v6184_v20, %s5974_s4 }
 0x681   :  { %v858_v13 = vpop.xlane.xlu0 %857 }
 0x6b9   :  { %v849_v3 = vpop.xlane.xlu1 %848 }
 0x6ba   :  { %v851_v5 = vsub.f32 %v843_v1, %v849_v3  ;;  %v4738_v3 = vld [vmem:[%s6828_s7] ss:$0 sm:$0xff] }
 0x6bc   :  { %v854_v6 = vmul.f32 1.442695, %v851_v5  ;;  %v738_v5 = vadd.f32 %v4738_v3, %v6254_v52 }
 0x6bd   :  { %v917_v7 = vpop.permute.xlu1 %916 }
 0x6be   :  { %5766 = vpow2.f32 %v854_v6  ;;  %v922_v9 = vsel %vm587_vm2, %v917_v7, 0  ;;  %v739_v7 = vadd.f32 %v4738_v3, %v6256_v56 }
 0x6bf   :  { %5271 = vmatpush3.bf16.msra.mxu0 %v922_v9  ;;  %5768 = vrcp.f32 %v858_v13 }
 0x6c0   :  { %5284 = vmatprep.subr.bf16.mxu0 %v5976_v4 }
 0x6c1   :  { %v1030_v27 = vpop.permute.xlu1 %1029 }
 0x6c2   :  { %v1035_v29 = vsel %vm462_vm1, %v1030_v27, 0 }
 0x6c5   :  { %v1080_v38 = vpop.permute.xlu1 %1079 }
 0x6c6   :  { %v1085_v44 = vsel %vm462_vm1, %v1080_v38, 0 }
 0x6c8   :  { %v5767_v10 = vpop.eup %5766 }
 0x6c9   :  { %v859_v12 = vsel %vm559_vm3, %v5767_v10, 0.0  ;;  %v5769_v14 = vpop.eup %5768  ;;  %v1078_v49 = vpop.permute.xlu1 %1077 }
 0x6ca   :  { %860 = vadd.xlane.f32.xlu0 %v859_v12  ;;  %v864_v17 = vmul.f32 %v5769_v14, %v5765_v48 }
 0x6cc   :  { %v866_v24 = vpack.c.bf16 %v864_v17, %v864_v17 }
 0x6e0   :  { %868 = vrot.lane.b32.xlu0 %v6177_v16, %s5980_s27 }
 0x6e4   :  { %1027 = vrot.lane.b32.xlu0 %v6180_v18, %s5974_s4 }
 0x757   :  { %v861_v15 = vpop.xlane.xlu0 %860 }
 0x758   :  { %5770 = vrcp.f32 %v861_v15 }
 0x75b   :  { %v869_v21 = vpop.permute.xlu0 %868 }
 0x75c   :  { %v874_v22 = vsel %vm587_vm2, %v869_v21, 0 }
 0x75d   :  { %5265 = vmatpush3.bf16.msra.mxu1 %v874_v22 }
 0x75e   :  { %5276 = vmatprep.subr.bf16.mxu1 %v5976_v4 }
 0x75f   :  { %v1028_v31 = vpop.permute.xlu0 %1027 }
 0x760   :  { %5267 = vmatmul.mubr.msk.bf16.vlgmr.msra.gmra.mrb[16].mxu1 %vm559_vm3, %v866_v24 }
 0x761   :  { %5277 = vmatpush3.bf16.msra.mxu1 %v5546_v23  ;;  %5280 = vmatprep.mubr.msk.bf16.mxu1 %vm5978_vm0, %v5976_v4 }
 0x762   :  { %v5771_v25 = vpop.eup %5770  ;;  %5278 = vmatprep.subr.bf16.mxu1 %v5976_v4 }
 0x763   :  { %v865_v26 = vmul.f32 %v5771_v25, %v5767_v10 }
 0x765   :  { %v867_v28 = vpack.c.bf16 %v865_v26, %v865_v26  ;;  %5279 = vmatpush3.bf16.msra.mxu1 %v5547_v32 }
 0x766   :  { %5290 = vmatprep.subr.bf16.mxu1 %v5976_v4 }
 0x767   :  { %5273 = vmatmul.mubr.msk.bf16.vlgmr.msra.gmra.mrb[20].mxu0 %vm559_vm3, %v867_v28 }
 0x768   :  { %5285 = vmatpush3.bf16.xpose.msra.mxu0 %v1035_v29  ;;  %5286 = vmatprep.mubr.msk.bf16.mxu0 %vm5978_vm0, %v5976_v4 }
 0x769   :  { %5296 = vmatprep.subr.bf16.mxu0 %v5976_v4 }
 0x76f   :  { %5287 = vmatmul.mubr.msk.bf16.vlgmr.msra.gmra.mrb[24].mxu0 %vm462_vm1, %v1028_v31 }
 0x770   :  { %5298 = vmatprep.mubr.msk.bf16.mxu0 %vm5978_vm0, %v5976_v4 }
 0x833   :  { %v910_v33 = vpop.f32.mrb[16].mxu1 }
 0x834   :  { %v5268_v34 = vpop.f32.mrb[17].mxu1 }
 0x835   :  { %v913_v36 = vpop.f32.mrb[18].mxu1 }
 0x836   :  { %v5269_v37 = vpop.f32.mrb[19].mxu1  ;;  %v5548_v36 = vld [vmem:[%s6827_s6 + $0x20] sm:$0xff]  }
 0x83a   :  { %v958_v40 = vpop.f32.mrb[20].mxu0 }
 0x83b   :  { %v964_v41 = vpack.c.bf16 %v958_v40, %v910_v33  ;;  %v5274_v42 = vpop.f32.mrb[21].mxu0 }
 0x83c   :  { %v961_v43 = vpop.f32.mrb[22].mxu0 }
 0x83d   :  { %v5275_v45 = vpop.f32.mrb[23].mxu0  ;;  %5281 = vmatmul.mubr.msk.bf16.vlgmr.msra.gmra.mrb[20].mxu1 %vm462_vm1, %v964_v41 }
 0x83e   :  { %5291 = vmatpush3.bf16.xpose.msra.mxu1 %v1085_v44  ;;  %5292 = vmatprep.mubr.msk.bf16.mxu1 %vm5978_vm0, %v5976_v4  ;;  %v5549_v44 = vld [vmem:[%s6827_s6 + $0x28] sm:$0xff]  }
 0x83f   :  { %5302 = vmatprep.subr.bf16.mxu1 %v5976_v4 }
 0x842   :  { %v1071_v46 = vpop.f32.mrb[24].mxu0 }
 0x843   :  { %v1127_v47 = vmul.f32 0.17677669, %v1071_v46  ;;  %v5288_v48 = vpop.f32.mrb[25].mxu0 }
 0x844   :  { %v1074_v53 = vpop.f32.mrb[26].mxu0 }
 0x845   :  { %v5289_v58 = vpop.f32.mrb[27].mxu0  ;;  %5293 = vmatmul.mubr.msk.bf16.vlgmr.msra.gmra.mrb[24].mxu1 %vm462_vm1, %v1078_v49  ;;  %v1129_v60 = vadd.f32 %v1127_v47, %v6205_v35 }
 0x846   :  { %5304 = vmatprep.mubr.msk.bf16.mxu1 %vm5978_vm0, %v5976_v4 }
 0x847   :  { %v1131_v61 = vsel %vm559_vm3, %v1129_v60, -inf }
 0x848   :  { %1132 = vmax.xlane.f32.xlu0 %v1131_v61 }
 0x8d5   :  { %v1133_v62 = vpop.xlane.xlu0 %1132 }
 0x8d6   :  { %v1137_v63 = vsub.f32 %v1129_v60, %v1133_v62 }
 0x8d8   :  { %v1139_v0 = vmul.f32 1.442695, %v1137_v63 }
 0x8da   :  { %5772 = vpow2.f32 %v1139_v0 }
 0x8e4   :  { %v5773_v1 = vpop.eup %5772 }
 0x8e5   :  { %v1143_v2 = vsel %vm559_vm3, %v5773_v1, 0.0 }
 0x8e6   :  { %1144 = vadd.xlane.f32.xlu0 %v1143_v2 }
 0x910   :  { %v1018_v6 = vpop.f32.mrb[20].mxu1 }
 0x911   :  { %v6312_v9 = vadd.f32 %v1018_v6, %v738_v5  ;;  %v5282_v10 = vpop.f32.mrb[21].mxu1 }
 0x912   :  { %v1021_v12 = vpop.f32.mrb[22].mxu1 }
 0x913   :  { %v6314_v13 = vadd.f32 %v1021_v12, %v739_v7  ;;  %v5283_v14 = vpop.f32.mrb[23].mxu1 }
 0x918   :  { %v1121_v15 = vpop.f32.mrb[24].mxu1 }
 0x919   :  { %v1128_v17 = vmul.f32 0.17677669, %v1121_v15  ;;  %v5294_v21 = vpop.f32.mrb[25].mxu1 }
 0x91a   :  { %v1124_v22 = vpop.f32.mrb[26].mxu1 }
 0x91b   :  { %v5295_v23 = vpop.f32.mrb[27].mxu1  ;;  %v1130_v24 = vadd.f32 %v1128_v17, %v6208_v39 }
 0x91d   :  { %v1134_v25 = vsel %vm559_vm3, %v1130_v24, -inf }
 0x91e   :  { %1135 = vmax.xlane.f32.xlu1 %v1134_v25 }
 0x92f   :  { %1203 = vrot.lane.b32.xlu1 %v6182_v19, %s5974_s4 }
 0x933   :  { %1316 = vrot.lane.b32.xlu1 %v6168_v8, %s5981_s12 }
 0x937   :  { %1366 = vrot.lane.b32.xlu1 %v6170_v11, %s5981_s12 }
 0x93b   :  { %1364 = vrot.lane.b32.xlu1 %v6184_v20, %s5981_s12 }
 0x973   :  { %v1145_v8 = vpop.xlane.xlu0 %1144 }
 0x9ab   :  { %v1136_v52 = vpop.xlane.xlu1 %1135 }
 0x9ac   :  { %v1138_v56 = vsub.f32 %v1130_v24, %v1136_v52 }
 0x9ae   :  { %v1141_v26 = vmul.f32 1.442695, %v1138_v56 }
 0x9af   :  { %v1204_v27 = vpop.permute.xlu1 %1203 }
 0x9b0   :  { %5774 = vpow2.f32 %v1141_v26  ;;  %v1209_v28 = vsel %vm587_vm2, %v1204_v27, 0 }
 0x9b1   :  { %5303 = vmatpush3.bf16.msra.mxu1 %v1209_v28  ;;  %5776 = vrcp.f32 %v1145_v8 }
 0x9b2   :  { %5316 = vmatprep.subr.bf16.mxu1 %v5976_v4 }
 0x9b3   :  { %v1317_v40 = vpop.permute.xlu1 %1316 }
 0x9b4   :  { %v1322_v42 = vsel %vm462_vm1, %v1317_v40, 0 }
 0x9b7   :  { %v1367_v49 = vpop.permute.xlu1 %1366 }
 0x9b8   :  { %v1372_v62 = vsel %vm462_vm1, %v1367_v49, 0 }
 0x9ba   :  { %v5775_v29 = vpop.eup %5774 }
 0x9bb   :  { %v1146_v31 = vsel %vm559_vm3, %v5775_v29, 0.0  ;;  %v5777_v11 = vpop.eup %5776  ;;  %v1365_v3 = vpop.permute.xlu1 %1364 }
 0x9bc   :  { %1147 = vadd.xlane.f32.xlu0 %v1146_v31  ;;  %v1151_v32 = vmul.f32 %v5777_v11, %v5773_v1 }
 0x9be   :  { %v1153_v37 = vpack.c.bf16 %v1151_v32, %v1151_v32 }
 0x9d2   :  { %1155 = vrot.lane.b32.xlu0 %v6177_v16, %s5974_s4 }
 0x9d6   :  { %1314 = vrot.lane.b32.xlu0 %v6180_v18, %s5981_s12 }
 0xa49   :  { %v1148_v20 = vpop.xlane.xlu0 %1147 }
 0xa4a   :  { %5778 = vrcp.f32 %v1148_v20 }
 0xa4d   :  { %v1156_v33 = vpop.permute.xlu0 %1155 }
 0xa4e   :  { %v1161_v34 = vsel %vm587_vm2, %v1156_v33, 0 }
 0xa4f   :  { %5297 = vmatpush3.bf16.msra.mxu0 %v1161_v34 }
 0xa50   :  { %5308 = vmatprep.subr.bf16.mxu0 %v5976_v4 }
 0xa51   :  { %v1315_v43 = vpop.permute.xlu0 %1314 }
 0xa52   :  { %5299 = vmatmul.mubr.msk.bf16.vlgmr.msra.gmra.mrb[28].mxu0 %vm559_vm3, %v1153_v37 }
 0xa53   :  { %5309 = vmatpush3.bf16.msra.mxu0 %v5548_v36  ;;  %5312 = vmatprep.mubr.msk.bf16.mxu0 %vm5978_vm0, %v5976_v4 }
 0xa54   :  { %v5779_v18 = vpop.eup %5778  ;;  %5310 = vmatprep.subr.bf16.mxu0 %v5976_v4 }
 0xa55   :  { %v1152_v38 = vmul.f32 %v5779_v18, %v5775_v29 }
 0xa57   :  { %v1154_v41 = vpack.c.bf16 %v1152_v38, %v1152_v38  ;;  %5311 = vmatpush3.bf16.msra.mxu0 %v5549_v44 }
 0xa58   :  { %5322 = vmatprep.subr.bf16.mxu0 %v5976_v4 }
 0xa59   :  { %5305 = vmatmul.mubr.msk.bf16.vlgmr.msra.gmra.mrb[28].mxu1 %vm559_vm3, %v1154_v41 }
 0xa5a   :  { %5317 = vmatpush3.bf16.xpose.msra.mxu1 %v1322_v42  ;;  %5318 = vmatprep.mubr.msk.bf16.mxu1 %vm5978_vm0, %v5976_v4 }
 0xa5b   :  { %5328 = vmatprep.subr.bf16.mxu1 %v5976_v4 }
 0xa61   :  { %5319 = vmatmul.mubr.msk.bf16.vlgmr.msra.gmra.mrb[32].mxu1 %vm462_vm1, %v1315_v43 }
 0xa62   :  { %5330 = vmatprep.mubr.msk.bf16.mxu1 %vm5978_vm0, %v5976_v4 }
 0xb25   :  { %v1197_v45 = vpop.f32.mrb[28].mxu0 }
 0xb26   :  { %v5300_v46 = vpop.f32.mrb[29].mxu0 }
 0xb27   :  { %v1200_v47 = vpop.f32.mrb[30].mxu0  ;;  %v5551_v46 = vld [vmem:[%s6827_s6 + $0x38] sm:$0xff]  }
 0xb28   :  { %v5301_v48 = vpop.f32.mrb[31].mxu0 }
 0xb2c   :  { %v1245_v53 = vpop.f32.mrb[28].mxu1 }
 0xb2d   :  { %v1251_v58 = vpack.c.bf16 %v1245_v53, %v1197_v45  ;;  %v5306_v60 = vpop.f32.mrb[29].mxu1  ;;  %v5550_v45 = vld [vmem:[%s6827_s6 + $0x30] sm:$0xff]  }
 0xb2e   :  { %v1248_v61 = vpop.f32.mrb[30].mxu1 }
 0xb2f   :  { %v5307_v63 = vpop.f32.mrb[31].mxu1  ;;  %5313 = vmatmul.mubr.msk.bf16.vlgmr.msra.gmra.mrb[32].mxu0 %vm462_vm1, %v1251_v58 }
 0xb30   :  { %5323 = vmatpush3.bf16.xpose.msra.mxu0 %v1372_v62  ;;  %5324 = vmatprep.mubr.msk.bf16.mxu0 %vm5978_vm0, %v5976_v4 }
 0xb31   :  { %5334 = vmatprep.subr.bf16.mxu0 %v5976_v4 }
 0xb34   :  { %v1358_v0 = vpop.f32.mrb[32].mxu1 }
 0xb35   :  { %v1414_v1 = vmul.f32 0.17677669, %v1358_v0  ;;  %v5320_v2 = vpop.f32.mrb[33].mxu1 }
 0xb36   :  { %v1361_v5 = vpop.f32.mrb[34].mxu1 }
 0xb37   :  { %v5321_v6 = vpop.f32.mrb[35].mxu1  ;;  %5325 = vmatmul.mubr.msk.bf16.vlgmr.msra.gmra.mrb[36].mxu0 %vm462_vm1, %v1365_v3  ;;  %v1416_v7 = vadd.f32 %v1414_v1, %v6205_v35 }
 0xb38   :  { %5336 = vmatprep.mubr.msk.bf16.mxu0 %vm5978_vm0, %v5976_v4 }
 0xb39   :  { %v1418_v10 = vsel %vm559_vm3, %v1416_v7, -inf }
 0xb3a   :  { %1419 = vmax.xlane.f32.xlu0 %v1418_v10 }
 0xbc7   :  { %v1420_v12 = vpop.xlane.xlu0 %1419 }
 0xbc8   :  { %v1424_v14 = vsub.f32 %v1416_v7, %v1420_v12  ;;  %v5552_v12 = vld [vmem:[#allocation5] ss:$16 sps:$4 sm:$0xff]  }
 0xbca   :  { %v1426_v15 = vmul.f32 1.442695, %v1424_v14  ;;  %v5554_v14 = vld [vmem:[#allocation5 + $0x4] ss:$16 sps:$4 sm:$0xff]  }
 0xbcc   :  { %5780 = vpow2.f32 %v1426_v15  ;;  %v5555_v15 = vld [vmem:[#allocation5 + $0x8] ss:$16 sps:$4 sm:$0xff]  }
 0xbd6   :  { %v5781_v17 = vpop.eup %5780 }
 0xbd7   :  { %v1430_v21 = vsel %vm559_vm3, %v5781_v17, 0.0 }
 0xbd8   :  { %1431 = vadd.xlane.f32.xlu0 %v1430_v21  ;;  %v5560_v21 = vld [vmem:[#allocation5 + $0x24] ss:$16 sps:$4 sm:$0xff]  }
 0xc02   :  { %v1305_v22 = vpop.f32.mrb[32].mxu0 }
 0xc03   :  { %v1312_v23 = vadd.f32 %v1305_v22, %v6312_v9  ;;  %v5314_v24 = vpop.f32.mrb[33].mxu0  ;;  %v5563_v22 = vld [vmem:[#allocation5 + $0x2c] ss:$16 sps:$4 sm:$0xff]  }
 0xc04   :  { %v1308_v25 = vpop.f32.mrb[34].mxu0  ;;  %v5561_v24 = vld [vmem:[#allocation5 + $0x28] ss:$16 sps:$4 sm:$0xff]  }
 0xc05   :  { %v1313_v52 = vadd.f32 %v1308_v25, %v6314_v13  ;;  %v5315_v56 = vpop.f32.mrb[35].mxu0 }
 0xc0a   :  { %v1408_v26 = vpop.f32.mrb[36].mxu0 }
 0xc0b   :  { %v1415_v27 = vmul.f32 0.17677669, %v1408_v26  ;;  %v5326_v28 = vpop.f32.mrb[37].mxu0 }
 0xc0c   :  { %v1411_v29 = vpop.f32.mrb[38].mxu0 }
 0xc0d   :  { %v5327_v31 = vpop.f32.mrb[39].mxu0  ;;  %v1417_v8 = vadd.f32 %v1415_v27, %v6208_v39  ;;  %v5566_v29 = vld [vmem:[#allocation5 + $0x44] ss:$16 sps:$4 sm:$0xff]  }
 0xc0e   :  { %v5569_v31 = vld [vmem:[#allocation5 + $0x4c] ss:$16 sps:$4 sm:$0xff]  }
 0xc0f   :  { %v1421_v11 = vsel %vm559_vm3, %v1417_v8, -inf }
 0xc10   :  { %1422 = vmax.xlane.f32.xlu1 %v1421_v11  ;;  %v5567_v11 = vld [vmem:[#allocation5 + $0x48] ss:$16 sps:$4 sm:$0xff]  }
 0xc21   :  { %1490 = vrot.lane.b32.xlu1 %v6182_v19, %s5981_s12 }
 0xc65   :  { %v1432_v37 = vpop.xlane.xlu0 %1431 }
 0xc9d   :  { %v1423_v20 = vpop.xlane.xlu1 %1422 }
 0xc9e   :  { %v1425_v9 = vsub.f32 %v1417_v8, %v1423_v20  ;;  %v5564_v8 = vld [vmem:[#allocation5 + $0x40] ss:$16 sps:$4 sm:$0xff]   ;;  %v5572_v20 = vld [vmem:[#allocation5 + $0x64] ss:$16 sps:$4 sm:$0xff]  }
 0xca0   :  { %v1428_v32 = vmul.f32 1.442695, %v1425_v9  ;;  %v5575_v9 = vld [vmem:[#allocation5 + $0x6c] ss:$16 sps:$4 sm:$0xff]  }
 0xca1   :  { %v1491_v33 = vpop.permute.xlu1 %1490 }
 0xca2   :  { %5782 = vpow2.f32 %v1428_v32  ;;  %v1496_v13 = vsel %vm587_vm2, %v1491_v33, 0  ;;  %v5570_v32 = vld [vmem:[#allocation5 + $0x60] ss:$16 sps:$4 sm:$0xff]   ;;  %v5573_v33 = vld [vmem:[#allocation5 + $0x68] ss:$16 sps:$4 sm:$0xff]  }
 0xca3   :  { %5335 = vmatpush3.bf16.msra.mxu0 %v1496_v13  ;;  %5784 = vrcp.f32 %v1432_v37  ;;  %v5578_v13 = vld [vmem:[#allocation5 + $0x84] ss:$16 sps:$4 sm:$0xff]   ;;  %v5579_v37 = vld [vmem:[#allocation5 + $0x88] ss:$16 sps:$4 sm:$0xff]  }
 0xca4   :  { %1858 = vmatprep.subr.bf16.mxu0 %v5554_v14  ;;  %v5600_v14 = vld [vmem:[#allocation7 + $0x40] sm:$0xff]  }
 0xcac   :  { %v5783_v34 = vpop.eup %5782 }
 0xcad   :  { %v1433_v36 = vsel %vm559_vm3, %v5783_v34, 0.0  ;;  %v5785_v18 = vpop.eup %5784 }
 0xcae   :  { %1434 = vadd.xlane.f32.xlu0 %v1433_v36  ;;  %v1438_v19 = vmul.f32 %v5785_v18, %v5781_v17  ;;  %v5557_v17 = vld [vmem:[#allocation5 + $0xc] ss:$16 sps:$4 sm:$0xff]   ;;  %v5576_v36 = vld [vmem:[#allocation5 + $0x80] ss:$16 sps:$4 sm:$0xff]   ;;  %v5584_v18 = vld [vmem:[#allocation5 + $0xa4] ss:$16 sps:$4 sm:$0xff]  }
 0xcb0   :  { %v1440_v42 = vpack.c.bf16 %v1438_v19, %v1438_v19  ;;  %v5582_v19 = vld [vmem:[#allocation5 + $0xa0] ss:$16 sps:$4 sm:$0xff]  }
 0xcc4   :  { %1442 = vrot.lane.b32.xlu0 %v6177_v16, %s5981_s12 }
 0xd3b   :  { %v1435_v38 = vpop.xlane.xlu0 %1434 }
 0xd3c   :  { %5786 = vrcp.f32 %v1435_v38  ;;  %v5587_v38 = vld [vmem:[#allocation5 + $0xac] ss:$16 sps:$4 sm:$0xff]  }
 0xd3f   :  { %v1443_v40 = vpop.permute.xlu0 %1442 }
 0xd40   :  { %v1448_v41 = vsel %vm587_vm2, %v1443_v40, 0  ;;  %v5585_v40 = vld [vmem:[#allocation5 + $0xa8] ss:$16 sps:$4 sm:$0xff]  }
 0xd41   :  { %5329 = vmatpush3.bf16.msra.mxu1 %v1448_v41  ;;  %v5590_v41 = vld [vmem:[#allocation5 + $0xc4] ss:$16 sps:$4 sm:$0xff]  }
 0xd42   :  { %5340 = vmatprep.subr.bf16.mxu1 %v5976_v4 }
 0xd44   :  { %5331 = vmatmul.mubr.msk.bf16.vlgmr.msra.gmra.mrb[36].mxu1 %vm559_vm3, %v1440_v42  ;;  %v5593_v42 = vld [vmem:[#allocation5 + $0xcc] ss:$16 sps:$4 sm:$0xff]  }
 0xd45   :  { %5344 = vmatprep.mubr.msk.bf16.mxu1 %vm5978_vm0, %v5976_v4  ;;  %5341 = vmatpush3.bf16.msra.mxu1 %v5550_v45  ;;  %v5599_v45 = vld [vmem:[#allocation5 + $0xec] ss:$16 sps:$4 sm:$0xff]  }
 0xd46   :  { %v5787_v43 = vpop.eup %5786  ;;  %5342 = vmatprep.subr.bf16.mxu1 %v5976_v4 }
 0xd47   :  { %v1439_v16 = vmul.f32 %v5787_v43, %v5783_v34  ;;  %v5581_v34 = vld [vmem:[#allocation5 + $0x8c] ss:$16 sps:$4 sm:$0xff]   ;;  %v5588_v43 = vld [vmem:[#allocation5 + $0xc0] ss:$16 sps:$4 sm:$0xff]  }
 0xd49   :  { %v1441_v44 = vpack.c.bf16 %v1439_v16, %v1439_v16  ;;  %5343 = vmatpush3.bf16.msra.mxu1 %v5551_v46  ;;  %v5591_v16 = vld [vmem:[#allocation5 + $0xc8] ss:$16 sps:$4 sm:$0xff]   ;;  %v5594_v46 = vld [vmem:[#allocation5 + $0xe0] ss:$16 sps:$4 sm:$0xff]  }
 0xd4a   :  { %1901 = vmatprep.subr.bf16.mxu1 %v5557_v17  ;;  %v5602_v17 = vld [vmem:[#allocation7] sm:$0xff]  }
 0xd4b   :  { %5337 = vmatmul.mubr.msk.bf16.vlgmr.msra.gmra.mrb[40].mxu0 %vm559_vm3, %v1441_v44  ;;  %v5596_v44 = vld [vmem:[#allocation5 + $0xe4] ss:$16 sps:$4 sm:$0xff]  }
 0xd4c   :  { %1890 = vmatprep.mubr.bf16.mxu0 %v5977_v30  ;;  %1859 = vmatpush1.bf16.msra.mxu0 %v5552_v12 }
 0xd4d   :  { %1860 = vmatprep.subr.bf16.mxu0 %v5560_v21  ;;  %v5603_v21 = vld [vmem:[#allocation7 + $0x80] sm:$0xff]  }
 0xe17   :  { %v1484_v47 = vpop.f32.mrb[36].mxu1 }
 0xe18   :  { %v5332_v48 = vpop.f32.mrb[37].mxu1 }
 0xe19   :  { %v1487_v49 = vpop.f32.mrb[38].mxu1 }
 0xe1a   :  { %v5333_v53 = vpop.f32.mrb[39].mxu1 }
 0xe1e   :  { %v1532_v58 = vpop.f32.mrb[40].mxu0 }
 0xe1f   :  { %v1538_v60 = vpack.c.bf16 %v1532_v58, %v1484_v47  ;;  %v5338_v61 = vpop.f32.mrb[41].mxu0  ;;  %v5597_v47 = vld [vmem:[#allocation5 + $0xe8] ss:$16 sps:$4 sm:$0xff]  }
 0xe20   :  { %v1535_v62 = vpop.f32.mrb[42].mxu0 }
 0xe21   :  { %v5339_v63 = vpop.f32.mrb[43].mxu0  ;;  %5345 = vmatmul.mubr.msk.bf16.vlgmr.msra.gmra.mrb[40].mxu1 %vm462_vm1, %v1538_v60 }
 0xe22   :  { %1933 = vmatprep.mubr.bf16.mxu1 %v5977_v30  ;;  %1902 = vmatpush1.bf16.msra.mxu1 %v5555_v15  ;;  %v4773_v63 = vld [vmem:[%s6829_s8] ss:$0 sm:$0xff] }
 0xe23   :  { %1903 = vmatprep.subr.bf16.mxu1 %v5563_v22  ;;  %v5601_v15 = vld [vmem:[#allocation7 + $0xc0] sm:$0xff]   ;;  %v5604_v22 = vld [vmem:[#allocation7 + $0x48] sm:$0xff]  }
 0xe26   :  { %1904 = vmatpush1.bf16.msra.mxu1 %v5561_v24  ;;  %v5606_v24 = vld [vmem:[#allocation7 + $0x8] sm:$0xff]  }
 0xe27   :  { %1905 = vmatprep.subr.bf16.mxu1 %v5569_v31  ;;  %v5616_v31 = vld [vmem:[#allocation7 + $0x60] sm:$0xff]  }
 0xe2a   :  { %1906 = vmatpush1.bf16.msra.mxu1 %v5567_v11  ;;  %v5618_v11 = vld [vmem:[#allocation7 + $0x20] sm:$0xff]  }
 0xe2b   :  { %1907 = vmatprep.subr.bf16.mxu1 %v5575_v9  ;;  %v5620_v9 = vld [vmem:[#allocation7 + $0x68] sm:$0xff]  }
 0xe2e   :  { %1908 = vmatpush1.bf16.msra.mxu1 %v5573_v33  ;;  %v5622_v33 = vld [vmem:[#allocation7 + $0x28] sm:$0xff]  }
 0xe2f   :  { %1909 = vmatprep.subr.bf16.mxu1 %v5581_v34  ;;  %v5624_v34 = vld [vmem:[#allocation7 + $0x70] sm:$0xff]  }
 0xe32   :  { %1910 = vmatpush1.bf16.msra.mxu1 %v5579_v37  ;;  %v5626_v37 = vld [vmem:[#allocation7 + $0x30] sm:$0xff]  }
 0xe33   :  { %1911 = vmatprep.subr.bf16.mxu1 %v5587_v38  ;;  %v5628_v38 = vld [vmem:[#allocation7 + $0x78] sm:$0xff]  }
 0xe36   :  { %1912 = vmatpush1.bf16.msra.mxu1 %v5585_v40  ;;  %v5630_v40 = vld [vmem:[#allocation7 + $0x38] sm:$0xff]  }
 0xe37   :  { %1913 = vmatprep.subr.bf16.mxu1 %v5593_v42  ;;  %v1676_v42 = vld [vmem:[%s6832_s11] sm:$0xf] }
 0xe3a   :  { %1914 = vmatpush1.bf16.msra.mxu1 %v5591_v16  ;;  %v1681_v16 = vrot.slane %v1676_v42, %v6164_v59 }
 0xe3b   :  { %1915 = vmatprep.subr.bf16.mxu1 %v5599_v45  ;;  %v1685_v45 = vrot.slane %v1676_v42, %v6154_v55 }
 0xe3e   :  { %1916 = vmatpush1.bf16.msra.mxu1 %v5597_v47 }
 0xe3f   :  { %5081 = vmatprep.subr.bf16.mxu1 %v5601_v15 }
 0xef4   :  { %v1592_v0 = vpop.f32.mrb[40].mxu1 }
 0xef5   :  { %v1599_v1 = vadd.f32 %v1592_v0, %v1312_v23  ;;  %v5346_v2 = vpop.f32.mrb[41].mxu1  ;;  %v5558_v23 = vld [vmem:[#allocation5 + $0x20] ss:$16 sps:$4 sm:$0xff]  }
 0xef6   :  { %v1595_v3 = vpop.f32.mrb[42].mxu1  ;;  %1861 = vmatpush1.bf16.msra.mxu0 %v5558_v23  ;;  %v5605_v23 = vld [vmem:[#allocation7 + $0xc8] sm:$0xff]  }
 0xef7   :  { %v1600_v5 = vadd.f32 %v1595_v3, %v1313_v52  ;;  %v5347_v6 = vpop.f32.mrb[43].mxu1  ;;  %v1601_v7 = vadd.f32 %v1599_v1, %v6141_v50  ;;  %1862 = vmatprep.subr.bf16.mxu0 %v5566_v29  ;;  %v5615_v29 = vld [vmem:[#allocation7 + $0x98] sm:$0xff]  }
 0xef9   :  { %1605 = vadd.xlane.f32.xlu1 %v1601_v7  ;;  %v1602_v10 = vadd.f32 %v1600_v5, %v6143_v51  ;;  %v4774_v5 = vld [vmem:[%s6830_s9] ss:$0 sm:$0xff] }
 0xefa   :  { %1863 = vmatpush1.bf16.msra.mxu0 %v5564_v8  ;;  %v5617_v8 = vld [vmem:[#allocation7 + $0xe0] sm:$0xff]  }
 0xefb   :  { %1607 = vadd.xlane.f32.xlu0 %v1602_v10  ;;  %1864 = vmatprep.subr.bf16.mxu0 %v5572_v20  ;;  %v5619_v20 = vld [vmem:[#allocation7 + $0xa0] sm:$0xff]  }
 0xefe   :  { %1865 = vmatpush1.bf16.msra.mxu0 %v5570_v32  ;;  %v5621_v32 = vld [vmem:[#allocation7 + $0xe8] sm:$0xff]  }
 0xeff   :  { %1866 = vmatprep.subr.bf16.mxu0 %v5578_v13  ;;  %v5623_v13 = vld [vmem:[#allocation7 + $0xa8] sm:$0xff]  }
 0xf02   :  { %1867 = vmatpush1.bf16.msra.mxu0 %v5576_v36  ;;  %v5625_v36 = vld [vmem:[#allocation7 + $0xf0] sm:$0xff]  }
 0xf03   :  { %1868 = vmatprep.subr.bf16.mxu0 %v5584_v18  ;;  %v5627_v18 = vld [vmem:[#allocation7 + $0xb0] sm:$0xff]  }
 0xf06   :  { %1869 = vmatpush1.bf16.msra.mxu0 %v5582_v19  ;;  %v5629_v19 = vld [vmem:[#allocation7 + $0xf8] sm:$0xff]  }
 0xf07   :  { %1870 = vmatprep.subr.bf16.mxu0 %v5590_v41  ;;  %v5631_v41 = vld [vmem:[#allocation7 + $0xb8] sm:$0xff]  }
 0xf0a   :  { %1871 = vmatpush1.bf16.msra.mxu0 %v5588_v43  ;;  %v1692_v43 = vsub.s32 3, %v6151_v54 }
 0xf0b   :  { %1872 = vmatprep.subr.bf16.mxu0 %v5596_v44  ;;  %v1689_v44 = vrot.slane %v1676_v42, %v6160_v57 }
 0xf0e   :  { %1873 = vmatpush1.bf16.msra.mxu0 %v5594_v46  ;;  %v1693_v46 = vrot.slane %v1676_v42, %v1692_v43 }
 0xf0f   :  { %5059 = vmatprep.subr.bf16.mxu0 %v5600_v14 }
 0xf86   :  { %v1606_v50 = vpop.xlane.xlu1 %1605 }
 0xf87   :  { %v1609_v25 = vmul.f32 0.0078125, %v1606_v50  ;;  %v5607_v50 = vld [vmem:[#allocation7 + $0x88] sm:$0xff]  }
 0xf88   :  { %v1608_v51 = vpop.xlane.xlu0 %1607 }
 0xf89   :  { %v6393_v52 = vsub.f32 %v1601_v7, %v1609_v25  ;;  %v1610_v56 = vmul.f32 0.0078125, %v1608_v51  ;;  %v5608_v25 = vld [vmem:[#allocation7 + $0x50] sm:$0xff]  }
 0xf8a   :  { %v5609_v51 = vld [vmem:[#allocation7 + $0xd0] sm:$0xff]  }
 0xf8b   :  { %v6395_v26 = vsub.f32 %v1602_v10, %v1610_v56  ;;  %v1613_v27 = vmul.f32 %v6393_v52, %v6393_v52  ;;  %v5611_v56 = vld [vmem:[#allocation7 + $0x90] sm:$0xff]  }
 0xf8d   :  { %1615 = vadd.xlane.f32.xlu0 %v1613_v27  ;;  %v1614_v28 = vmul.f32 %v6395_v26, %v6395_v26  ;;  %v5613_v27 = vld [vmem:[#allocation7 + $0xd8] sm:$0xff]  }
 0xf8f   :  { %1617 = vadd.xlane.f32.xlu1 %v1614_v28  ;;  %v5614_v28 = vld [vmem:[#allocation7 + $0x18] sm:$0xff]  }
0x101a   :  { %v1616_v48 = vpop.xlane.xlu0 %1615 }
0x101b   :  { %v1619_v49 = vmul.f32 0.0078125, %v1616_v48 }
0x101c   :  { %v1618_v53 = vpop.xlane.xlu1 %1617 }
0x101d   :  { %v1621_v58 = vadd.f32 1e-12, %v1619_v49  ;;  %v1620_v60 = vmul.f32 0.0078125, %v1618_v53 }
0x101f   :  { %5788 = vrsqrt.f32 %v1621_v58  ;;  %v1622_v61 = vadd.f32 1e-12, %v1620_v60 }
0x1021   :  { %5790 = vrsqrt.f32 %v1622_v61 }
0x1029   :  { %v5789_v62 = vpop.eup %5788 }
0x102a   :  { %v1625_v0 = vmul.f32 %v5789_v62, %v6393_v52  ;;  %v5610_v52 = vld [vmem:[#allocation7 + $0x10] sm:$0xff]  }
0x102b   :  { %v5791_v1 = vpop.eup %5790 }
0x102c   :  { %v1626_v2 = vmul.f32 %v5791_v1, %v6395_v26  ;;  %v1633_v3 = vmul.f32 %v4773_v63, %v1625_v0  ;;  %v5612_v26 = vld [vmem:[#allocation7 + $0x58] sm:$0xff]  }
0x102e   :  { %v1634_v6 = vmul.f32 %v4773_v63, %v1626_v2  ;;  %v6409_v7 = vadd.f32 %v4774_v5, %v1633_v3 }
0x1030   :  { %v6411_v10 = vadd.f32 %v4774_v5, %v1634_v6 }
0x1032   :  { %v1643_v12 = vpack.c.bf16 %v6411_v10, %v6409_v7 }
0x1034   :  { %1891 = vmatmul.mubr.bf16.vlgmr.msra.gmra.mrb[44].mxu0 %v1643_v12  ;;  %1934 = vmatmul.mubr.bf16.vlgmr.msra.gmra.mrb[44].mxu1 %v1643_v12 }
0x1035   :  { %5060 = vmatpush3.bf16.msra.mxu0 %v5602_v17  ;;  %5082 = vmatpush3.bf16.msra.mxu1 %v5603_v21 }
0x1036   :  { %5061 = vmatprep.subr.bf16.mxu0 %v5604_v22  ;;  %5083 = vmatprep.subr.bf16.mxu1 %v5605_v23 }
0x1039   :  { %5062 = vmatpush3.bf16.msra.mxu0 %v5606_v24  ;;  %5084 = vmatpush3.bf16.msra.mxu1 %v5607_v50 }
0x103a   :  { %5063 = vmatprep.subr.bf16.mxu0 %v5608_v25  ;;  %5085 = vmatprep.subr.bf16.mxu1 %v5609_v51 }
0x103d   :  { %5064 = vmatpush3.bf16.msra.mxu0 %v5610_v52  ;;  %5086 = vmatpush3.bf16.msra.mxu1 %v5611_v56 }
0x103e   :  { %5065 = vmatprep.subr.bf16.mxu0 %v5612_v26  ;;  %5087 = vmatprep.subr.bf16.mxu1 %v5613_v27 }
0x1041   :  { %5066 = vmatpush3.bf16.msra.mxu0 %v5614_v28  ;;  %5088 = vmatpush3.bf16.msra.mxu1 %v5615_v29 }
0x1042   :  { %5067 = vmatprep.subr.bf16.mxu0 %v5616_v31  ;;  %5089 = vmatprep.subr.bf16.mxu1 %v5617_v8 }
0x1045   :  { %5068 = vmatpush3.bf16.msra.mxu0 %v5618_v11  ;;  %5090 = vmatpush3.bf16.msra.mxu1 %v5619_v20 }
0x1046   :  { %5069 = vmatprep.subr.bf16.mxu0 %v5620_v9  ;;  %5091 = vmatprep.subr.bf16.mxu1 %v5621_v32 }
0x1049   :  { %5070 = vmatpush3.bf16.msra.mxu0 %v5622_v33  ;;  %5092 = vmatpush3.bf16.msra.mxu1 %v5623_v13 }
0x104a   :  { %5071 = vmatprep.subr.bf16.mxu0 %v5624_v34  ;;  %5093 = vmatprep.subr.bf16.mxu1 %v5625_v36 }
0x104d   :  { %5072 = vmatpush3.bf16.msra.mxu0 %v5626_v37  ;;  %5094 = vmatpush3.bf16.msra.mxu1 %v5627_v18 }
0x104e   :  { %5073 = vmatprep.subr.bf16.mxu0 %v5628_v38  ;;  %5095 = vmatprep.subr.bf16.mxu1 %v5629_v19 }
0x1051   :  { %5074 = vmatpush3.bf16.msra.mxu0 %v5630_v40  ;;  %5096 = vmatpush3.bf16.msra.mxu1 %v5631_v41 }
0x1052   :  { %5348 = vmatprep.subr.bf16.mxu1 %v5976_v4 }
0x1107   :  { %v1892_v47 = vpop.f32.mrb[44].mxu0  ;;  %v1935_v48 = vpop.f32.mrb[44].mxu1 }
0x1108   :  { %v6425_v49 = vadd.f32 %v1892_v47, %v1681_v16  ;;  %v6427_v53 = vadd.f32 %v1935_v48, %v1689_v44  ;;  %v1894_v58 = vpop.f32.mrb[45].mxu0  ;;  %v1937_v60 = vpop.f32.mrb[45].mxu1 }
0x1109   :  { %v6429_v61 = vadd.f32 %v1894_v58, %v1685_v45  ;;  %v6431_v62 = vadd.f32 %v1937_v60, %v1693_v46  ;;  %v1896_v63 = vpop.f32.mrb[46].mxu0  ;;  %v1939_v0 = vpop.f32.mrb[46].mxu1 }
0x110a   :  { %v1952_v1 = vmul.f32 0.044715, %v6425_v49  ;;  %v1954_v2 = vmul.f32 0.044715, %v6427_v53  ;;  %v1897_v3 = vadd.f32 %v1896_v63, %v1681_v16  ;;  %v1940_v5 = vadd.f32 %v1939_v0, %v1689_v44  ;;  %v1898_v6 = vpop.f32.mrb[47].mxu0  ;;  %v1941_v12 = vpop.f32.mrb[47].mxu1 }
0x110b   :  { %v1953_v14 = vmul.f32 0.044715, %v6429_v61  ;;  %v1955_v15 = vmul.f32 0.044715, %v6431_v62  ;;  %v6437_v17 = vadd.f32 %v1898_v6, %v1685_v45  ;;  %v6439_v21 = vadd.f32 %v1941_v12, %v1693_v46 }
0x110c   :  { %v1960_v22 = vmul.f32 %v1952_v1, %v6425_v49  ;;  %v1962_v23 = vmul.f32 %v1954_v2, %v6427_v53  ;;  %v1956_v24 = vmul.f32 0.044715, %v1897_v3  ;;  %v1958_v50 = vmul.f32 0.044715, %v1940_v5 }
0x110d   :  { %v1961_v25 = vmul.f32 %v1953_v14, %v6429_v61  ;;  %v1963_v51 = vmul.f32 %v1955_v15, %v6431_v62  ;;  %v1957_v52 = vmul.f32 0.044715, %v6437_v17  ;;  %v1959_v56 = vmul.f32 0.044715, %v6439_v21 }
0x110e   :  { %v1968_v26 = vmul.f32 %v1960_v22, %v6425_v49  ;;  %v1970_v27 = vmul.f32 %v1962_v23, %v6427_v53  ;;  %v1964_v28 = vmul.f32 %v1956_v24, %v1897_v3  ;;  %v1966_v29 = vmul.f32 %v1958_v50, %v1940_v5 }
0x110f   :  { %v1969_v31 = vmul.f32 %v1961_v25, %v6429_v61  ;;  %v1971_v8 = vmul.f32 %v1963_v51, %v6431_v62  ;;  %v1965_v11 = vmul.f32 %v1957_v52, %v6437_v17  ;;  %v1967_v20 = vmul.f32 %v1959_v56, %v6439_v21 }
0x1110   :  { %v1976_v9 = vadd.f32 %v1968_v26, %v6425_v49  ;;  %v1978_v32 = vadd.f32 %v1970_v27, %v6427_v53  ;;  %v1972_v33 = vmul.f32 %v1964_v28, %v1897_v3  ;;  %v1974_v13 = vmul.f32 %v1966_v29, %v1940_v5 }
0x1111   :  { %v1973_v34 = vmul.f32 %v1965_v11, %v6437_v17  ;;  %v1975_v36 = vmul.f32 %v1967_v20, %v6439_v21  ;;  %v1977_v40 = vadd.f32 %v1969_v31, %v6429_v61  ;;  %v1979_v44 = vadd.f32 %v1971_v8, %v6431_v62 }
0x1112   :  { %v1984_v37 = vmul.f32 0.7978846, %v1976_v9  ;;  %v1986_v18 = vmul.f32 0.7978846, %v1978_v32  ;;  %v1980_v38 = vadd.f32 %v1972_v33, %v1897_v3  ;;  %v1982_v19 = vadd.f32 %v1974_v13, %v1940_v5 }
0x1113   :  { %v1981_v41 = vadd.f32 %v1973_v34, %v6437_v17  ;;  %v1985_v45 = vmul.f32 0.7978846, %v1977_v40  ;;  %v1983_v47 = vadd.f32 %v1975_v36, %v6439_v21  ;;  %v1987_v48 = vmul.f32 0.7978846, %v1979_v44 }
0x1114   :  { %5792 = vtanh.f32 %v1984_v37  ;;  %v1988_v42 = vmul.f32 0.7978846, %v1980_v38  ;;  %v1990_v16 = vmul.f32 0.7978846, %v1982_v19  ;;  %v1944_v12 = vmul.f32 0.5, %v6425_v49 }
0x1115   :  { %5794 = vtanh.f32 %v1986_v18  ;;  %v1989_v46 = vmul.f32 0.7978846, %v1981_v41  ;;  %v1991_v58 = vmul.f32 0.7978846, %v1983_v47  ;;  %v1948_v14 = vmul.f32 0.5, %v1897_v3 }
0x1116   :  { %5796 = vtanh.f32 %v1988_v42  ;;  %v1946_v23 = vmul.f32 0.5, %v6427_v53  ;;  %v1950_v24 = vmul.f32 0.5, %v1940_v5  ;;  %v1945_v51 = vmul.f32 0.5, %v6429_v61 }
0x1117   :  { %5798 = vtanh.f32 %v1990_v16  ;;  %v1949_v28 = vmul.f32 0.5, %v6437_v17  ;;  %v1947_v3 = vmul.f32 0.5, %v6431_v62  ;;  %v1951_v11 = vmul.f32 0.5, %v6439_v21  ;;  %v4807_v17 = vld [vmem:[%s6834_s13] ss:$0 sm:$0xff] }
0x1118   :  { %5800 = vtanh.f32 %v1985_v45 }
0x1119   :  { %5802 = vtanh.f32 %v1989_v46 }
0x111a   :  { %5804 = vtanh.f32 %v1987_v48 }
0x111b   :  { %5806 = vtanh.f32 %v1991_v58 }
0x111e   :  { %v5793_v60 = vpop.eup %5792 }
0x111f   :  { %v5795_v63 = vpop.eup %5794  ;;  %v2000_v0 = vadd.f32 1.0, %v5793_v60 }
0x1120   :  { %v5797_v1 = vpop.eup %5796  ;;  %v2002_v2 = vadd.f32 1.0, %v5795_v63 }
0x1121   :  { %v5799_v6 = vpop.eup %5798  ;;  %v2004_v15 = vadd.f32 1.0, %v5797_v1  ;;  %v2008_v56 = vmul.f32 %v2000_v0, %v1944_v12  ;;  %v5632_v0 = vld [vmem:[#allocation2 + $0xc0] ss:$12 sps:$4 sm:$0xff]   ;;  %v5634_v1 = vld [vmem:[#allocation2 + $0xc4] ss:$12 sps:$4 sm:$0xff]  }
0x1122   :  { %v5801_v22 = vpop.eup %5800  ;;  %v2006_v50 = vadd.f32 1.0, %v5799_v6  ;;  %v2010_v31 = vmul.f32 %v2002_v2, %v1946_v23  ;;  %v5635_v2 = vld [vmem:[#allocation2 + $0xc8] ss:$12 sps:$4 sm:$0xff]   ;;  %2587 = vmatprep.subr.bf16.mxu0 %v5634_v1  ;;  %v5639_v12 = vld [vmem:[#allocation2 + $0xe0] ss:$12 sps:$4 sm:$0xff]  }
0x1123   :  { %v5803_v25 = vpop.eup %5802  ;;  %v2001_v52 = vadd.f32 1.0, %v5801_v22  ;;  %v2012_v26 = vmul.f32 %v2004_v15, %v1948_v14  ;;  %v5638_v6 = vld [vmem:[#allocation2 + $0xdc] ss:$12 sps:$4 sm:$0xff]   ;;  %v5636_v14 = vld [vmem:[#allocation2 + $0xd8] ss:$12 sps:$4 sm:$0xff]  }
0x1124   :  { %v5805_v27 = vpop.eup %5804  ;;  %v2005_v29 = vadd.f32 1.0, %v5803_v25  ;;  %v2014_v8 = vmul.f32 %v2006_v50, %v1950_v24 }
0x1125   :  { %v5807_v49 = vpop.eup %5806  ;;  %v2003_v53 = vadd.f32 1.0, %v5805_v27  ;;  %v2016_v5 = vpack.c.bf16 %v2012_v26, %v2008_v56  ;;  %v2009_v20 = vmul.f32 %v2001_v52, %v1945_v51  ;;  %v5642_v51 = vld [vmem:[#allocation2 + $0xf4] ss:$12 sps:$4 sm:$0xff]   ;;  %v5640_v52 = vld [vmem:[#allocation2 + $0xf0] ss:$12 sps:$4 sm:$0xff]  }
0x1126   :  { %v2013_v9 = vmul.f32 %v2005_v29, %v1949_v28  ;;  %v2007_v32 = vadd.f32 1.0, %v5807_v49  ;;  %v2018_v61 = vpack.c.bf16 %v2014_v8, %v2010_v31  ;;  %v5643_v56 = vld [vmem:[#allocation2 + $0xf8] ss:$12 sps:$4 sm:$0xff]   ;;  %v5644_v27 = vld [vmem:[#allocation2 + $0x108] ss:$12 sps:$4 sm:$0xff]  }
0x1127   :  { %v2011_v13 = vmul.f32 %v2003_v53, %v1947_v3  ;;  %v5646_v26 = vld [vmem:[#allocation2 + $0x10c] ss:$12 sps:$4 sm:$0xff]   ;;  %v5647_v28 = vld [vmem:[#allocation2 + $0x110] ss:$12 sps:$4 sm:$0xff]   ;;  %v5651_v8 = vld [vmem:[#allocation2 + $0x128] ss:$12 sps:$4 sm:$0xff]  }
0x1128   :  { %v2017_v33 = vpack.c.bf16 %v2013_v9, %v2009_v20  ;;  %v2015_v34 = vmul.f32 %v2007_v32, %v1951_v11  ;;  %v5648_v29 = vld [vmem:[#allocation2 + $0x120] ss:$12 sps:$4 sm:$0xff]   ;;  %v5650_v31 = vld [vmem:[#allocation2 + $0x124] ss:$12 sps:$4 sm:$0xff]   ;;  %v5654_v49 = vld [vmem:[#allocation2 + $0x13c] ss:$12 sps:$4 sm:$0xff]  }
0x1129   :  { %v5652_v3 = vld [vmem:[#allocation2 + $0x138] ss:$12 sps:$4 sm:$0xff]   ;;  %v5655_v11 = vld [vmem:[#allocation2 + $0x140] ss:$12 sps:$4 sm:$0xff]   ;;  %v5660_v32 = vld [vmem:[#allocation2 + $0x168] ss:$12 sps:$4 sm:$0xff]  }
0x112a   :  { %2315 = vmatprep.mubr.bf16.mxu0 %v2017_v33  ;;  %v2019_v36 = vpack.c.bf16 %v2015_v34, %v2011_v13  ;;  %v5658_v53 = vld [vmem:[#allocation2 + $0x154] ss:$12 sps:$4 sm:$0xff]   ;;  %v5659_v20 = vld [vmem:[#allocation2 + $0x158] ss:$12 sps:$4 sm:$0xff]  }
0x112b   :  { %2316 = vmatmul.mubr.bf16.vlgmr.msra.gmra.mrb[48].mxu0 %v2016_v5  ;;  %v5656_v5 = vld [vmem:[#allocation2 + $0x150] ss:$12 sps:$4 sm:$0xff]   ;;  %v5662_v9 = vld [vmem:[#allocation2 + $0x16c] ss:$12 sps:$4 sm:$0xff]  }
0x112c   :  { %2356 = vmatprep.mubr.bf16.mxu1 %v2019_v36  ;;  %2619 = vmatprep.mubr.bf16.mxu0 %v5977_v30 }
0x112d   :  { %2357 = vmatmul.mubr.bf16.vlgmr.msra.gmra.mrb[48].mxu1 %v2018_v61  ;;  %2588 = vmatpush1.bf16.msra.mxu0 %v5632_v0  ;;  %v5663_v61 = vld [vmem:[#allocation2 + $0x170] ss:$12 sps:$4 sm:$0xff]  }
0x112e   :  { %5364 = vmatprep.mubr.msk.bf16.mxu1 %vm5978_vm0, %v5976_v4  ;;  %5349 = vmatpush3.bf16.msra.mxu1 %v5635_v2 }
0x112f   :  { %5350 = vmatprep.subr.bf16.mxu1 %v5976_v4  ;;  %2589 = vmatprep.subr.bf16.mxu0 %v5638_v6 }
0x1131   :  { %2590 = vmatpush1.bf16.msra.mxu0 %v5636_v14 }
0x1132   :  { %5351 = vmatpush3.bf16.msra.mxu1 %v5639_v12  ;;  %2591 = vmatprep.subr.bf16.mxu0 %v5642_v51 }
0x1133   :  { %5352 = vmatprep.subr.bf16.mxu1 %v5976_v4 }
0x1135   :  { %2592 = vmatpush1.bf16.msra.mxu0 %v5640_v52 }
0x1136   :  { %5353 = vmatpush3.bf16.msra.mxu1 %v5643_v56  ;;  %2593 = vmatprep.subr.bf16.mxu0 %v5646_v26 }
0x1137   :  { %5354 = vmatprep.subr.bf16.mxu1 %v5976_v4 }
0x1139   :  { %2594 = vmatpush1.bf16.msra.mxu0 %v5644_v27 }
0x113a   :  { %5355 = vmatpush3.bf16.msra.mxu1 %v5647_v28  ;;  %2595 = vmatprep.subr.bf16.mxu0 %v5650_v31 }
0x113b   :  { %5356 = vmatprep.subr.bf16.mxu1 %v5976_v4 }
0x113d   :  { %2596 = vmatpush1.bf16.msra.mxu0 %v5648_v29 }
0x113e   :  { %5357 = vmatpush3.bf16.msra.mxu1 %v5651_v8  ;;  %2597 = vmatprep.subr.bf16.mxu0 %v5654_v49 }
0x113f   :  { %5358 = vmatprep.subr.bf16.mxu1 %v5976_v4 }
0x1141   :  { %2598 = vmatpush1.bf16.msra.mxu0 %v5652_v3 }
0x1142   :  { %5359 = vmatpush3.bf16.msra.mxu1 %v5655_v11  ;;  %2599 = vmatprep.subr.bf16.mxu0 %v5658_v53 }
0x1143   :  { %5360 = vmatprep.subr.bf16.mxu1 %v5976_v4 }
0x1145   :  { %2600 = vmatpush1.bf16.msra.mxu0 %v5656_v5 }
0x1146   :  { %5361 = vmatpush3.bf16.msra.mxu1 %v5659_v20  ;;  %2601 = vmatprep.subr.bf16.mxu0 %v5662_v9 }
0x1147   :  { %5362 = vmatprep.subr.bf16.mxu1 %v5976_v4 }
0x1149   :  { %2602 = vmatpush1.bf16.msra.mxu0 %v5660_v32 }
0x114a   :  { %5363 = vmatpush3.bf16.msra.mxu1 %v5663_v61  ;;  %5368 = vmatprep.subr.bf16.mxu0 %v5976_v4 }
0x114b   :  { %5374 = vmatprep.subr.bf16.mxu1 %v5976_v4 }
0x11fe   :  { %v5075_v62 = vpop.f32.mrb[48].mxu0 }
0x11ff   :  { %v5076_v21 = vpop.f32.mrb[49].mxu0 }
0x1200   :  { %v5097_v37 = vpop.f32.mrb[48].mxu1  ;;  %v5077_v18 = vadd.f32 %v5076_v21, %v5075_v62  ;;  %v5078_v38 = vpop.f32.mrb[50].mxu0 }
0x1201   :  { %v5098_v19 = vpop.f32.mrb[49].mxu1  ;;  %v5079_v40 = vpop.f32.mrb[51].mxu0 }
0x1202   :  { %v2318_v41 = vadd.f32 %v5077_v18, %v4807_v17  ;;  %v5099_v42 = vadd.f32 %v5098_v19, %v5097_v37  ;;  %v5100_v16 = vpop.f32.mrb[50].mxu1  ;;  %v5080_v44 = vadd.f32 %v5079_v40, %v5078_v38  ;;  %v4840_v37 = vld [vmem:[%s6835_s14] ss:$0 sm:$0xff] }
0x1203   :  { %v5101_v45 = vpop.f32.mrb[51].mxu1 }
0x1204   :  { %v2359_v46 = vadd.f32 %v5099_v42, %v2318_v41  ;;  %v2321_v47 = vadd.f32 %v5080_v44, %v4807_v17  ;;  %v5102_v48 = vadd.f32 %v5101_v45, %v5100_v16  ;;  %v4841_v41 = vld [vmem:[%s6836_s15] ss:$0 sm:$0xff] }
0x1206   :  { %v2362_v58 = vadd.f32 %v5102_v48, %v2321_v47  ;;  %v2365_v60 = vadd.f32 %v2359_v46, %v6409_v7  ;;  %v4842_v46 = vld [vmem:[%s6826_s5 + $0x3] sm:$0x7] }
0x1207   :  { %v2451_v47 = vrot.slane %v4842_v46, %v6154_v55  ;;  %v2455_v0 = vrot.slane %v4842_v46, %v6160_v57 }
0x1208   :  { %2369 = vadd.xlane.f32.xlu0 %v2365_v60  ;;  %v2366_v63 = vadd.f32 %v2362_v58, %v6411_v10 }
0x120a   :  { %2371 = vadd.xlane.f32.xlu1 %v2366_v63 }
0x1295   :  { %v2370_v7 = vpop.xlane.xlu0 %2369 }
0x1296   :  { %v2373_v15 = vmul.f32 0.0078125, %v2370_v7  ;;  %v2447_v7 = vrot.slane %v4842_v46, %v6164_v59 }
0x1297   :  { %v2372_v10 = vpop.xlane.xlu1 %2371 }
0x1298   :  { %v2375_v22 = vsub.f32 %v2365_v60, %v2373_v15  ;;  %v2374_v23 = vmul.f32 0.0078125, %v2372_v10 }
0x129a   :  { %v2376_v24 = vsub.f32 %v2366_v63, %v2374_v23  ;;  %v2377_v50 = vmul.f32 %v2375_v22, %v2375_v22 }
0x129c   :  { %2379 = vadd.xlane.f32.xlu0 %v2377_v50  ;;  %v2378_v25 = vmul.f32 %v2376_v24, %v2376_v24 }
0x129e   :  { %2381 = vadd.xlane.f32.xlu1 %v2378_v25 }
0x1329   :  { %v2380_v33 = vpop.xlane.xlu0 %2379 }
0x132a   :  { %v2383_v13 = vmul.f32 0.0078125, %v2380_v33 }
0x132b   :  { %v2382_v34 = vpop.xlane.xlu1 %2381 }
0x132c   :  { %v2385_v36 = vadd.f32 1e-12, %v2383_v13  ;;  %v2384_v62 = vmul.f32 0.0078125, %v2382_v34 }
0x132e   :  { %5808 = vrsqrt.f32 %v2385_v36  ;;  %v2386_v17 = vadd.f32 1e-12, %v2384_v62 }
0x1330   :  { %5810 = vrsqrt.f32 %v2386_v17 }
0x1338   :  { %v5809_v21 = vpop.eup %5808 }
0x1339   :  { %v2389_v18 = vmul.f32 %v5809_v21, %v2375_v22 }
0x133a   :  { %v5811_v38 = vpop.eup %5810 }
0x133b   :  { %v2390_v19 = vmul.f32 %v5811_v38, %v2376_v24  ;;  %v2397_v40 = vmul.f32 %v4840_v37, %v2389_v18 }
0x133d   :  { %v2398_v42 = vmul.f32 %v4840_v37, %v2390_v19  ;;  %v6490_v16 = vadd.f32 %v4841_v41, %v2397_v40 }
0x133f   :  { %v6492_v44 = vadd.f32 %v4841_v41, %v2398_v42 }
0x1341   :  { %v2407_v45 = vpack.c.bf16 %v6492_v44, %v6490_v16 }
0x1343   :  { %2620 = vmatmul.mubr.bf16.vlgmr.msra.gmra.mrb[52].mxu0 %v2407_v45  ;;  %5365 = vmatmul.mubr.bf16.vlgmr.msra.gmra.mrb[52].mxu1 %v2407_v45 }
0x1344   :  { %5370 = vmatprep.mubr.msk.bf16.mxu0 %vm5978_vm0, %v5976_v4  ;;  %5376 = vmatprep.mubr.msk.bf16.mxu1 %vm5978_vm0, %v5976_v4 }
0x1416   :  { %v2621_v48 = vpop.f32.mrb[52].mxu0  ;;  %v2664_v58 = vpop.f32.mrb[52].mxu1 }
0x1417   :  { %v2623_v60 = vpop.f32.mrb[53].mxu0  ;;  %v5366_v63 = vpop.f32.mrb[53].mxu1  ;;  %v2665_v22 = vadd.f32 %v2664_v58, %v2455_v0  ;;  %v2622_v50 = vadd.f32 %v2621_v48, %v2447_v7 }
0x1418   :  { %v2624_v1 = vadd.f32 %v2623_v60, %v2451_v47  ;;  %v2625_v2 = vpop.f32.mrb[54].mxu0  ;;  %v2667_v6 = vpop.f32.mrb[54].mxu1  ;;  %v5664_v60 = vld [vmem:[%s6827_s6 + $0x40] sm:$0xff]  }
0x1419   :  { %v2627_v12 = vpop.f32.mrb[55].mxu0  ;;  %v5367_v14 = vpop.f32.mrb[55].mxu1  ;;  %v2668_v25 = vadd.f32 %v2667_v6, %v2455_v0  ;;  %v6515_v52 = vpack.c.bf16 %v2665_v22, %v2665_v22  ;;  %v2626_v56 = vadd.f32 %v2625_v2, %v2447_v7  ;;  %v6518_v26 = vpack.c.bf16 %v2622_v50, %v2622_v50  ;;  %v5665_v6 = vld [vmem:[%s6827_s6 + $0x48] sm:$0xff]  }
0x141a   :  { %v6506_v15 = vpack.c.bf16 %v2624_v1, %v2624_v1  ;;  %v2628_v10 = vadd.f32 %v2627_v12, %v2451_v47 }
0x141b   :  { %v6520_v27 = vpack.c.bf16 %v2668_v25, %v2668_v25  ;;  %v6522_v28 = vpack.c.bf16 %v2626_v56, %v2626_v56  ;;  %v2821_v29 = vsel %vm587_vm2, %v6515_v52, 0 }
0x141c   :  { %v6508_v23 = vpack.c.bf16 %v2628_v10, %v2628_v10  ;;  %v2701_v24 = vsel %vm462_vm1, %v6506_v15, 0 }
0x141d   :  { %5369 = vmatpush3.bf16.xpose.msra.mxu0 %v2701_v24  ;;  %v2867_v31 = vsel %vm587_vm2, %v6520_v27, 0 }
0x141e   :  { %v2747_v51 = vsel %vm462_vm1, %v6508_v23, 0  ;;  %5380 = vmatprep.subr.bf16.mxu0 %v5976_v4 }
0x141f   :  { %5375 = vmatpush3.bf16.xpose.msra.mxu1 %v2747_v51 }
0x1420   :  { %5386 = vmatprep.subr.bf16.mxu1 %v5976_v4 }
0x1424   :  { %5371 = vmatmul.mubr.msk.bf16.vlgmr.msra.gmra.mrb[56].mxu0 %vm462_vm1, %v6518_v26 }
0x1425   :  { %5381 = vmatpush3.bf16.msra.mxu0 %v2821_v29  ;;  %5382 = vmatprep.mubr.msk.bf16.mxu0 %vm5978_vm0, %v5976_v4 }
0x1426   :  { %5377 = vmatmul.mubr.msk.bf16.vlgmr.msra.gmra.mrb[56].mxu1 %vm462_vm1, %v6522_v28  ;;  %5392 = vmatprep.subr.bf16.mxu0 %v5976_v4 }
0x1427   :  { %5387 = vmatpush3.bf16.msra.mxu1 %v2867_v31  ;;  %5388 = vmatprep.mubr.msk.bf16.mxu1 %vm5978_vm0, %v5976_v4 }
0x1428   :  { %5400 = vmatprep.subr.bf16.mxu1 %v5976_v4 }
0x14f7   :  { %v2737_v8 = vpop.f32.mrb[56].mxu0 }
0x14f8   :  { %v2789_v49 = vmul.f32 0.17677669, %v2737_v8  ;;  %v5372_v3 = vpop.f32.mrb[57].mxu0 }
0x14f9   :  { %v2740_v11 = vpop.f32.mrb[58].mxu0  ;;  %v2783_v53 = vpop.f32.mrb[56].mxu1 }
0x14fa   :  { %v2790_v5 = vmul.f32 0.17677669, %v2783_v53  ;;  %v5373_v20 = vpop.f32.mrb[59].mxu0  ;;  %v5378_v9 = vpop.f32.mrb[57].mxu1  ;;  %v2791_v32 = vadd.f32 %v2789_v49, %v6205_v35 }
0x14fb   :  { %v2786_v61 = vpop.f32.mrb[58].mxu1 }
0x14fc   :  { %v5379_v33 = vpop.f32.mrb[59].mxu1  ;;  %v2793_v13 = vsel %vm559_vm3, %v2791_v32, -inf  ;;  %v2792_v34 = vadd.f32 %v2790_v5, %v6208_v39 }
0x14fd   :  { %2794 = vmax.xlane.f32.xlu0 %v2793_v13 }
0x14fe   :  { %v2796_v36 = vsel %vm559_vm3, %v2792_v34, -inf }
0x14ff   :  { %2797 = vmax.xlane.f32.xlu1 %v2796_v36 }
0x158a   :  { %v2795_v62 = vpop.xlane.xlu0 %2794 }
0x158b   :  { %v2799_v17 = vsub.f32 %v2791_v32, %v2795_v62 }
0x158c   :  { %v2798_v21 = vpop.xlane.xlu1 %2797 }
0x158d   :  { %v2801_v37 = vmul.f32 1.442695, %v2799_v17  ;;  %v2800_v18 = vsub.f32 %v2792_v34, %v2798_v21 }
0x158f   :  { %5812 = vpow2.f32 %v2801_v37  ;;  %v2803_v38 = vmul.f32 1.442695, %v2800_v18 }
0x1591   :  { %5814 = vpow2.f32 %v2803_v38 }
0x1599   :  { %v5813_v19 = vpop.eup %5812 }
0x159a   :  { %v2805_v40 = vsel %vm559_vm3, %v5813_v19, 0.0 }
0x159b   :  { %v5815_v41 = vpop.eup %5814  ;;  %2806 = vadd.xlane.f32.xlu0 %v2805_v40 }
0x159c   :  { %v2808_v42 = vsel %vm559_vm3, %v5815_v41, 0.0 }
0x159d   :  { %2809 = vadd.xlane.f32.xlu1 %v2808_v42 }
0x15ae   :  { %3025 = vrot.lane.b32.xlu1 %v6508_v23, %s5980_s27 }
0x15b1   :  { %2975 = vrot.lane.b32.xlu0 %v6506_v15, %s5980_s27 }
0x15b2   :  { %2973 = vrot.lane.b32.xlu1 %v6518_v26, %s5980_s27 }
0x15b6   :  { %3023 = vrot.lane.b32.xlu1 %v6522_v28, %s5980_s27 }
0x1628   :  { %v2807_v45 = vpop.xlane.xlu0 %2806 }
0x1629   :  { %5816 = vrcp.f32 %v2807_v45 }
0x162a   :  { %v2810_v46 = vpop.xlane.xlu1 %2809 }
0x162b   :  { %5818 = vrcp.f32 %v2810_v46 }
0x162c   :  { %v2976_v1 = vpop.permute.xlu0 %2975 }
0x162d   :  { %v2981_v12 = vsel %vm462_vm1, %v2976_v1, 0 }
0x162e   :  { %v3026_v14 = vpop.permute.xlu1 %3025 }
0x162f   :  { %v3031_v31 = vsel %vm462_vm1, %v3026_v14, 0 }
0x1632   :  { %v2974_v7 = vpop.permute.xlu1 %2973 }
0x1633   :  { %v5817_v47 = vpop.eup %5816 }
0x1634   :  { %v2813_v48 = vmul.f32 %v5817_v47, %v5813_v19 }
0x1635   :  { %v5819_v58 = vpop.eup %5818 }
0x1636   :  { %v2814_v63 = vmul.f32 %v5819_v58, %v5815_v41  ;;  %v2815_v0 = vpack.c.bf16 %v2813_v48, %v2813_v48  ;;  %v3024_v53 = vpop.permute.xlu1 %3023 }
0x1638   :  { %5383 = vmatmul.mubr.msk.bf16.vlgmr.msra.gmra.mrb[60].mxu0 %vm559_vm3, %v2815_v0  ;;  %v2816_v2 = vpack.c.bf16 %v2814_v63, %v2814_v63 }
0x1639   :  { %5393 = vmatpush3.bf16.msra.mxu0 %v5664_v60  ;;  %5396 = vmatprep.mubr.msk.bf16.mxu0 %vm5978_vm0, %v5976_v4 }
0x163a   :  { %5389 = vmatmul.mubr.msk.bf16.vlgmr.msra.gmra.mrb[60].mxu1 %vm559_vm3, %v2816_v2  ;;  %5394 = vmatprep.subr.bf16.mxu0 %v5976_v4 }
0x163b   :  { %5401 = vmatpush3.bf16.xpose.msra.mxu1 %v2981_v12  ;;  %5402 = vmatprep.mubr.msk.bf16.mxu1 %vm5978_vm0, %v5976_v4 }
0x163c   :  { %5412 = vmatprep.subr.bf16.mxu1 %v5976_v4 }
0x163d   :  { %5395 = vmatpush3.bf16.msra.mxu0 %v5665_v6 }
0x163e   :  { %5406 = vmatprep.subr.bf16.mxu0 %v5976_v4 }
0x1642   :  { %5403 = vmatmul.mubr.msk.bf16.vlgmr.msra.gmra.mrb[64].mxu1 %vm462_vm1, %v2974_v7 }
0x1643   :  { %5414 = vmatprep.mubr.msk.bf16.mxu1 %vm5978_vm0, %v5976_v4 }
0x170b   :  { %v2857_v10 = vpop.f32.mrb[60].mxu0 }
0x170c   :  { %v5384_v22 = vpop.f32.mrb[61].mxu0 }
0x170d   :  { %v2860_v24 = vpop.f32.mrb[62].mxu0  ;;  %v2903_v50 = vpop.f32.mrb[60].mxu1 }
0x170e   :  { %v2909_v25 = vpack.c.bf16 %v2903_v50, %v2857_v10  ;;  %v5385_v51 = vpop.f32.mrb[63].mxu0  ;;  %v5390_v56 = vpop.f32.mrb[61].mxu1  ;;  %v5666_v10 = vld [vmem:[%s6827_s6 + $0x50] sm:$0xff]  }
0x170f   :  { %v2906_v29 = vpop.f32.mrb[62].mxu1 }
0x1710   :  { %v5391_v8 = vpop.f32.mrb[63].mxu1  ;;  %5397 = vmatmul.mubr.msk.bf16.vlgmr.msra.gmra.mrb[64].mxu0 %vm462_vm1, %v2909_v25 }
0x1711   :  { %5407 = vmatpush3.bf16.xpose.msra.mxu0 %v3031_v31  ;;  %5408 = vmatprep.mubr.msk.bf16.mxu0 %vm5978_vm0, %v5976_v4  ;;  %v5667_v31 = vld [vmem:[%s6827_s6 + $0x58] sm:$0xff]  }
0x1712   :  { %5418 = vmatprep.subr.bf16.mxu0 %v5976_v4 }
0x1715   :  { %v3017_v49 = vpop.f32.mrb[64].mxu1 }
0x1716   :  { %v3073_v3 = vmul.f32 0.17677669, %v3017_v49  ;;  %v5404_v11 = vpop.f32.mrb[65].mxu1 }
0x1717   :  { %v3020_v5 = vpop.f32.mrb[66].mxu1 }
0x1718   :  { %v5405_v20 = vpop.f32.mrb[67].mxu1  ;;  %5409 = vmatmul.mubr.msk.bf16.vlgmr.msra.gmra.mrb[68].mxu0 %vm462_vm1, %v3024_v53  ;;  %v3075_v9 = vadd.f32 %v3073_v3, %v6205_v35 }
0x1719   :  { %5420 = vmatprep.mubr.msk.bf16.mxu0 %vm5978_vm0, %v5976_v4 }
0x171a   :  { %v3077_v32 = vsel %vm559_vm3, %v3075_v9, -inf }
0x171b   :  { %3078 = vmax.xlane.f32.xlu0 %v3077_v32 }
0x17a8   :  { %v3079_v61 = vpop.xlane.xlu0 %3078 }
0x17a9   :  { %v3083_v33 = vsub.f32 %v3075_v9, %v3079_v61 }
0x17ab   :  { %v3085_v13 = vmul.f32 1.442695, %v3083_v33 }
0x17ad   :  { %5820 = vpow2.f32 %v3085_v13 }
0x17b7   :  { %v5821_v34 = vpop.eup %5820 }
0x17b8   :  { %v3089_v36 = vsel %vm559_vm3, %v5821_v34, 0.0 }
0x17b9   :  { %3090 = vadd.xlane.f32.xlu0 %v3089_v36 }
0x17e3   :  { %v6582_v62 = vpop.f32.mrb[64].mxu0 }
0x17e4   :  { %v5398_v17 = vpop.f32.mrb[65].mxu0 }
0x17e5   :  { %v6584_v21 = vpop.f32.mrb[66].mxu0 }
0x17e6   :  { %v5399_v37 = vpop.f32.mrb[67].mxu0 }
0x17eb   :  { %v3067_v18 = vpop.f32.mrb[68].mxu0 }
0x17ec   :  { %v3074_v38 = vmul.f32 0.17677669, %v3067_v18  ;;  %v5410_v19 = vpop.f32.mrb[69].mxu0 }
0x17ed   :  { %v3070_v40 = vpop.f32.mrb[70].mxu0 }
0x17ee   :  { %v5411_v41 = vpop.f32.mrb[71].mxu0  ;;  %v3076_v42 = vadd.f32 %v3074_v38, %v6208_v39 }
0x17f0   :  { %v3080_v45 = vsel %vm559_vm3, %v3076_v42, -inf }
0x17f1   :  { %3081 = vmax.xlane.f32.xlu1 %v3080_v45 }
0x1802   :  { %3149 = vrot.lane.b32.xlu1 %v6520_v27, %s5980_s27 }
0x1806   :  { %3262 = vrot.lane.b32.xlu1 %v6506_v15, %s5974_s4 }
0x180a   :  { %3312 = vrot.lane.b32.xlu1 %v6508_v23, %s5974_s4 }
0x180e   :  { %3310 = vrot.lane.b32.xlu1 %v6522_v28, %s5974_s4 }
0x1846   :  { %v3091_v1 = vpop.xlane.xlu0 %3090 }
0x187e   :  { %v3082_v46 = vpop.xlane.xlu1 %3081 }
0x187f   :  { %v3084_v47 = vsub.f32 %v3076_v42, %v3082_v46 }
0x1881   :  { %v3087_v48 = vmul.f32 1.442695, %v3084_v47  ;;  %v4868_v47 = vld [vmem:[%s6828_s7 + $0x1] ss:$0 sm:$0xff] }
0x1882   :  { %v3150_v58 = vpop.permute.xlu1 %3149 }
0x1883   :  { %5822 = vpow2.f32 %v3087_v48  ;;  %v3155_v60 = vsel %vm587_vm2, %v3150_v58, 0  ;;  %v2971_v48 = vadd.f32 %v4868_v47, %v6582_v62 }
0x1884   :  { %5419 = vmatpush3.bf16.msra.mxu0 %v3155_v60  ;;  %5824 = vrcp.f32 %v3091_v1  ;;  %v2972_v60 = vadd.f32 %v4868_v47, %v6584_v21 }
0x1885   :  { %5432 = vmatprep.subr.bf16.mxu0 %v5976_v4 }
0x1886   :  { %v3263_v25 = vpop.permute.xlu1 %3262 }
0x1887   :  { %v3268_v56 = vsel %vm462_vm1, %v3263_v25, 0 }
0x188a   :  { %v3313_v53 = vpop.permute.xlu1 %3312 }
0x188b   :  { %v3318_v61 = vsel %vm462_vm1, %v3313_v53, 0 }
0x188d   :  { %v5823_v63 = vpop.eup %5822 }
0x188e   :  { %v3092_v0 = vsel %vm559_vm3, %v5823_v63, 0.0  ;;  %v5825_v2 = vpop.eup %5824  ;;  %v3311_v17 = vpop.permute.xlu1 %3310 }
0x188f   :  { %3093 = vadd.xlane.f32.xlu0 %v3092_v0  ;;  %v3097_v12 = vmul.f32 %v5825_v2, %v5821_v34 }
0x1891   :  { %v3099_v22 = vpack.c.bf16 %v3097_v12, %v3097_v12 }
0x18a5   :  { %3101 = vrot.lane.b32.xlu0 %v6515_v52, %s5980_s27 }
0x18a9   :  { %3260 = vrot.lane.b32.xlu0 %v6518_v26, %s5974_s4 }
0x191c   :  { %v3094_v6 = vpop.xlane.xlu0 %3093 }
0x191d   :  { %5826 = vrcp.f32 %v3094_v6 }
0x1920   :  { %v3102_v14 = vpop.permute.xlu0 %3101 }
0x1921   :  { %v3107_v7 = vsel %vm587_vm2, %v3102_v14, 0 }
0x1922   :  { %5413 = vmatpush3.bf16.msra.mxu1 %v3107_v7 }
0x1923   :  { %5424 = vmatprep.subr.bf16.mxu1 %v5976_v4 }
0x1924   :  { %v3261_v29 = vpop.permute.xlu0 %3260 }
0x1925   :  { %5415 = vmatmul.mubr.msk.bf16.vlgmr.msra.gmra.mrb[68].mxu1 %vm559_vm3, %v3099_v22 }
0x1926   :  { %5425 = vmatpush3.bf16.msra.mxu1 %v5666_v10  ;;  %5428 = vmatprep.mubr.msk.bf16.mxu1 %vm5978_vm0, %v5976_v4 }
0x1927   :  { %v5827_v24 = vpop.eup %5826  ;;  %5426 = vmatprep.subr.bf16.mxu1 %v5976_v4 }
0x1928   :  { %v3098_v50 = vmul.f32 %v5827_v24, %v5823_v63 }
0x192a   :  { %v3100_v51 = vpack.c.bf16 %v3098_v50, %v3098_v50  ;;  %5427 = vmatpush3.bf16.msra.mxu1 %v5667_v31 }
0x192b   :  { %5438 = vmatprep.subr.bf16.mxu1 %v5976_v4 }
0x192c   :  { %5421 = vmatmul.mubr.msk.bf16.vlgmr.msra.gmra.mrb[72].mxu0 %vm559_vm3, %v3100_v51 }
0x192d   :  { %5433 = vmatpush3.bf16.xpose.msra.mxu0 %v3268_v56  ;;  %5434 = vmatprep.mubr.msk.bf16.mxu0 %vm5978_vm0, %v5976_v4 }
0x192e   :  { %5444 = vmatprep.subr.bf16.mxu0 %v5976_v4 }
0x1934   :  { %5435 = vmatmul.mubr.msk.bf16.vlgmr.msra.gmra.mrb[76].mxu0 %vm462_vm1, %v3261_v29 }
0x1935   :  { %5446 = vmatprep.mubr.msk.bf16.mxu0 %vm5978_vm0, %v5976_v4 }
0x19f8   :  { %v3143_v8 = vpop.f32.mrb[68].mxu1 }
0x19f9   :  { %v5416_v49 = vpop.f32.mrb[69].mxu1 }
0x19fa   :  { %v3146_v3 = vpop.f32.mrb[70].mxu1 }
0x19fb   :  { %v5417_v11 = vpop.f32.mrb[71].mxu1 }
0x19fc   :  { %v5668_v11 = vld [vmem:[%s6827_s6 + $0x60] sm:$0xff]  }
0x19ff   :  { %v3191_v5 = vpop.f32.mrb[72].mxu0 }
0x1a00   :  { %v3197_v20 = vpack.c.bf16 %v3191_v5, %v3143_v8  ;;  %v5422_v9 = vpop.f32.mrb[73].mxu0 }
0x1a01   :  { %v3194_v32 = vpop.f32.mrb[74].mxu0 }
0x1a02   :  { %v5423_v33 = vpop.f32.mrb[75].mxu0  ;;  %5429 = vmatmul.mubr.msk.bf16.vlgmr.msra.gmra.mrb[72].mxu1 %vm462_vm1, %v3197_v20 }
0x1a03   :  { %5439 = vmatpush3.bf16.xpose.msra.mxu1 %v3318_v61  ;;  %5440 = vmatprep.mubr.msk.bf16.mxu1 %vm5978_vm0, %v5976_v4  ;;  %v5669_v33 = vld [vmem:[%s6827_s6 + $0x68] sm:$0xff]  }
0x1a04   :  { %5450 = vmatprep.subr.bf16.mxu1 %v5976_v4 }
0x1a07   :  { %v3304_v13 = vpop.f32.mrb[76].mxu0 }
0x1a08   :  { %v3360_v34 = vmul.f32 0.17677669, %v3304_v13  ;;  %v5436_v36 = vpop.f32.mrb[77].mxu0 }
0x1a09   :  { %v3307_v37 = vpop.f32.mrb[78].mxu0 }
0x1a0a   :  { %v5437_v18 = vpop.f32.mrb[79].mxu0  ;;  %5441 = vmatmul.mubr.msk.bf16.vlgmr.msra.gmra.mrb[76].mxu1 %vm462_vm1, %v3311_v17  ;;  %v3362_v38 = vadd.f32 %v3360_v34, %v6205_v35 }
0x1a0b   :  { %5452 = vmatprep.mubr.msk.bf16.mxu1 %vm5978_vm0, %v5976_v4 }
0x1a0c   :  { %v3364_v19 = vsel %vm559_vm3, %v3362_v38, -inf }
0x1a0d   :  { %3365 = vmax.xlane.f32.xlu0 %v3364_v19 }
0x1a9a   :  { %v3366_v40 = vpop.xlane.xlu0 %3365 }
0x1a9b   :  { %v3370_v41 = vsub.f32 %v3362_v38, %v3366_v40 }
0x1a9d   :  { %v3372_v42 = vmul.f32 1.442695, %v3370_v41 }
0x1a9f   :  { %5828 = vpow2.f32 %v3372_v42 }
0x1aa9   :  { %v5829_v45 = vpop.eup %5828 }
0x1aaa   :  { %v3376_v46 = vsel %vm559_vm3, %v5829_v45, 0.0 }
0x1aab   :  { %3377 = vadd.xlane.f32.xlu0 %v3376_v46 }
0x1ad5   :  { %v3251_v58 = vpop.f32.mrb[72].mxu1 }
0x1ad6   :  { %v6640_v63 = vadd.f32 %v3251_v58, %v2971_v48  ;;  %v5430_v0 = vpop.f32.mrb[73].mxu1 }
0x1ad7   :  { %v3254_v1 = vpop.f32.mrb[74].mxu1 }
0x1ad8   :  { %v6642_v2 = vadd.f32 %v3254_v1, %v2972_v60  ;;  %v5431_v6 = vpop.f32.mrb[75].mxu1 }
0x1add   :  { %v3354_v12 = vpop.f32.mrb[76].mxu1 }
0x1ade   :  { %v3361_v14 = vmul.f32 0.17677669, %v3354_v12  ;;  %v5442_v7 = vpop.f32.mrb[77].mxu1 }
0x1adf   :  { %v3357_v10 = vpop.f32.mrb[78].mxu1 }
0x1ae0   :  { %v5443_v22 = vpop.f32.mrb[79].mxu1  ;;  %v3363_v24 = vadd.f32 %v3361_v14, %v6208_v39 }
0x1ae2   :  { %v3367_v50 = vsel %vm559_vm3, %v3363_v24, -inf }
0x1ae3   :  { %3368 = vmax.xlane.f32.xlu1 %v3367_v50 }
0x1af4   :  { %3436 = vrot.lane.b32.xlu1 %v6520_v27, %s5974_s4 }
0x1af8   :  { %3549 = vrot.lane.b32.xlu1 %v6506_v15, %s5981_s12 }
0x1afc   :  { %3599 = vrot.lane.b32.xlu1 %v6508_v23, %s5981_s12 }
0x1b00   :  { %3597 = vrot.lane.b32.xlu1 %v6522_v28, %s5981_s12 }
0x1b38   :  { %v3378_v15 = vpop.xlane.xlu0 %3377 }
0x1b70   :  { %v3369_v62 = vpop.xlane.xlu1 %3368 }
0x1b71   :  { %v3371_v21 = vsub.f32 %v3363_v24, %v3369_v62 }
0x1b73   :  { %v3374_v25 = vmul.f32 1.442695, %v3371_v21 }
0x1b74   :  { %v3437_v51 = vpop.permute.xlu1 %3436 }
0x1b75   :  { %5830 = vpow2.f32 %v3374_v25  ;;  %v3442_v56 = vsel %vm587_vm2, %v3437_v51, 0 }
0x1b76   :  { %5451 = vmatpush3.bf16.msra.mxu1 %v3442_v56  ;;  %5832 = vrcp.f32 %v3378_v15 }
0x1b77   :  { %5464 = vmatprep.subr.bf16.mxu1 %v5976_v4 }
0x1b78   :  { %v3550_v20 = vpop.permute.xlu1 %3549 }
0x1b79   :  { %v3555_v32 = vsel %vm462_vm1, %v3550_v20, 0 }
0x1b7c   :  { %v3600_v37 = vpop.permute.xlu1 %3599 }
0x1b7d   :  { %v3605_v41 = vsel %vm462_vm1, %v3600_v37, 0 }
0x1b7f   :  { %v5831_v29 = vpop.eup %5830 }
0x1b80   :  { %v3379_v31 = vsel %vm559_vm3, %v5831_v29, 0.0  ;;  %v5833_v23 = vpop.eup %5832  ;;  %v3598_v48 = vpop.permute.xlu1 %3597 }
0x1b81   :  { %3380 = vadd.xlane.f32.xlu0 %v3379_v31  ;;  %v3384_v8 = vmul.f32 %v5833_v23, %v5829_v45 }
0x1b83   :  { %v3386_v53 = vpack.c.bf16 %v3384_v8, %v3384_v8 }
0x1b97   :  { %3388 = vrot.lane.b32.xlu0 %v6515_v52, %s5974_s4 }
0x1b9b   :  { %3547 = vrot.lane.b32.xlu0 %v6518_v26, %s5981_s12 }
0x1c0e   :  { %v3381_v28 = vpop.xlane.xlu0 %3380 }
0x1c0f   :  { %5834 = vrcp.f32 %v3381_v28 }
0x1c12   :  { %v3389_v49 = vpop.permute.xlu0 %3388 }
0x1c13   :  { %v3394_v3 = vsel %vm587_vm2, %v3389_v49, 0 }
0x1c14   :  { %5445 = vmatpush3.bf16.msra.mxu0 %v3394_v3 }
0x1c15   :  { %5456 = vmatprep.subr.bf16.mxu0 %v5976_v4 }
0x1c16   :  { %v3548_v61 = vpop.permute.xlu0 %3547 }
0x1c17   :  { %5447 = vmatmul.mubr.msk.bf16.vlgmr.msra.gmra.mrb[80].mxu0 %vm559_vm3, %v3386_v53 }
0x1c18   :  { %5457 = vmatpush3.bf16.msra.mxu0 %v5668_v11  ;;  %5460 = vmatprep.mubr.msk.bf16.mxu0 %vm5978_vm0, %v5976_v4 }
0x1c19   :  { %v5835_v26 = vpop.eup %5834  ;;  %5458 = vmatprep.subr.bf16.mxu0 %v5976_v4 }
0x1c1a   :  { %v3385_v5 = vmul.f32 %v5835_v26, %v5831_v29 }
0x1c1c   :  { %v3387_v9 = vpack.c.bf16 %v3385_v5, %v3385_v5  ;;  %5459 = vmatpush3.bf16.msra.mxu0 %v5669_v33  ;;  %v5670_v33 = vld [vmem:[%s6827_s6 + $0x70] sm:$0xff]  }
0x1c1d   :  { %5470 = vmatprep.subr.bf16.mxu0 %v5976_v4 }
0x1c1e   :  { %5453 = vmatmul.mubr.msk.bf16.vlgmr.msra.gmra.mrb[80].mxu1 %vm559_vm3, %v3387_v9 }
0x1c1f   :  { %5465 = vmatpush3.bf16.xpose.msra.mxu1 %v3555_v32  ;;  %5466 = vmatprep.mubr.msk.bf16.mxu1 %vm5978_vm0, %v5976_v4 }
0x1c20   :  { %5476 = vmatprep.subr.bf16.mxu1 %v5976_v4 }
0x1c26   :  { %5467 = vmatmul.mubr.msk.bf16.vlgmr.msra.gmra.mrb[84].mxu1 %vm462_vm1, %v3548_v61 }
0x1c27   :  { %5478 = vmatprep.mubr.msk.bf16.mxu1 %vm5978_vm0, %v5976_v4 }
0x1cea   :  { %v3430_v13 = vpop.f32.mrb[80].mxu0 }
0x1ceb   :  { %v5448_v34 = vpop.f32.mrb[81].mxu0 }
0x1cec   :  { %v3433_v36 = vpop.f32.mrb[82].mxu0 }
0x1ced   :  { %v5449_v17 = vpop.f32.mrb[83].mxu0 }
0x1cf1   :  { %v3478_v18 = vpop.f32.mrb[80].mxu1 }
0x1cf2   :  { %v3484_v38 = vpack.c.bf16 %v3478_v18, %v3430_v13  ;;  %v5454_v19 = vpop.f32.mrb[81].mxu1  ;;  %v5671_v13 = vld [vmem:[%s6827_s6 + $0x78] sm:$0xff]  }
0x1cf3   :  { %v3481_v40 = vpop.f32.mrb[82].mxu1 }
0x1cf4   :  { %v5455_v42 = vpop.f32.mrb[83].mxu1  ;;  %5461 = vmatmul.mubr.msk.bf16.vlgmr.msra.gmra.mrb[84].mxu0 %vm462_vm1, %v3484_v38 }
0x1cf5   :  { %5471 = vmatpush3.bf16.xpose.msra.mxu0 %v3605_v41  ;;  %5472 = vmatprep.mubr.msk.bf16.mxu0 %vm5978_vm0, %v5976_v4 }
0x1cf6   :  { %5482 = vmatprep.subr.bf16.mxu0 %v5976_v4 }
0x1cf9   :  { %v3591_v45 = vpop.f32.mrb[84].mxu1 }
0x1cfa   :  { %v3647_v46 = vmul.f32 0.17677669, %v3591_v45  ;;  %v5468_v47 = vpop.f32.mrb[85].mxu1 }
0x1cfb   :  { %v3594_v58 = vpop.f32.mrb[86].mxu1 }
0x1cfc   :  { %v5469_v60 = vpop.f32.mrb[87].mxu1  ;;  %5473 = vmatmul.mubr.msk.bf16.vlgmr.msra.gmra.mrb[88].mxu0 %vm462_vm1, %v3598_v48  ;;  %v3649_v0 = vadd.f32 %v3647_v46, %v6205_v35 }
0x1cfd   :  { %5484 = vmatprep.mubr.msk.bf16.mxu0 %vm5978_vm0, %v5976_v4 }
0x1cfe   :  { %v3651_v1 = vsel %vm559_vm3, %v3649_v0, -inf }
0x1cff   :  { %3652 = vmax.xlane.f32.xlu0 %v3651_v1  ;;  %v5674_v1 = vld [vmem:[#allocation5 + $0x104] ss:$16 sps:$4 sm:$0xff]  }
0x1d8c   :  { %v3653_v6 = vpop.xlane.xlu0 %3652 }
0x1d8d   :  { %v3657_v12 = vsub.f32 %v3649_v0, %v3653_v6  ;;  %v5672_v0 = vld [vmem:[#allocation5 + $0x100] ss:$16 sps:$4 sm:$0xff]   ;;  %v5675_v6 = vld [vmem:[#allocation5 + $0x108] ss:$16 sps:$4 sm:$0xff]  }
0x1d8f   :  { %v3659_v14 = vmul.f32 1.442695, %v3657_v12  ;;  %v5677_v12 = vld [vmem:[#allocation5 + $0x10c] ss:$16 sps:$4 sm:$0xff]  }
0x1d91   :  { %5836 = vpow2.f32 %v3659_v14  ;;  %v5680_v14 = vld [vmem:[#allocation5 + $0x124] ss:$16 sps:$4 sm:$0xff]  }
0x1d9b   :  { %v5837_v7 = vpop.eup %5836 }
0x1d9c   :  { %v3663_v10 = vsel %vm559_vm3, %v5837_v7, 0.0 }
0x1d9d   :  { %3664 = vadd.xlane.f32.xlu0 %v3663_v10  ;;  %v5681_v10 = vld [vmem:[#allocation5 + $0x128] ss:$16 sps:$4 sm:$0xff]  }
0x1dc7   :  { %v3538_v22 = vpop.f32.mrb[84].mxu0 }
0x1dc8   :  { %v3545_v24 = vadd.f32 %v3538_v22, %v6640_v63  ;;  %v5462_v50 = vpop.f32.mrb[85].mxu0 }
0x1dc9   :  { %v3541_v62 = vpop.f32.mrb[86].mxu0 }
0x1dca   :  { %v3546_v35 = vadd.f32 %v3541_v62, %v6642_v2  ;;  %v5463_v21 = vpop.f32.mrb[87].mxu0 }
0x1dcf   :  { %v3641_v25 = vpop.f32.mrb[88].mxu0 }
0x1dd0   :  { %v3648_v51 = vmul.f32 0.17677669, %v3641_v25  ;;  %v5474_v56 = vpop.f32.mrb[89].mxu0  ;;  %v5686_v25 = vld [vmem:[#allocation5 + $0x144] ss:$16 sps:$4 sm:$0xff]  }
0x1dd1   :  { %v3644_v29 = vpop.f32.mrb[90].mxu0  ;;  %v5684_v56 = vld [vmem:[#allocation5 + $0x140] ss:$16 sps:$4 sm:$0xff]  }
0x1dd2   :  { %v5475_v31 = vpop.f32.mrb[91].mxu0  ;;  %v3650_v15 = vadd.f32 %v3648_v51, %v6208_v39  ;;  %v5689_v51 = vld [vmem:[#allocation5 + $0x14c] ss:$16 sps:$4 sm:$0xff]   ;;  %v5687_v29 = vld [vmem:[#allocation5 + $0x148] ss:$16 sps:$4 sm:$0xff]  }
0x1dd3   :  { %v5692_v31 = vld [vmem:[#allocation5 + $0x164] ss:$16 sps:$4 sm:$0xff]  }
0x1dd4   :  { %v3654_v23 = vsel %vm559_vm3, %v3650_v15, -inf }
0x1dd5   :  { %3655 = vmax.xlane.f32.xlu1 %v3654_v23  ;;  %v5690_v23 = vld [vmem:[#allocation5 + $0x160] ss:$16 sps:$4 sm:$0xff]  }
0x1de6   :  { %3723 = vrot.lane.b32.xlu1 %v6520_v27, %s5981_s12 }
0x1e2a   :  { %v3665_v39 = vpop.xlane.xlu0 %3664 }
0x1e62   :  { %v3656_v28 = vpop.xlane.xlu1 %3655 }
0x1e63   :  { %v3658_v63 = vsub.f32 %v3650_v15, %v3656_v28  ;;  %v5695_v15 = vld [vmem:[#allocation5 + $0x16c] ss:$16 sps:$4 sm:$0xff]   ;;  %v5693_v28 = vld [vmem:[#allocation5 + $0x168] ss:$16 sps:$4 sm:$0xff]  }
0x1e65   :  { %v3661_v8 = vmul.f32 1.442695, %v3658_v63  ;;  %v5696_v63 = vld [vmem:[#allocation5 + $0x180] ss:$16 sps:$4 sm:$0xff]  }
0x1e66   :  { %v3724_v49 = vpop.permute.xlu1 %3723 }
0x1e67   :  { %5838 = vpow2.f32 %v3661_v8  ;;  %v3729_v2 = vsel %vm587_vm2, %v3724_v49, 0  ;;  %v5698_v8 = vld [vmem:[#allocation5 + $0x184] ss:$16 sps:$4 sm:$0xff]   ;;  %v5699_v49 = vld [vmem:[#allocation5 + $0x188] ss:$16 sps:$4 sm:$0xff]  }
0x1e68   :  { %5483 = vmatpush3.bf16.msra.mxu0 %v3729_v2  ;;  %5840 = vrcp.f32 %v3665_v39  ;;  %v5701_v2 = vld [vmem:[#allocation5 + $0x18c] ss:$16 sps:$4 sm:$0xff]   ;;  %v5702_v39 = vld [vmem:[#allocation5 + $0x1a0] ss:$16 sps:$4 sm:$0xff]  }
0x1e69   :  { %4095 = vmatprep.subr.bf16.mxu0 %v5674_v1  ;;  %v5723_v1 = vld [vmem:[#allocation7 + $0x180] sm:$0xff]  }
0x1e71   :  { %v5839_v3 = vpop.eup %5838 }
0x1e72   :  { %v3666_v11 = vsel %vm559_vm3, %v5839_v3, 0.0  ;;  %v5841_v53 = vpop.eup %5840 }
0x1e73   :  { %3667 = vadd.xlane.f32.xlu0 %v3666_v11  ;;  %v3671_v27 = vmul.f32 %v5841_v53, %v5837_v7  ;;  %v5683_v7 = vld [vmem:[#allocation5 + $0x12c] ss:$16 sps:$4 sm:$0xff]   ;;  %v5705_v53 = vld [vmem:[#allocation5 + $0x1a8] ss:$16 sps:$4 sm:$0xff]  }
0x1e74   :  { %v5707_v11 = vld [vmem:[#allocation5 + $0x1ac] ss:$16 sps:$4 sm:$0xff]  }
0x1e75   :  { %v3673_v9 = vpack.c.bf16 %v3671_v27, %v3671_v27  ;;  %v5713_v27 = vld [vmem:[#allocation5 + $0x1cc] ss:$16 sps:$4 sm:$0xff]  }
0x1e89   :  { %3675 = vrot.lane.b32.xlu0 %v6515_v52, %s5981_s12 }
0x1f00   :  { %v3668_v26 = vpop.xlane.xlu0 %3667 }
0x1f01   :  { %5842 = vrcp.f32 %v3668_v26  ;;  %v5710_v26 = vld [vmem:[#allocation5 + $0x1c4] ss:$16 sps:$4 sm:$0xff]  }
0x1f04   :  { %v3676_v5 = vpop.permute.xlu0 %3675 }
0x1f05   :  { %v3681_v20 = vsel %vm587_vm2, %v3676_v5, 0  ;;  %v5708_v5 = vld [vmem:[#allocation5 + $0x1c0] ss:$16 sps:$4 sm:$0xff]  }
0x1f06   :  { %5477 = vmatpush3.bf16.msra.mxu1 %v3681_v20  ;;  %v5711_v20 = vld [vmem:[#allocation5 + $0x1c8] ss:$16 sps:$4 sm:$0xff]  }
0x1f07   :  { %5488 = vmatprep.subr.bf16.mxu1 %v5976_v4 }
0x1f09   :  { %5479 = vmatmul.mubr.msk.bf16.vlgmr.msra.gmra.mrb[88].mxu1 %vm559_vm3, %v3673_v9  ;;  %v5716_v9 = vld [vmem:[#allocation5 + $0x1e4] ss:$16 sps:$4 sm:$0xff]  }
0x1f0a   :  { %5492 = vmatprep.mubr.msk.bf16.mxu1 %vm5978_vm0, %v5976_v4  ;;  %5489 = vmatpush3.bf16.msra.mxu1 %v5670_v33 }
0x1f0b   :  { %v5843_v32 = vpop.eup %5842  ;;  %5490 = vmatprep.subr.bf16.mxu1 %v5976_v4 }
0x1f0c   :  { %v3672_v52 = vmul.f32 %v5843_v32, %v5839_v3  ;;  %v5704_v3 = vld [vmem:[#allocation5 + $0x1a4] ss:$16 sps:$4 sm:$0xff]   ;;  %v5719_v32 = vld [vmem:[#allocation5 + $0x1ec] ss:$16 sps:$4 sm:$0xff]  }
0x1f0e   :  { %v3674_v61 = vpack.c.bf16 %v3672_v52, %v3672_v52  ;;  %5491 = vmatpush3.bf16.msra.mxu1 %v5671_v13  ;;  %v5714_v52 = vld [vmem:[#allocation5 + $0x1e0] ss:$16 sps:$4 sm:$0xff]  }
0x1f0f   :  { %4138 = vmatprep.subr.bf16.mxu1 %v5677_v12  ;;  %v5725_v12 = vld [vmem:[#allocation7 + $0x1c8] sm:$0xff]  }
0x1f10   :  { %5485 = vmatmul.mubr.msk.bf16.vlgmr.msra.gmra.mrb[92].mxu0 %vm559_vm3, %v3674_v61  ;;  %v5717_v61 = vld [vmem:[#allocation5 + $0x1e8] ss:$16 sps:$4 sm:$0xff]  }
0x1f11   :  { %4127 = vmatprep.mubr.bf16.mxu0 %v5977_v30  ;;  %4096 = vmatpush1.bf16.msra.mxu0 %v5672_v0  ;;  %v5722_v0 = vld [vmem:[#allocation7 + $0x100] sm:$0xff]  }
0x1f12   :  { %4097 = vmatprep.subr.bf16.mxu0 %v5680_v14  ;;  %v5726_v14 = vld [vmem:[#allocation7 + $0x108] sm:$0xff]  }
0x1fdc   :  { %v3717_v34 = vpop.f32.mrb[88].mxu1 }
0x1fdd   :  { %v5480_v36 = vpop.f32.mrb[89].mxu1 }
0x1fde   :  { %v3720_v17 = vpop.f32.mrb[90].mxu1 }
0x1fdf   :  { %v5481_v37 = vpop.f32.mrb[91].mxu1 }
0x1fe3   :  { %v3765_v18 = vpop.f32.mrb[92].mxu0 }
0x1fe4   :  { %v3771_v38 = vpack.c.bf16 %v3765_v18, %v3717_v34  ;;  %v5486_v19 = vpop.f32.mrb[93].mxu0 }
0x1fe5   :  { %v3768_v40 = vpop.f32.mrb[94].mxu0 }
0x1fe6   :  { %v5487_v41 = vpop.f32.mrb[95].mxu0  ;;  %5493 = vmatmul.mubr.msk.bf16.vlgmr.msra.gmra.mrb[92].mxu1 %vm462_vm1, %v3771_v38  ;;  %v4921_v38 = vld [vmem:[%s6829_s8 + $0x1] ss:$0 sm:$0xff] }
0x1fe7   :  { %4170 = vmatprep.mubr.bf16.mxu1 %v5977_v30  ;;  %v5678_v30 = vld [vmem:[#allocation5 + $0x120] ss:$16 sps:$4 sm:$0xff]   ;;  %4139 = vmatpush1.bf16.msra.mxu1 %v5675_v6  ;;  %v5724_v6 = vld [vmem:[#allocation7 + $0x148] sm:$0xff]  }
0x1fe8   :  { %4140 = vmatprep.subr.bf16.mxu1 %v5683_v7  ;;  %4098 = vmatpush1.bf16.msra.mxu0 %v5678_v30  ;;  %v5727_v7 = vld [vmem:[#allocation7 + $0x188] sm:$0xff]   ;;  %v5728_v30 = vld [vmem:[#allocation7 + $0x150] sm:$0xff]  }
0x1fe9   :  { %4099 = vmatprep.subr.bf16.mxu0 %v5686_v25  ;;  %v5738_v25 = vld [vmem:[#allocation7 + $0x120] sm:$0xff]  }
0x1feb   :  { %4141 = vmatpush1.bf16.msra.mxu1 %v5681_v10  ;;  %v5729_v10 = vld [vmem:[#allocation7 + $0x1d0] sm:$0xff]  }
0x1fec   :  { %4142 = vmatprep.subr.bf16.mxu1 %v5689_v51  ;;  %4100 = vmatpush1.bf16.msra.mxu0 %v5684_v56  ;;  %v5739_v51 = vld [vmem:[#allocation7 + $0x1a0] sm:$0xff]   ;;  %v5740_v56 = vld [vmem:[#allocation7 + $0x168] sm:$0xff]  }
0x1fed   :  { %4101 = vmatprep.subr.bf16.mxu0 %v5692_v31  ;;  %v5742_v31 = vld [vmem:[#allocation7 + $0x128] sm:$0xff]  }
0x1fef   :  { %4143 = vmatpush1.bf16.msra.mxu1 %v5687_v29  ;;  %v5741_v29 = vld [vmem:[#allocation7 + $0x1e8] sm:$0xff]  }
0x1ff0   :  { %4144 = vmatprep.subr.bf16.mxu1 %v5695_v15  ;;  %4102 = vmatpush1.bf16.msra.mxu0 %v5690_v23  ;;  %v5743_v15 = vld [vmem:[#allocation7 + $0x1a8] sm:$0xff]   ;;  %v5744_v23 = vld [vmem:[#allocation7 + $0x170] sm:$0xff]  }
0x1ff1   :  { %4103 = vmatprep.subr.bf16.mxu0 %v5698_v8  ;;  %v5747_v8 = vld [vmem:[#allocation7 + $0x1b0] sm:$0xff]  }
0x1ff3   :  { %4145 = vmatpush1.bf16.msra.mxu1 %v5693_v28  ;;  %v5745_v28 = vld [vmem:[#allocation7 + $0x1f0] sm:$0xff]  }
0x1ff4   :  { %4146 = vmatprep.subr.bf16.mxu1 %v5701_v2  ;;  %4104 = vmatpush1.bf16.msra.mxu0 %v5696_v63  ;;  %v5746_v63 = vld [vmem:[#allocation7 + $0x130] sm:$0xff]   ;;  %v5749_v2 = vld [vmem:[#allocation7 + $0x1f8] sm:$0xff]  }
0x1ff5   :  { %4105 = vmatprep.subr.bf16.mxu0 %v5704_v3  ;;  %v5750_v3 = vld [vmem:[#allocation7 + $0x138] sm:$0xff]  }
0x1ff7   :  { %4147 = vmatpush1.bf16.msra.mxu1 %v5699_v49  ;;  %v5748_v49 = vld [vmem:[#allocation7 + $0x178] sm:$0xff]  }
0x1ff8   :  { %4148 = vmatprep.subr.bf16.mxu1 %v5707_v11  ;;  %4106 = vmatpush1.bf16.msra.mxu0 %v5702_v39  ;;  %v5751_v11 = vld [vmem:[#allocation7 + $0x1b8] sm:$0xff]   ;;  %v4923_v39 = vld [vmem:[%s6832_s11 + $0x4] sm:$0xf] }
0x1ff9   :  { %4107 = vmatprep.subr.bf16.mxu0 %v5710_v26  ;;  %v3926_v26 = vrot.slane %v4923_v39, %v6160_v57 }
0x1ffb   :  { %4149 = vmatpush1.bf16.msra.mxu1 %v5705_v53  ;;  %v3918_v53 = vrot.slane %v4923_v39, %v6164_v59 }
0x1ffc   :  { %4150 = vmatprep.subr.bf16.mxu1 %v5713_v27  ;;  %4108 = vmatpush1.bf16.msra.mxu0 %v5708_v5  ;;  %v3922_v27 = vrot.slane %v4923_v39, %v6154_v55  ;;  %v3930_v5 = vrot.slane %v4923_v39, %v1692_v43 }
0x1ffd   :  { %4109 = vmatprep.subr.bf16.mxu0 %v5716_v9 }
0x1fff   :  { %4151 = vmatpush1.bf16.msra.mxu1 %v5711_v20 }
0x2000   :  { %4152 = vmatprep.subr.bf16.mxu1 %v5719_v32  ;;  %4110 = vmatpush1.bf16.msra.mxu0 %v5714_v52 }
0x2003   :  { %4153 = vmatpush1.bf16.msra.mxu1 %v5717_v61 }
0x20b9   :  { %v3825_v42 = vpop.f32.mrb[92].mxu1 }
0x20ba   :  { %v3832_v4 = vadd.f32 %v3825_v42, %v3545_v24  ;;  %v5494_v45 = vpop.f32.mrb[93].mxu1 }
0x20bb   :  { %v3828_v46 = vpop.f32.mrb[94].mxu1 }
0x20bc   :  { %v3833_v47 = vadd.f32 %v3828_v46, %v3546_v35  ;;  %v5495_v48 = vpop.f32.mrb[95].mxu1  ;;  %v3834_v58 = vadd.f32 %v3832_v4, %v6490_v16  ;;  %v4922_v4 = vld [vmem:[%s6830_s9 + $0x1] ss:$0 sm:$0xff] }
0x20be   :  { %3840 = vadd.xlane.f32.xlu1 %v3834_v58  ;;  %v3835_v60 = vadd.f32 %v3833_v47, %v6492_v44 }
0x20c0   :  { %3842 = vadd.xlane.f32.xlu0 %v3835_v60 }
0x214b   :  { %v3841_v16 = vpop.xlane.xlu1 %3840 }
0x214c   :  { %v3844_v22 = vmul.f32 0.0078125, %v3841_v16  ;;  %v5730_v16 = vld [vmem:[#allocation7 + $0x110] sm:$0xff]  }
0x214d   :  { %v3843_v44 = vpop.xlane.xlu0 %3842 }
0x214e   :  { %v6721_v24 = vsub.f32 %v3834_v58, %v3844_v22  ;;  %v3845_v50 = vmul.f32 0.0078125, %v3843_v44  ;;  %v5720_v58 = vld [vmem:[#allocation7 + $0x140] sm:$0xff]   ;;  %v5731_v22 = vld [vmem:[#allocation7 + $0x190] sm:$0xff]   ;;  %v5732_v44 = vld [vmem:[#allocation7 + $0x158] sm:$0xff]  }
0x214f   :  { %5156 = vmatprep.subr.bf16.mxu0 %v5720_v58 }
0x2150   :  { %v6723_v62 = vsub.f32 %v3835_v60, %v3845_v50  ;;  %v3848_v35 = vmul.f32 %v6721_v24, %v6721_v24  ;;  %v5721_v60 = vld [vmem:[#allocation7 + $0x1c0] sm:$0xff]   ;;  %v5734_v50 = vld [vmem:[#allocation7 + $0x118] sm:$0xff]  }
0x2151   :  { %5178 = vmatprep.subr.bf16.mxu1 %v5721_v60 }
0x2152   :  { %3850 = vadd.xlane.f32.xlu0 %v3848_v35  ;;  %v3849_v21 = vmul.f32 %v6723_v62, %v6723_v62  ;;  %v5736_v35 = vld [vmem:[#allocation7 + $0x160] sm:$0xff]  }
0x2154   :  { %3852 = vadd.xlane.f32.xlu1 %v3849_v21  ;;  %v5737_v21 = vld [vmem:[#allocation7 + $0x1e0] sm:$0xff]  }
0x21df   :  { %v3851_v33 = vpop.xlane.xlu0 %3850 }
0x21e0   :  { %v3854_v13 = vmul.f32 0.0078125, %v3851_v33 }
0x21e1   :  { %v3853_v34 = vpop.xlane.xlu1 %3852 }
0x21e2   :  { %v3856_v36 = vadd.f32 1e-12, %v3854_v13  ;;  %v3855_v17 = vmul.f32 0.0078125, %v3853_v34 }
0x21e4   :  { %5844 = vrsqrt.f32 %v3856_v36  ;;  %v3857_v37 = vadd.f32 1e-12, %v3855_v17 }
0x21e6   :  { %5846 = vrsqrt.f32 %v3857_v37 }
0x21ee   :  { %v5845_v18 = vpop.eup %5844 }
0x21ef   :  { %v3860_v19 = vmul.f32 %v5845_v18, %v6721_v24  ;;  %v5733_v24 = vld [vmem:[#allocation7 + $0x1d8] sm:$0xff]  }
0x21f0   :  { %v5847_v40 = vpop.eup %5846 }
0x21f1   :  { %v3861_v41 = vmul.f32 %v5847_v40, %v6723_v62  ;;  %v3868_v42 = vmul.f32 %v4921_v38, %v3860_v19  ;;  %v5735_v62 = vld [vmem:[#allocation7 + $0x198] sm:$0xff]  }
0x21f3   :  { %v3869_v45 = vmul.f32 %v4921_v38, %v3861_v41  ;;  %v6737_v46 = vadd.f32 %v4922_v4, %v3868_v42 }
0x21f5   :  { %v6739_v47 = vadd.f32 %v4922_v4, %v3869_v45 }
0x21f7   :  { %v3878_v48 = vpack.c.bf16 %v6739_v47, %v6737_v46 }
0x21f9   :  { %4128 = vmatmul.mubr.bf16.vlgmr.msra.gmra.mrb[96].mxu0 %v3878_v48  ;;  %4171 = vmatmul.mubr.bf16.vlgmr.msra.gmra.mrb[96].mxu1 %v3878_v48 }
0x21fa   :  { %5157 = vmatpush3.bf16.msra.mxu0 %v5722_v0  ;;  %5179 = vmatpush3.bf16.msra.mxu1 %v5723_v1 }
0x21fb   :  { %5158 = vmatprep.subr.bf16.mxu0 %v5724_v6  ;;  %5180 = vmatprep.subr.bf16.mxu1 %v5725_v12 }
0x21fe   :  { %5159 = vmatpush3.bf16.msra.mxu0 %v5726_v14  ;;  %5181 = vmatpush3.bf16.msra.mxu1 %v5727_v7 }
0x21ff   :  { %5160 = vmatprep.subr.bf16.mxu0 %v5728_v30  ;;  %5182 = vmatprep.subr.bf16.mxu1 %v5729_v10 }
0x2202   :  { %5161 = vmatpush3.bf16.msra.mxu0 %v5730_v16  ;;  %5183 = vmatpush3.bf16.msra.mxu1 %v5731_v22 }
0x2203   :  { %5162 = vmatprep.subr.bf16.mxu0 %v5732_v44  ;;  %5184 = vmatprep.subr.bf16.mxu1 %v5733_v24 }
0x2206   :  { %5163 = vmatpush3.bf16.msra.mxu0 %v5734_v50  ;;  %5185 = vmatpush3.bf16.msra.mxu1 %v5735_v62 }
0x2207   :  { %5164 = vmatprep.subr.bf16.mxu0 %v5736_v35  ;;  %5186 = vmatprep.subr.bf16.mxu1 %v5737_v21 }
0x220a   :  { %5165 = vmatpush3.bf16.msra.mxu0 %v5738_v25  ;;  %5187 = vmatpush3.bf16.msra.mxu1 %v5739_v51 }
0x220b   :  { %5166 = vmatprep.subr.bf16.mxu0 %v5740_v56  ;;  %5188 = vmatprep.subr.bf16.mxu1 %v5741_v29 }
0x220e   :  { %5167 = vmatpush3.bf16.msra.mxu0 %v5742_v31  ;;  %5189 = vmatpush3.bf16.msra.mxu1 %v5743_v15 }
0x220f   :  { %5168 = vmatprep.subr.bf16.mxu0 %v5744_v23  ;;  %5190 = vmatprep.subr.bf16.mxu1 %v5745_v28 }
0x2212   :  { %5169 = vmatpush3.bf16.msra.mxu0 %v5746_v63  ;;  %5191 = vmatpush3.bf16.msra.mxu1 %v5747_v8 }
0x2213   :  { %5170 = vmatprep.subr.bf16.mxu0 %v5748_v49  ;;  %5192 = vmatprep.subr.bf16.mxu1 %v5749_v2 }
0x2216   :  { %5171 = vmatpush3.bf16.msra.mxu0 %v5750_v3  ;;  %5193 = vmatpush3.bf16.msra.mxu1 %v5751_v11 }
0x22cc   :  { %v4129_v20 = vpop.f32.mrb[96].mxu0  ;;  %v4172_v9 = vpop.f32.mrb[96].mxu1 }
0x22cd   :  { %v6751_v32 = vadd.f32 %v4129_v20, %v3918_v53  ;;  %v6753_v52 = vadd.f32 %v4172_v9, %v3926_v26  ;;  %v4131_v61 = vpop.f32.mrb[97].mxu0  ;;  %v4174_v33 = vpop.f32.mrb[97].mxu1 }
0x22ce   :  { %v6755_v13 = vadd.f32 %v4131_v61, %v3922_v27  ;;  %v6757_v34 = vadd.f32 %v4174_v33, %v3930_v5  ;;  %v4133_v36 = vpop.f32.mrb[98].mxu0  ;;  %v4176_v17 = vpop.f32.mrb[98].mxu1 }
0x22cf   :  { %v4189_v57 = vmul.f32 0.044715, %v6751_v32  ;;  %v4191_v37 = vmul.f32 0.044715, %v6753_v52  ;;  %v4134_v54 = vadd.f32 %v4133_v36, %v3918_v53  ;;  %v4177_v43 = vadd.f32 %v4176_v17, %v3926_v26  ;;  %v4135_v18 = vpop.f32.mrb[99].mxu0  ;;  %v4178_v38 = vpop.f32.mrb[99].mxu1 }
0x22d0   :  { %v4190_v19 = vmul.f32 0.044715, %v6755_v13  ;;  %v4192_v40 = vmul.f32 0.044715, %v6757_v34  ;;  %v6763_v41 = vadd.f32 %v4135_v18, %v3922_v27  ;;  %v6765_v42 = vadd.f32 %v4178_v38, %v3930_v5 }
0x22d1   :  { %v4197_v4 = vmul.f32 %v4189_v57, %v6751_v32  ;;  %v4199_v45 = vmul.f32 %v4191_v37, %v6753_v52  ;;  %v4193_v48 = vmul.f32 0.044715, %v4134_v54  ;;  %v4195_v58 = vmul.f32 0.044715, %v4177_v43 }
0x22d2   :  { %v4198_v60 = vmul.f32 %v4190_v19, %v6755_v13  ;;  %v4200_v0 = vmul.f32 %v4192_v40, %v6757_v34  ;;  %v4194_v1 = vmul.f32 0.044715, %v6763_v41  ;;  %v4196_v6 = vmul.f32 0.044715, %v6765_v42 }
0x22d3   :  { %v4205_v12 = vmul.f32 %v4197_v4, %v6751_v32  ;;  %v4207_v14 = vmul.f32 %v4199_v45, %v6753_v52  ;;  %v4201_v7 = vmul.f32 %v4193_v48, %v4134_v54  ;;  %v4203_v30 = vmul.f32 %v4195_v58, %v4177_v43 }
0x22d4   :  { %v4206_v10 = vmul.f32 %v4198_v60, %v6755_v13  ;;  %v4208_v16 = vmul.f32 %v4200_v0, %v6757_v34  ;;  %v4202_v22 = vmul.f32 %v4194_v1, %v6763_v41  ;;  %v4204_v44 = vmul.f32 %v4196_v6, %v6765_v42 }
0x22d5   :  { %v4213_v24 = vadd.f32 %v4205_v12, %v6751_v32  ;;  %v4215_v50 = vadd.f32 %v4207_v14, %v6753_v52  ;;  %v4209_v62 = vmul.f32 %v4201_v7, %v4134_v54  ;;  %v4211_v35 = vmul.f32 %v4203_v30, %v4177_v43 }
0x22d6   :  { %v4210_v21 = vmul.f32 %v4202_v22, %v6763_v41  ;;  %v4212_v25 = vmul.f32 %v4204_v44, %v6765_v42  ;;  %v4214_v15 = vadd.f32 %v4206_v10, %v6755_v13  ;;  %v4216_v8 = vadd.f32 %v4208_v16, %v6757_v34 }
0x22d7   :  { %v4221_v51 = vmul.f32 0.7978846, %v4213_v24  ;;  %v4223_v56 = vmul.f32 0.7978846, %v4215_v50  ;;  %v4217_v29 = vadd.f32 %v4209_v62, %v4134_v54  ;;  %v4219_v31 = vadd.f32 %v4211_v35, %v4177_v43 }
0x22d8   :  { %v4218_v23 = vadd.f32 %v4210_v21, %v6763_v41  ;;  %v4222_v49 = vmul.f32 0.7978846, %v4214_v15  ;;  %v4220_v3 = vadd.f32 %v4212_v25, %v6765_v42  ;;  %v4224_v11 = vmul.f32 0.7978846, %v4216_v8 }
0x22d9   :  { %5848 = vtanh.f32 %v4221_v51  ;;  %v4225_v28 = vmul.f32 0.7978846, %v4217_v29  ;;  %v4227_v63 = vmul.f32 0.7978846, %v4219_v31  ;;  %v4181_v61 = vmul.f32 0.5, %v6751_v32 }
0x22da   :  { %5850 = vtanh.f32 %v4223_v56  ;;  %v4226_v2 = vmul.f32 0.7978846, %v4218_v23  ;;  %v4228_v39 = vmul.f32 0.7978846, %v4220_v3  ;;  %v4185_v33 = vmul.f32 0.5, %v4134_v54 }
0x22db   :  { %5852 = vtanh.f32 %v4225_v28  ;;  %v4183_v57 = vmul.f32 0.5, %v6753_v52  ;;  %v4187_v37 = vmul.f32 0.5, %v4177_v43  ;;  %v4182_v19 = vmul.f32 0.5, %v6755_v13 }
0x22dc   :  { %5854 = vtanh.f32 %v4227_v63  ;;  %v4186_v58 = vmul.f32 0.5, %v6763_v41  ;;  %v4184_v54 = vmul.f32 0.5, %v6757_v34  ;;  %v4188_v6 = vmul.f32 0.5, %v6765_v42  ;;  %v4957_v34 = vld [vmem:[%s6834_s13 + $0x1] ss:$0 sm:$0xff] }
0x22dd   :  { %5856 = vtanh.f32 %v4222_v49 }
0x22de   :  { %5858 = vtanh.f32 %v4226_v2 }
0x22df   :  { %5860 = vtanh.f32 %v4224_v11 }
0x22e0   :  { %5862 = vtanh.f32 %v4228_v39 }
0x22e3   :  { %v5849_v53 = vpop.eup %5848 }
0x22e4   :  { %v5851_v26 = vpop.eup %5850  ;;  %v4237_v27 = vadd.f32 1.0, %v5849_v53 }
0x22e5   :  { %v5853_v5 = vpop.eup %5852  ;;  %v4239_v20 = vadd.f32 1.0, %v5851_v26 }
0x22e6   :  { %v5855_v9 = vpop.eup %5854  ;;  %v4241_v36 = vadd.f32 1.0, %v5853_v5  ;;  %v4245_v4 = vmul.f32 %v4237_v27, %v4181_v61  ;;  %v5872_v5 = vld [vmem:[%s6822_s1] sm:$0x3] }
0x22e7   :  { %v5857_v17 = vpop.eup %5856  ;;  %v4243_v18 = vadd.f32 1.0, %v5855_v9  ;;  %v4247_v0 = vmul.f32 %v4239_v20, %v4183_v57  ;;  %v4651_v20 = vrot.slane %v5872_v5, %v6164_v59  ;;  %v4993_v59 = vld [vmem:[%s6836_s15 + $0x1] ss:$0 sm:$0xff] }
0x22e8   :  { %v5859_v38 = vpop.eup %5858  ;;  %v4238_v40 = vadd.f32 1.0, %v5857_v17  ;;  %v4249_v45 = vmul.f32 %v4241_v36, %v4185_v33 }
0x22e9   :  { %v5861_v48 = vpop.eup %5860  ;;  %v4242_v60 = vadd.f32 1.0, %v5859_v38  ;;  %v4251_v1 = vmul.f32 %v4243_v18, %v4187_v37  ;;  %v4992_v38 = vld [vmem:[%s6835_s14 + $0x1] ss:$0 sm:$0xff]  ;;  %s5982_s14 = smov [#allocation8]  }
0x22ea   :  { %v5863_v32 = vpop.eup %5862  ;;  %v4240_v52 = vadd.f32 1.0, %v5861_v48  ;;  %v4253_v43 = vpack.c.bf16 %v4249_v45, %v4245_v4  ;;  %v4246_v12 = vmul.f32 %v4238_v40, %v4182_v19  ;;  %s4702_s15 = sshll.u32 %s5982_s14, 4  ;;  %s4703_s15 = int_to_ptr.vmem [resolvable:$true] %s4702_s15 }
0x22eb   :  { %v4250_v14 = vmul.f32 %v4242_v60, %v4186_v58  ;;  %v4244_v7 = vadd.f32 1.0, %v5863_v32  ;;  %v4255_v13 = vpack.c.bf16 %v4251_v1, %v4247_v0  ;;  %s5939_s29 = scalar_lea.vmem %s4703_s15, 32  ;;  %p5944_p11 = scmp.lt.s32.totalorder %s4703_s15, %s4703_s15 }
0x22ec   :  { %v4248_v10 = vmul.f32 %v4240_v52, %v4184_v54  ;;  %p5940_p10 = scmp.ne.s32.totalorder %s4703_s15, %s5939_s29  ;;  %p5945_p12 = scmp.lt.s32.totalorder %s5939_s29, %s5939_s29 }
0x22ed   :  { %v4254_v30 = vpack.c.bf16 %v4250_v14, %v4246_v12  ;;  %v4252_v16 = vmul.f32 %v4244_v7, %v4188_v6 }
0x22ee   :  { %p5946_p13 = por %p5945_p12, %p5944_p11 }
0x22ef   :  { %4554 = vmatprep.mubr.bf16.mxu0 %v4254_v30  ;;  %v4256_v22 = vpack.c.bf16 %v4252_v16, %v4248_v10 }
0x22f0   :  { %4555 = vmatmul.mubr.bf16.vlgmr.msra.gmra.mrb[100].mxu0 %v4253_v43  ;;  %p5947_p0 = pnand %p5946_p13, %p5940_p10 }
0x22f1   :  { %4595 = vmatprep.mubr.bf16.mxu1 %v4256_v22 }
0x22f2   :  { %4596 = vmatmul.mubr.bf16.vlgmr.msra.gmra.mrb[100].mxu1 %v4255_v13 }
0x23c3   :  { %v5172_v41 = vpop.f32.mrb[100].mxu0 }
0x23c4   :  { %v5173_v42 = vpop.f32.mrb[101].mxu0 }
0x23c5   :  { %v5194_v44 = vpop.f32.mrb[100].mxu1  ;;  %v5174_v24 = vadd.f32 %v5173_v42, %v5172_v41  ;;  %v5175_v50 = vpop.f32.mrb[102].mxu0 }
0x23c6   :  { %v5195_v62 = vpop.f32.mrb[101].mxu1  ;;  %v5176_v35 = vpop.f32.mrb[103].mxu0 }
0x23c7   :  { %v4557_v21 = vadd.f32 %v5174_v24, %v4957_v34  ;;  %v5196_v25 = vadd.f32 %v5195_v62, %v5194_v44  ;;  %v5197_v51 = vpop.f32.mrb[102].mxu1  ;;  %v5177_v56 = vadd.f32 %v5176_v35, %v5175_v50 }
0x23c8   :  { %v5198_v29 = vpop.f32.mrb[103].mxu1 }
0x23c9   :  { %v4598_v31 = vadd.f32 %v5196_v25, %v4557_v21  ;;  %v4560_v15 = vadd.f32 %v5177_v56, %v4957_v34  ;;  %v5199_v23 = vadd.f32 %v5198_v29, %v5197_v51 }
0x23cb   :  { %v4601_v28 = vadd.f32 %v5199_v23, %v4560_v15  ;;  %v4604_v63 = vadd.f32 %v4598_v31, %v6737_v46  ;;  %v4677_v46 = vsel %vm4676_vm4, %v5872_v5, 0.0 }
0x23cd   :  { %4610 = vadd.xlane.f32.xlu1 %v4604_v63  ;;  %v4605_v8 = vadd.f32 %v4601_v28, %v6739_v47  ;;  %v4658_v47 = vrot.slane %v5872_v5, %v6154_v55 }
0x23cf   :  { %4612 = vadd.xlane.f32.xlu0 %v4605_v8 }
0x245a   :  { %v4611_v49 = vpop.xlane.xlu1 %4610 }
0x245b   :  { %v4614_v2 = vmul.f32 0.0078125, %v4611_v49 }
0x245c   :  { %v4613_v3 = vpop.xlane.xlu0 %4612 }
0x245d   :  { %v4616_v11 = vsub.f32 %v4604_v63, %v4614_v2  ;;  %v4615_v39 = vmul.f32 0.0078125, %v4613_v3 }
0x245f   :  { %v4617_v53 = vsub.f32 %v4605_v8, %v4615_v39  ;;  %v4618_v26 = vmul.f32 %v4616_v11, %v4616_v11 }
0x2461   :  { %4620 = vadd.xlane.f32.xlu1 %v4618_v26  ;;  %v4619_v27 = vmul.f32 %v4617_v53, %v4617_v53 }
0x2463   :  { %4622 = vadd.xlane.f32.xlu0 %v4619_v27 }
0x2467   :  { %4678 = vadd.xlane.f32.xlu0 %v4677_v46 }
0x2472   :  { %4660 = vbcast.lane.b32.xlu1 %v4658_v47, 256 }
0x247d   :  { %4653 = vbcast.lane.b32.xlu0 %v4651_v20, 256 }
0x24ee   :  { %v4621_v9 = vpop.xlane.xlu1 %4620 }
0x24ef   :  { %v4624_v61 = vmul.f32 0.0078125, %v4621_v9 }
0x24f0   :  { %v4623_v33 = vpop.xlane.xlu0 %4622 }
0x24f1   :  { %v4626_v36 = vadd.f32 1e-12, %v4624_v61  ;;  %v4625_v17 = vmul.f32 0.0078125, %v4623_v33 }
0x24f2   :  { %v4661_v1 = vpop.permute.xlu1 %4660 }
0x24f3   :  { %5864 = vrsqrt.f32 %v4626_v36  ;;  %v4627_v57 = vadd.f32 1e-12, %v4625_v17 }
0x24f4   :  { %v4679_v37 = vpop.xlane.xlu0 %4678 }
0x24f5   :  { %5866 = vrsqrt.f32 %v4627_v57  ;;  %v4680_v40 = vmax.f32 %v4679_v37, 1e-09 }
0x24f7   :  { %v4682_v0 = vrot.slane %v4680_v40, 1 }
0x24f8   :  { %v4654_v48 = vpop.permute.xlu0 %4653 }
0x24f9   :  { %5868 = vrcp.f32 %v4682_v0 }
0x24fa   :  { %5870 = vrcp.f32 %v4680_v40 }
0x24fd   :  { %v5865_v18 = vpop.eup %5864 }
0x24fe   :  { %v4630_v19 = vmul.f32 %v5865_v18, %v4616_v11 }
0x24ff   :  { %v5867_v55 = vpop.eup %5866 }
0x2500   :  { %v4638_v4 = vmul.f32 %v4992_v38, %v4630_v19  ;;  %v4631_v45 = vmul.f32 %v5867_v55, %v4617_v53 }
0x2502   :  { %v4646_v58 = vadd.f32 %v4993_v59, %v4638_v4  ;;  %v4639_v60 = vmul.f32 %v4992_v38, %v4631_v45 }
0x2503   :  { %v5869_v41 = vpop.eup %5868 }
0x2504   :  { %v4662_v32 = vmul.f32 %v4654_v48, %v4646_v58  ;;  %v4647_v54 = vadd.f32 %v4993_v59, %v4639_v60  ;;  %v5871_v44 = vpop.eup %5870 }
0x2506   :  { %v4664_v6 = vrot.slane %v4662_v32, 4  ;;  %v4663_v52 = vmul.f32 %v4661_v1, %v4647_v54 }
0x2508   :  { %v4665_v43 = vadd.f32 %v4664_v6, %v4662_v32  ;;  %v4670_v12 = vrot.slane %v4663_v52, 4 }
0x250a   :  { %v4666_v14 = vrot.slane %v4665_v43, 2  ;;  %v4671_v7 = vadd.f32 %v4670_v12, %v4663_v52 }
0x250c   :  { %v4667_v13 = vadd.f32 %v4666_v14, %v4665_v43  ;;  %v4672_v30 = vrot.slane %v4671_v7, 2 }
0x250e   :  { %v4668_v10 = vrot.slane %v4667_v13, 1  ;;  %v4673_v16 = vadd.f32 %v4672_v30, %v4671_v7 }
0x2510   :  { %v4674_v22 = vrot.slane %v4673_v16, 1  ;;  %v4669_v34 = vadd.f32 %v4668_v10, %v4667_v13 }
0x2512   :  { %v4675_v42 = vadd.f32 %v4674_v22, %v4673_v16  ;;  %v4686_v50 = vmul.f32 %v5871_v44, %v4669_v34 }
0x2514   :  { %v4688_v24 = vmul.f32 %v5869_v41, %v4675_v42 }
0x2516   :  { %v4691_v62 = vrot.slane %v4688_v24, 7 }
0x2518   :  { %v4693_v35 = vsel %vm4692_vm5, %v4691_v62, %v4686_v50 }
0x2519   :  { %4695 = vst [vmem:[#allocation8] sm:$0x3] %v4693_v35 }
0x251a   :  { %5950 = shalt.err (!%p5947_p0)
}
0x251b   :  { %s5951_s30 = scalar_lea.hbm %s6837_s16, 32 }
0x251c   :  { %p5952_p1 = scmp.ne.s32.totalorder %s6837_s16, %s5951_s30  ;;  %p5955_p2 = scmp.lt.u32.totalorder %s5951_s30, %s6837_s16 }
0x251e   :  { %p5957_p3 = pnand %p5955_p2, %p5952_p1 }
0x2520   :  { %5960 = shalt.err (!%p5957_p3)
}
0x2521   :  { %4705 = dma.vmem_to_hbm [thread:$0]  %s4703_s15, 32, %s6837_s16, [#allocation4]  }
0x2522   :  { %5965 = dma.done.wait [#allocation4], 32  }
0x2523   :  { %5966 = vsyncadd [#allocation4], 4294967264 }
0x2524   :  { %4709 = vsyncpa [#allocation3], 1 }
0x2525   :  { %4710 = vsyncpa [#allocation6], 1 }
0x2526   :  { %4711 = vsyncpa [#allocation4], 1 }

</bundles_post_ra>
